<compile_context>
chip_gen: v7x
topology: tpu7x:2x2x1
jax: 0.10.0
libtpu: 0.0.40
codegen_flags: <defaults>
</compile_context>

<pallas_src>
import jax
import jax.numpy as jnp
from jax import lax
from jax.experimental import pallas as pl
from jax.experimental.pallas import tpu as pltpu

# ----------------- small synthetic config -----------------
B = 2
NUM_CAMS = 2
IMG_C, IMG_H, IMG_W = 3, 16, 16
PATCH = 8
PATCHES_PER_IMG = (IMG_H // PATCH) * (IMG_W // PATCH)      # 4
NUM_IMG_TOKENS = NUM_CAMS * PATCHES_PER_IMG                # 8 per batch
PATCH_DIM = IMG_C * PATCH * PATCH                          # 192
LANG_LEN = 8
VOCAB = 32
D = 32                 # shared hidden width (synthetic)
H = 4                  # attention heads
HD = D // H            # 8
HEAD_HALF = HD // 2    # 4
D_HALF = D // 2        # 16
MLP = 64
N_ACTION_STEPS = 8
MAX_ACTION_DIM = 8
STATE_DIM = MAX_ACTION_DIM
PREFIX_LEN = NUM_IMG_TOKENS + LANG_LEN                     # 16 per batch
SUFFIX_LEN = 1 + N_ACTION_STEPS                            # 9 per batch
NEG_INF = -1e30
OUT_PAD = 128                                              # lane-dense output width

# lane offsets inside the packed per-suffix-row slab (batch-size independent)
SFX_OFF_RAW = 0
SFX_OFF_SEL = SFX_OFF_RAW + 2 * MAX_ACTION_DIM             # 16
SFX_OFF_COS = SFX_OFF_SEL + D                              # 48
SFX_OFF_SIN = SFX_OFF_COS + D                              # 80
SFX_OFF_BIAS = SFX_OFF_SIN + D                             # 112

# grouped-halves lane permutation for q/k columns (applied once at fuse time):
# new lane 4h+j   <- old lane 8h+j      (head h, first half,  freq j)
# new lane 16+4h+j<- old lane 8h+4+j    (head h, second half, freq j)
_QK_PERM = tuple([h * HD + j for h in range(H) for j in range(HEAD_HALF)]
                 + [h * HD + HEAD_HALF + j for h in range(H) for j in range(HEAD_HALF)])


# ----------------- packed weight-slab layouts -----------------
def _make_wm_layout():
    order = [
        ("patch_w", PATCH_DIM, D),
        ("w_sfx", 2 * MAX_ACTION_DIM, D),
        ("atm_in_wa", D, D),
        ("atm_out_w", D, D),
        ("pg_wkv", D, 2 * D),
        ("ex_wqkv", D, 3 * D),
        ("ex_wo", D, D),
        ("ex_wmi", D, MLP),
        ("ex_wmo", MLP, D),
        ("w_act", D, OUT_PAD),
    ]
    layout, off = {}, 0
    for name, r, c in order:
        layout[name] = (off, r, c)
        off += r
    rows = ((off + 7) // 8) * 8
    return layout, rows


def _make_wv_layout():
    order = [
        ("patch_b", D), ("pg_ln1", D), ("pg_bkv", 2 * D),
        ("b_action", D), ("b_sfx_diff", D), ("atm_time_bias", D),
        ("atm_out_b", D),
        ("ex_ln1", D), ("ex_ln2", D), ("ex_lnf", D),
        ("ex_bqkv", 3 * D), ("ex_bo", D), ("ex_bmi", MLP), ("ex_bmo", D),
        ("b_act", OUT_PAD),
    ]
    layout = {name: (i, c) for i, (name, c) in enumerate(order)}
    rows = ((len(order) + 7) // 8) * 8
    return layout, rows


_WM_LAYOUT, WM_ROWS = _make_wm_layout()
_WV_LAYOUT, WV_ROWS = _make_wv_layout()


# ----------------- in-kernel helpers -----------------
def _rms(x, g):
    var = jnp.mean(jnp.square(x), axis=-1, keepdims=True)
    return x * lax.rsqrt(var + 1e-6) * (1.0 + g)


def _rot_half(x):
    # grouped-halves layout: partner lane of l is (l + D/2) mod D -> one 16-lane swap
    return jnp.concatenate([x[:, D_HALF:], x[:, :D_HALF]], axis=-1)


# ----------------- the single fused Pallas kernel -----------------
def _pi0_fused_kernel(pfx_img_ref, pfx_lang_ref, sfx_ref, ropek_ref,
                      wm_ref, wv_ref, out_ref, kv_ref):
    f32 = jnp.float32

    def WM(name):                       # static slab slices: zero runtime cost
        off, r, c = _WM_LAYOUT[name]
        return wm_ref[off:off + r, 0:c]

    def WV(name):
        row, c = _WV_LAYOUT[name]
        return wv_ref[row:row + 1, 0:c]

    n_img = pfx_img_ref.shape[0]                    # B * NUM_IMG_TOKENS
    n_pfx = n_img + pfx_lang_ref.shape[0]           # B * PREFIX_LEN
    kv_len = ropek_ref.shape[0]                     # B * (PREFIX_LEN + SUFFIX_LEN)

    # ---------- prefix: patch embedding + KV cache (PaliGemma stand-in) ----------
    # (prefix self-attention output is discarded by the reference forward;
    #  only the KV cache feeds the suffix pass, so only K/V are built)
    pg_ln1, pg_wkv, pg_bkv = WV("pg_ln1"), WM("pg_wkv"), WV("pg_bkv")
    img_e = (jnp.dot(pfx_img_ref[...], WM("patch_w"), preferred_element_type=f32)
             + WV("patch_b"))
    kv_ref[0:n_img, :] = (jnp.dot(_rms(img_e, pg_ln1), pg_wkv,
                                  preferred_element_type=f32) + pg_bkv)
    kv_ref[n_img:n_pfx, :] = (jnp.dot(_rms(pfx_lang_ref[...], pg_ln1), pg_wkv,
                                      preferred_element_type=f32) + pg_bkv)

    # ---------- suffix embeddings (state/action + constant-folded time MLP) ----------
    raw = sfx_ref[:, SFX_OFF_RAW:SFX_OFF_RAW + 2 * MAX_ACTION_DIM]
    sel = sfx_ref[:, SFX_OFF_SEL:SFX_OFF_SEL + D]
    cos_q = sfx_ref[:, SFX_OFF_COS:SFX_OFF_COS + D]
    sin_q = sfx_ref[:, SFX_OFF_SIN:SFX_OFF_SIN + D]
    bias = sfx_ref[:, SFX_OFF_BIAS:SFX_OFF_BIAS + kv_len]

    e = (jnp.dot(raw, WM("w_sfx"), preferred_element_type=f32)
         + WV("b_action") + sel * WV("b_sfx_diff"))
    atm = jax.nn.silu(jnp.dot(e, WM("atm_in_wa"), preferred_element_type=f32)
                      + WV("atm_time_bias"))
    atm = jnp.dot(atm, WM("atm_out_w"), preferred_element_type=f32) + WV("atm_out_b")
    x = atm + sel * (e - atm)                       # state token keeps e, action tokens use atm

    # ---------- expert layer: fused QKV, suffix KV into cache, full-width RoPE ----------
    xn = _rms(x, WV("ex_ln1"))
    qkv = jnp.dot(xn, WM("ex_wqkv"), preferred_element_type=f32) + WV("ex_bqkv")
    kv_ref[n_pfx:kv_len, :] = qkv[:, D:3 * D]       # suffix K|V appended to the cache

    kv_all = kv_ref[...]
    k_raw = kv_all[:, 0:D]
    v_all = kv_all[:, D:2 * D]
    cos_k = ropek_ref[:, 0:D]
    sin_k = ropek_ref[:, D:2 * D]

    q_raw = qkv[:, 0:D]
    q_rot = q_raw * cos_q + _rot_half(q_raw) * sin_q          # sin tables are sign-folded
    k_rot = k_raw * cos_k + _rot_half(k_raw) * sin_k

    scale = 1.0 / (HD ** 0.5)
    nt = (((1,), (1,)), ((), ()))                   # contract last dims of both operands
    heads = []
    for h in range(H):                              # short unrolled head loop
        a = h * HEAD_HALF
        a2 = D_HALF + a
        s = (lax.dot_general(q_rot[:, a:a + HEAD_HALF], k_rot[:, a:a + HEAD_HALF],
                             nt, preferred_element_type=f32)
             + lax.dot_general(q_rot[:, a2:a2 + HEAD_HALF], k_rot[:, a2:a2 + HEAD_HALF],
                               nt, preferred_element_type=f32))
        s = s * scale + bias                        # single additive bias (pad + att + batch)
        m = jnp.max(s, axis=-1, keepdims=True)
        p = jnp.exp(s - m)
        inv = pl.reciprocal(jnp.sum(p, axis=-1, keepdims=True), approx=True)
        heads.append(jnp.dot(p, v_all[:, h * HD:(h + 1) * HD],
                             preferred_element_type=f32) * inv)

    attn = jnp.concatenate(heads, axis=-1)          # single Wo projection after the loop
    x = x + jnp.dot(attn, WM("ex_wo"), preferred_element_type=f32) + WV("ex_bo")

    xn2 = _rms(x, WV("ex_ln2"))
    hmid = jax.nn.gelu(jnp.dot(xn2, WM("ex_wmi"), preferred_element_type=f32)
                       + WV("ex_bmi"))
    x = x + jnp.dot(hmid, WM("ex_wmo"), preferred_element_type=f32) + WV("ex_bmo")
    out = _rms(x, WV("ex_lnf"))

    # composed (action_out_proj ∘ final_proj), padded to 128 lanes -> dense store
    out_ref[...] = (jnp.dot(out, WM("w_act"), preferred_element_type=f32) + WV("b_act"))


# ----------------- JAX glue -----------------
def make_att_2d_masks(pad_masks, att_masks):
    cumsum = jnp.cumsum(att_masks, axis=1)
    att_2d = cumsum[:, None, :] <= cumsum[:, :, None]
    pad_2d = pad_masks[:, None, :] & pad_masks[:, :, None]
    return att_2d & pad_2d


def sinusoidal_time_emb(t, dim):
    half = dim // 2
    freqs = jnp.exp(-jnp.log(10000.0) * jnp.arange(half, dtype=jnp.float32) / half)
    args = t[:, None] * freqs[None, :]
    return jnp.concatenate([jnp.sin(args), jnp.cos(args)], axis=-1)


def rope_full_tables(pos):
    """cos / sign-folded sin at full width D for the grouped-halves q/k layout."""
    inv_freq = 1.0 / (10000.0 ** (jnp.arange(HEAD_HALF, dtype=jnp.float32) / HEAD_HALF))
    ang = pos[:, None].astype(jnp.float32) * inv_freq[None, :]          # [N, 4]
    cos4, sin4 = jnp.cos(ang), jnp.sin(ang)
    cos_full = jnp.tile(cos4, (1, 2 * H))                               # [N, 32]
    sin_full = jnp.concatenate([-jnp.tile(sin4, (1, H)),
                                jnp.tile(sin4, (1, H))], axis=1)        # [N, 32]
    return cos_full, sin_full


# ----------------- parameters -----------------
def init_params(key):
    ks = iter(jax.random.split(key, 64))

    def w(*shape, scale=0.02):
        return jax.random.normal(next(ks), shape, jnp.float32) * scale

    def zeros(*shape):
        return jnp.zeros(shape, jnp.float32)

    def layer():
        return dict(
            ln1=zeros(1, D), ln2=zeros(1, D), ln_f=zeros(1, D),
            wq=w(D, D), wk=w(D, D), wv=w(D, D), wo=w(D, D),
            bq=zeros(1, D), bk=zeros(1, D), bv=zeros(1, D), bo=zeros(1, D),
            w_mlp_in=w(D, MLP), b_mlp_in=zeros(1, MLP),
            w_mlp_out=w(MLP, D), b_mlp_out=zeros(1, D),
        )

    return dict(
        patch_w=w(PATCH_DIM, D), patch_b=zeros(1, D),
        tok_embed=w(VOCAB, D, scale=1.0),
        state_w=w(STATE_DIM, D), state_b=zeros(1, D),
        action_in_w=w(MAX_ACTION_DIM, D), action_in_b=zeros(1, D),
        atm_in_w=w(2 * D, D), atm_in_b=zeros(1, D),
        atm_out_w=w(D, D), atm_out_b=zeros(1, D),
        pg=layer(),   # synthetic "PaliGemma" prefix layer
        ex=layer(),   # synthetic action-expert layer
        action_out_w=w(D, MAX_ACTION_DIM), action_out_b=zeros(1, MAX_ACTION_DIM),
        final_w=w(MAX_ACTION_DIM, MAX_ACTION_DIM), final_b=zeros(1, MAX_ACTION_DIM),
    )


def fuse_params(p):
    """One-time fusion: QKV/KV concat, grouped-halves q/k permutation, time-branch
    constant fold, action_out∘final composition, and packing into 2 slabs."""
    f32 = jnp.float32
    pg, ex = p["pg"], p["ex"]
    perm = jnp.array(_QK_PERM)

    # constant-fold the time branch (fixed_time == 0 in the one-step model)
    time_emb0 = sinusoidal_time_emb(jnp.zeros((1,), f32), D)            # [1, D]
    atm_time_bias = time_emb0 @ p["atm_in_w"][D:, :] + p["atm_in_b"]

    w_act = jnp.zeros((D, OUT_PAD), f32).at[:, :MAX_ACTION_DIM].set(
        p["action_out_w"] @ p["final_w"])
    b_act = jnp.zeros((1, OUT_PAD), f32).at[:, :MAX_ACTION_DIM].set(
        p["action_out_b"] @ p["final_w"] + p["final_b"])

    mats = dict(
        patch_w=p["patch_w"],
        w_sfx=jnp.concatenate([p["state_w"], p["action_in_w"]], axis=0),
        atm_in_wa=p["atm_in_w"][:D, :],
        atm_out_w=p["atm_out_w"],
        pg_wkv=jnp.concatenate([pg["wk"][:, perm], pg["wv"]], axis=1),
        ex_wqkv=jnp.concatenate([ex["wq"][:, perm], ex["wk"][:, perm], ex["wv"]], axis=1),
        ex_wo=ex["wo"],
        ex_wmi=ex["w_mlp_in"],
        ex_wmo=ex["w_mlp_out"],
        w_act=w_act,
    )
    vecs = dict(
        patch_b=p["patch_b"],
        pg_ln1=pg["ln1"],
        pg_bkv=jnp.concatenate([pg["bk"][:, perm], pg["bv"]], axis=1),
        b_action=p["action_in_b"],
        b_sfx_diff=p["state_b"] - p["action_in_b"],
        atm_time_bias=atm_time_bias,
        atm_out_b=p["atm_out_b"],
        ex_ln1=ex["ln1"], ex_ln2=ex["ln2"], ex_lnf=ex["ln_f"],
        ex_bqkv=jnp.concatenate([ex["bq"][:, perm], ex["bk"][:, perm], ex["bv"]], axis=1),
        ex_bo=ex["bo"],
        ex_bmi=ex["b_mlp_in"],
        ex_bmo=ex["b_mlp_out"],
        b_act=b_act,
    )

    wm = jnp.zeros((WM_ROWS, 128), f32)
    for name, (off, r, c) in _WM_LAYOUT.items():
        wm = wm.at[off:off + r, :c].set(mats[name])
    wv = jnp.zeros((WV_ROWS, 128), f32)
    for name, (row, c) in _WV_LAYOUT.items():
        wv = wv.at[row:row + 1, :c].set(vecs[name])

    return dict(tok_embed=p["tok_embed"], wm=wm, wv=wv)


# ----------------- forward pass -----------------
def pi0_onestep_forward(fp, images, img_masks, lang_tokens, lang_masks, state):
    f32 = jnp.float32
    bsize = state.shape[0]

    # --- prefix inputs (patch extraction + embedding-table gather stay in XLA) ---
    # TODO(synk): embedding-table gather has no clean Pallas equivalent; left in XLA.
    xi = images.reshape(bsize, NUM_CAMS, IMG_C,
                        IMG_H // PATCH, PATCH, IMG_W // PATCH, PATCH)
    patches = xi.transpose(0, 1, 3, 5, 2, 4, 6).reshape(
        bsize * NUM_IMG_TOKENS, PATCH_DIM)                              # [B*8, 192]
    lang_embs = (jnp.take(fp["tok_embed"], lang_tokens, axis=0)
                 * (D ** 0.5)).reshape(bsize * LANG_LEN, D)             # [B*8, 32]

    img_tok_masks = jnp.repeat(img_masks, PATCHES_PER_IMG, axis=1)
    prefix_pad_masks = jnp.concatenate([img_tok_masks, lang_masks], axis=1)   # [B, 16]
    prefix_pos = jnp.cumsum(prefix_pad_masks.astype(jnp.int32), axis=1) - 1

    # --- suffix raw tokens: one padded [state | action] slab per token ---
    x_0 = jnp.zeros((bsize, N_ACTION_STEPS, MAX_ACTION_DIM), f32)
    state_slot = jnp.concatenate(
        [state[:, None, :], jnp.zeros((bsize, 1, MAX_ACTION_DIM), f32)], axis=-1)
    action_slot = jnp.concatenate(
        [jnp.zeros((bsize, N_ACTION_STEPS, STATE_DIM), f32), x_0], axis=-1)
    sfx_raw = jnp.concatenate([state_slot, action_slot], axis=1).reshape(
        bsize * SUFFIX_LEN, 2 * MAX_ACTION_DIM)                         # [B*9, 16]

    suffix_pad = jnp.ones((bsize, SUFFIX_LEN), bool)
    suffix_att = jnp.concatenate(
        [jnp.ones((bsize, 2), jnp.int32),
         jnp.zeros((bsize, SUFFIX_LEN - 2), jnp.int32)], axis=1)
    suffix_att_2d = make_att_2d_masks(suffix_pad, suffix_att)           # [B, 9, 9]
    prefix_offsets = jnp.sum(prefix_pad_masks.astype(jnp.int32), axis=-1)[:, None]
    suffix_pos = prefix_offsets + jnp.cumsum(suffix_pad.astype(jnp.int32), axis=1) - 1

    # --- folded (batch-in-rows) layout; KV column order: img(b-major), lang(b-major), suffix(b-major) ---
    col_b_img = jnp.repeat(jnp.arange(bsize), NUM_IMG_TOKENS)
    col_i_img = jnp.tile(jnp.arange(NUM_IMG_TOKENS), bsize)
    col_b_lang = jnp.repeat(jnp.arange(bsize), LANG_LEN)
    col_i_lang = jnp.tile(jnp.arange(LANG_LEN), bsize) + NUM_IMG_TOKENS
    col_b_pfx = jnp.concatenate([col_b_img, col_b_lang])
    col_i_pfx = jnp.concatenate([col_i_img, col_i_lang])
    row_b = jnp.repeat(jnp.arange(bsize), SUFFIX_LEN)
    row_i = jnp.tile(jnp.arange(SUFFIX_LEN), bsize)

    # block-structured additive attention bias (pad + att masks + batch block-diag)
    pfx_pad_col = prefix_pad_masks[col_b_pfx, col_i_pfx]
    allow_pfx = (row_b[:, None] == col_b_pfx[None, :]) & pfx_pad_col[None, :]
    allow_sfx = ((row_b[:, None] == row_b[None, :])
                 & suffix_att_2d[row_b[:, None], row_i[:, None], row_i[None, :]])
    bias = jnp.where(jnp.concatenate([allow_pfx, allow_sfx], axis=1),
                     0.0, NEG_INF).astype(f32)                          # [B*9, B*25]

    # RoPE tables (full width, grouped-halves layout, sign folded into sin)
    pos_q = suffix_pos[row_b, row_i]                                    # [B*9]
    pos_k = jnp.concatenate([prefix_pos[col_b_pfx, col_i_pfx], pos_q])  # [B*25]
    cos_q, sin_q = rope_full_tables(pos_q)
    cos_k, sin_k = rope_full_tables(pos_k)
    rope_k = jnp.concatenate([cos_k, sin_k], axis=1)                    # [B*25, 64]

    # state-vs-action token selector, broadcast to D lanes
    sel = jnp.tile(jnp.tile((jnp.arange(SUFFIX_LEN) == 0).astype(f32),
                            (bsize,))[:, None], (1, D))                 # [B*9, 32]

    # packed per-suffix-row slab: [raw | sel | cos_q | sin_q | bias]
    sfx_in = jnp.concatenate([sfx_raw, sel, cos_q, sin_q, bias], axis=1)

    kv_rows = bsize * (PREFIX_LEN + SUFFIX_LEN)
    out = pl.pallas_call(
        _pi0_fused_kernel,
        out_shape=jax.ShapeDtypeStruct((bsize * SUFFIX_LEN, OUT_PAD), f32),
        scratch_shapes=[pltpu.VMEM((kv_rows, 2 * D), f32)],
    )(patches, lang_embs, sfx_in, rope_k, fp["wm"], fp["wv"])

    actions = out[:, :MAX_ACTION_DIM].reshape(bsize, SUFFIX_LEN, MAX_ACTION_DIM)
    return actions[:, -N_ACTION_STEPS:, :]


if __name__ == "__main__":
    key = jax.random.PRNGKey(0)
    kp, ki, kl, ks = jax.random.split(key, 4)
    params = init_params(kp)
    fparams = fuse_params(params)   # one-time weight fusion / slab packing outside jit

    images = jax.random.normal(ki, (B, NUM_CAMS, IMG_C, IMG_H, IMG_W), jnp.float32)
    img_masks = jnp.ones((B, NUM_CAMS), bool)
    lang_tokens = jax.random.randint(kl, (B, LANG_LEN), 0, VOCAB)
    lang_masks = jnp.array(
        [[True] * LANG_LEN,
         [True] * (LANG_LEN - 2) + [False, False]], dtype=bool)
    state = jax.random.normal(ks, (B, STATE_DIM), jnp.float32)

    fwd = jax.jit(pi0_onestep_forward)
    actions = fwd(fparams, images, img_masks, lang_tokens, lang_masks, state)
    jax.block_until_ready(actions)
    assert actions.shape == (B, N_ACTION_STEPS, MAX_ACTION_DIM)
    assert actions.dtype == jnp.float32
    assert bool(jnp.all(jnp.isfinite(actions)))
    print("KERNEL_OK")
</pallas_src>

<mosaic_0001>
module attributes {stable_mosaic.version = 11 : i64} {
  func.func @_pi0_fused_kernel(%arg0: memref<16x192xf32, #tpu.memory_space<vmem>>, %arg1: memref<16x32xf32, #tpu.memory_space<vmem>>, %arg2: memref<18x162xf32, #tpu.memory_space<vmem>>, %arg3: memref<50x64xf32, #tpu.memory_space<vmem>>, %arg4: memref<496x128xf32, #tpu.memory_space<vmem>>, %arg5: memref<16x128xf32, #tpu.memory_space<vmem>>, %arg6: memref<18x128xf32, #tpu.memory_space<vmem>>, %arg7: memref<50x64xf32, #tpu.memory_space<vmem>>) attributes {dimension_semantics = [], scalar_prefetch = 0 : i64, scratch_operands = 1 : i64, tpu.core_type = #tpu.core_type<tc>} {
    %c1 = arith.constant 1 : index
    %c0 = arith.constant 0 : index
    %0 = vector.load %arg5[%c1, %c0] : memref<16x128xf32, #tpu.memory_space<vmem>>, vector<1x32xf32>
    %c272 = arith.constant 272 : index
    %c0_0 = arith.constant 0 : index
    %1 = vector.load %arg4[%c272, %c0_0] : memref<496x128xf32, #tpu.memory_space<vmem>>, vector<32x64xf32>
    %c2 = arith.constant 2 : index
    %c0_1 = arith.constant 0 : index
    %2 = vector.load %arg5[%c2, %c0_1] : memref<16x128xf32, #tpu.memory_space<vmem>>, vector<1x64xf32>
    %c0_2 = arith.constant 0 : index
    %c0_3 = arith.constant 0 : index
    %3 = vector.load %arg0[%c0_2, %c0_3] : memref<16x192xf32, #tpu.memory_space<vmem>>, vector<16x192xf32>
    %c0_4 = arith.constant 0 : index
    %c0_5 = arith.constant 0 : index
    %4 = vector.load %arg4[%c0_4, %c0_5] : memref<496x128xf32, #tpu.memory_space<vmem>>, vector<192x32xf32>
    %cst = arith.constant dense<0.000000e+00> : vector<16x32xf32>
    %5 = tpu.matmul %3, %4, %cst {dimension_numbers = #tpu.dot_dimension_numbers<[1], [0], [0], [1], [0, 0, 1, 1], [], []>} : vector<16x192xf32>, vector<192x32xf32>, vector<16x32xf32> -> vector<16x32xf32>
    %c0_6 = arith.constant 0 : index
    %c0_7 = arith.constant 0 : index
    %6 = vector.load %arg5[%c0_6, %c0_7] : memref<16x128xf32, #tpu.memory_space<vmem>>, vector<1x32xf32>
    %7 = vector.broadcast %6 : vector<1x32xf32> to vector<16x32xf32>
    %8 = arith.addf %5, %7 : vector<16x32xf32>
    %9 = arith.mulf %8, %8 : vector<16x32xf32>
    %cst_8 = arith.constant dense<0.000000e+00> : vector<16xf32>
    %10 = vector.multi_reduction <add>, %9, %cst_8 [1] : vector<16x32xf32> to vector<16xf32>
    %11 = vector.shape_cast %10 : vector<16xf32> to vector<16x1xf32>
    %cst_9 = arith.constant 3.200000e+01 : f32
    %12 = vector.broadcast %cst_9 : f32 to vector<16x1xf32>
    %13 = arith.divf %11, %12 : vector<16x1xf32>
    %cst_10 = arith.constant 9.99999997E-7 : f32
    %14 = vector.broadcast %cst_10 : f32 to vector<16x1xf32>
    %15 = arith.addf %13, %14 : vector<16x1xf32>
    %16 = math.rsqrt %15 : vector<16x1xf32>
    %17 = vector.broadcast %16 : vector<16x1xf32> to vector<16x32xf32>
    %18 = arith.mulf %8, %17 : vector<16x32xf32>
    %cst_11 = arith.constant 1.000000e+00 : f32
    %19 = vector.broadcast %cst_11 : f32 to vector<1x32xf32>
    %20 = arith.addf %19, %0 : vector<1x32xf32>
    %21 = vector.broadcast %20 : vector<1x32xf32> to vector<16x32xf32>
    %22 = arith.mulf %18, %21 : vector<16x32xf32>
    %cst_12 = arith.constant dense<0.000000e+00> : vector<16x64xf32>
    %23 = tpu.matmul %22, %1, %cst_12 {dimension_numbers = #tpu.dot_dimension_numbers<[1], [0], [0], [1], [0, 0, 1, 1], [], []>} : vector<16x32xf32>, vector<32x64xf32>, vector<16x64xf32> -> vector<16x64xf32>
    %24 = vector.broadcast %2 : vector<1x64xf32> to vector<16x64xf32>
    %25 = arith.addf %23, %24 : vector<16x64xf32>
    %c0_13 = arith.constant 0 : index
    %c0_14 = arith.constant 0 : index
    %26 = vector.load %arg7[%c0_13, %c0_14] : memref<50x64xf32, #tpu.memory_space<vmem>>, vector<16x64xf32>
    tpu.vector_store %arg7[%c0_13, %c0_14], %25 {strides = array<i32>} : memref<50x64xf32, #tpu.memory_space<vmem>>, vector<16x64xf32>,
    %c0_15 = arith.constant 0 : index
    %c0_16 = arith.constant 0 : index
    %27 = vector.load %arg1[%c0_15, %c0_16] : memref<16x32xf32, #tpu.memory_space<vmem>>, vector<16x32xf32>
    %28 = arith.mulf %27, %27 : vector<16x32xf32>
    %cst_17 = arith.constant dense<0.000000e+00> : vector<16xf32>
    %29 = vector.multi_reduction <add>, %28, %cst_17 [1] : vector<16x32xf32> to vector<16xf32>
    %30 = vector.shape_cast %29 : vector<16xf32> to vector<16x1xf32>
    %cst_18 = arith.constant 3.200000e+01 : f32
    %31 = vector.broadcast %cst_18 : f32 to vector<16x1xf32>
    %32 = arith.divf %30, %31 : vector<16x1xf32>
    %cst_19 = arith.constant 9.99999997E-7 : f32
    %33 = vector.broadcast %cst_19 : f32 to vector<16x1xf32>
    %34 = arith.addf %32, %33 : vector<16x1xf32>
    %35 = math.rsqrt %34 : vector<16x1xf32>
    %36 = vector.broadcast %35 : vector<16x1xf32> to vector<16x32xf32>
    %37 = arith.mulf %27, %36 : vector<16x32xf32>
    %cst_20 = arith.constant 1.000000e+00 : f32
    %38 = vector.broadcast %cst_20 : f32 to vector<1x32xf32>
    %39 = arith.addf %38, %0 : vector<1x32xf32>
    %40 = vector.broadcast %39 : vector<1x32xf32> to vector<16x32xf32>
    %41 = arith.mulf %37, %40 : vector<16x32xf32>
    %cst_21 = arith.constant dense<0.000000e+00> : vector<16x64xf32>
    %42 = tpu.matmul %41, %1, %cst_21 {dimension_numbers = #tpu.dot_dimension_numbers<[1], [0], [0], [1], [0, 0, 1, 1], [], []>} : vector<16x32xf32>, vector<32x64xf32>, vector<16x64xf32> -> vector<16x64xf32>
    %43 = vector.broadcast %2 : vector<1x64xf32> to vector<16x64xf32>
    %44 = arith.addf %42, %43 : vector<16x64xf32>
    %c16 = arith.constant 16 : index
    %c0_22 = arith.constant 0 : index
    %45 = vector.load %arg7[%c16, %c0_22] : memref<50x64xf32, #tpu.memory_space<vmem>>, vector<16x64xf32>
    tpu.vector_store %arg7[%c16, %c0_22], %44 {strides = array<i32>} : memref<50x64xf32, #tpu.memory_space<vmem>>, vector<16x64xf32>,
    %c0_23 = arith.constant 0 : index
    %c0_24 = arith.constant 0 : index
    %46 = vector.load %arg2[%c0_23, %c0_24] : memref<18x162xf32, #tpu.memory_space<vmem>>, vector<18x16xf32>
    %c0_25 = arith.constant 0 : index
    %c16_26 = arith.constant 16 : index
    %47 = vector.load %arg2[%c0_25, %c16_26] : memref<18x162xf32, #tpu.memory_space<vmem>>, vector<18x32xf32>
    %c0_27 = arith.constant 0 : index
    %c48 = arith.constant 48 : index
    %48 = vector.load %arg2[%c0_27, %c48] : memref<18x162xf32, #tpu.memory_space<vmem>>, vector<18x32xf32>
    %c0_28 = arith.constant 0 : index
    %c80 = arith.constant 80 : index
    %49 = vector.load %arg2[%c0_28, %c80] : memref<18x162xf32, #tpu.memory_space<vmem>>, vector<18x32xf32>
    %c0_29 = arith.constant 0 : index
    %c112 = arith.constant 112 : index
    %50 = vector.load %arg2[%c0_29, %c112] : memref<18x162xf32, #tpu.memory_space<vmem>>, vector<18x50xf32>
    %c192 = arith.constant 192 : index
    %c0_30 = arith.constant 0 : index
    %51 = vector.load %arg4[%c192, %c0_30] : memref<496x128xf32, #tpu.memory_space<vmem>>, vector<16x32xf32>
    %cst_31 = arith.constant dense<0.000000e+00> : vector<18x32xf32>
    %52 = tpu.matmul %46, %51, %cst_31 {dimension_numbers = #tpu.dot_dimension_numbers<[1], [0], [0], [1], [0, 0, 1, 1], [], []>} : vector<18x16xf32>, vector<16x32xf32>, vector<18x32xf32> -> vector<18x32xf32>
    %c3 = arith.constant 3 : index
    %c0_32 = arith.constant 0 : index
    %53 = vector.load %arg5[%c3, %c0_32] : memref<16x128xf32, #tpu.memory_space<vmem>>, vector<1x32xf32>
    %54 = vector.broadcast %53 : vector<1x32xf32> to vector<18x32xf32>
    %55 = arith.addf %52, %54 : vector<18x32xf32>
    %c4 = arith.constant 4 : index
    %c0_33 = arith.constant 0 : index
    %56 = vector.load %arg5[%c4, %c0_33] : memref<16x128xf32, #tpu.memory_space<vmem>>, vector<1x32xf32>
    %57 = vector.broadcast %56 : vector<1x32xf32> to vector<18x32xf32>
    %58 = arith.mulf %47, %57 : vector<18x32xf32>
    %59 = arith.addf %55, %58 : vector<18x32xf32>
    %c208 = arith.constant 208 : index
    %c0_34 = arith.constant 0 : index
    %60 = vector.load %arg4[%c208, %c0_34] : memref<496x128xf32, #tpu.memory_space<vmem>>, vector<32x32xf32>
    %cst_35 = arith.constant dense<0.000000e+00> : vector<18x32xf32>
    %61 = tpu.matmul %59, %60, %cst_35 {dimension_numbers = #tpu.dot_dimension_numbers<[1], [0], [0], [1], [0, 0, 1, 1], [], []>} : vector<18x32xf32>, vector<32x32xf32>, vector<18x32xf32> -> vector<18x32xf32>
    %c5 = arith.constant 5 : index
    %c0_36 = arith.constant 0 : index
    %62 = vector.load %arg5[%c5, %c0_36] : memref<16x128xf32, #tpu.memory_space<vmem>>, vector<1x32xf32>
    %63 = vector.broadcast %62 : vector<1x32xf32> to vector<18x32xf32>
    %64 = arith.addf %61, %63 : vector<18x32xf32>
    %65 = arith.negf %64 : vector<18x32xf32>
    %66 = math.exp %65 : vector<18x32xf32>
    %cst_37 = arith.constant 1.000000e+00 : f32
    %67 = vector.broadcast %cst_37 : f32 to vector<18x32xf32>
    %68 = arith.addf %67, %66 : vector<18x32xf32>
    %69 = arith.divf %67, %68 : vector<18x32xf32>
    %70 = arith.mulf %64, %69 : vector<18x32xf32>
    %c240 = arith.constant 240 : index
    %c0_38 = arith.constant 0 : index
    %71 = vector.load %arg4[%c240, %c0_38] : memref<496x128xf32, #tpu.memory_space<vmem>>, vector<32x32xf32>
    %cst_39 = arith.constant dense<0.000000e+00> : vector<18x32xf32>
    %72 = tpu.matmul %70, %71, %cst_39 {dimension_numbers = #tpu.dot_dimension_numbers<[1], [0], [0], [1], [0, 0, 1, 1], [], []>} : vector<18x32xf32>, vector<32x32xf32>, vector<18x32xf32> -> vector<18x32xf32>
    %c6 = arith.constant 6 : index
    %c0_40 = arith.constant 0 : index
    %73 = vector.load %arg5[%c6, %c0_40] : memref<16x128xf32, #tpu.memory_space<vmem>>, vector<1x32xf32>
    %74 = vector.broadcast %73 : vector<1x32xf32> to vector<18x32xf32>
    %75 = arith.addf %72, %74 : vector<18x32xf32>
    %76 = arith.subf %59, %75 : vector<18x32xf32>
    %77 = arith.mulf %47, %76 : vector<18x32xf32>
    %78 = arith.addf %75, %77 : vector<18x32xf32>
    %c7 = arith.constant 7 : index
    %c0_41 = arith.constant 0 : index
    %79 = vector.load %arg5[%c7, %c0_41] : memref<16x128xf32, #tpu.memory_space<vmem>>, vector<1x32xf32>
    %80 = arith.mulf %78, %78 : vector<18x32xf32>
    %cst_42 = arith.constant dense<0.000000e+00> : vector<18xf32>
    %81 = vector.multi_reduction <add>, %80, %cst_42 [1] : vector<18x32xf32> to vector<18xf32>
    %82 = vector.shape_cast %81 : vector<18xf32> to vector<18x1xf32>
    %cst_43 = arith.constant 3.200000e+01 : f32
    %83 = vector.broadcast %cst_43 : f32 to vector<18x1xf32>
    %84 = arith.divf %82, %83 : vector<18x1xf32>
    %cst_44 = arith.constant 9.99999997E-7 : f32
    %85 = vector.broadcast %cst_44 : f32 to vector<18x1xf32>
    %86 = arith.addf %84, %85 : vector<18x1xf32>
    %87 = math.rsqrt %86 : vector<18x1xf32>
    %88 = vector.broadcast %87 : vector<18x1xf32> to vector<18x32xf32>
    %89 = arith.mulf %78, %88 : vector<18x32xf32>
    %cst_45 = arith.constant 1.000000e+00 : f32
    %90 = vector.broadcast %cst_45 : f32 to vector<1x32xf32>
    %91 = arith.addf %90, %79 : vector<1x32xf32>
    %92 = vector.broadcast %91 : vector<1x32xf32> to vector<18x32xf32>
    %93 = arith.mulf %89, %92 : vector<18x32xf32>
    %c304 = arith.constant 304 : index
    %c0_46 = arith.constant 0 : index
    %94 = vector.load %arg4[%c304, %c0_46] : memref<496x128xf32, #tpu.memory_space<vmem>>, vector<32x96xf32>
    %cst_47 = arith.constant dense<0.000000e+00> : vector<18x96xf32>
    %95 = tpu.matmul %93, %94, %cst_47 {dimension_numbers = #tpu.dot_dimension_numbers<[1], [0], [0], [1], [0, 0, 1, 1], [], []>} : vector<18x32xf32>, vector<32x96xf32>, vector<18x96xf32> -> vector<18x96xf32>
    %c10 = arith.constant 10 : index
    %c0_48 = arith.constant 0 : index
    %96 = vector.load %arg5[%c10, %c0_48] : memref<16x128xf32, #tpu.memory_space<vmem>>, vector<1x96xf32>
    %97 = vector.broadcast %96 : vector<1x96xf32> to vector<18x96xf32>
    %98 = arith.addf %95, %97 : vector<18x96xf32>
    %99 = vector.extract_strided_slice %98 {offsets = [0, 32], sizes = [18, 64], strides = [1, 1]} : vector<18x96xf32> to vector<18x64xf32>
    %c32 = arith.constant 32 : index
    %c0_49 = arith.constant 0 : index
    %100 = vector.load %arg7[%c32, %c0_49] : memref<50x64xf32, #tpu.memory_space<vmem>>, vector<18x64xf32>
    tpu.vector_store %arg7[%c32, %c0_49], %99 {strides = array<i32>} : memref<50x64xf32, #tpu.memory_space<vmem>>, vector<18x64xf32>,
    %c0_50 = arith.constant 0 : index
    %c0_51 = arith.constant 0 : index
    %101 = vector.load %arg7[%c0_50, %c0_51] : memref<50x64xf32, #tpu.memory_space<vmem>>, vector<50x64xf32>
    %102 = vector.extract_strided_slice %101 {offsets = [0, 0], sizes = [50, 32], strides = [1, 1]} : vector<50x64xf32> to vector<50x32xf32>
    %103 = vector.extract_strided_slice %101 {offsets = [0, 32], sizes = [50, 32], strides = [1, 1]} : vector<50x64xf32> to vector<50x32xf32>
    %c0_52 = arith.constant 0 : index
    %c0_53 = arith.constant 0 : index
    %104 = vector.load %arg3[%c0_52, %c0_53] : memref<50x64xf32, #tpu.memory_space<vmem>>, vector<50x32xf32>
    %c0_54 = arith.constant 0 : index
    %c32_55 = arith.constant 32 : index
    %105 = vector.load %arg3[%c0_54, %c32_55] : memref<50x64xf32, #tpu.memory_space<vmem>>, vector<50x32xf32>
    %106 = vector.extract_strided_slice %98 {offsets = [0, 0], sizes = [18, 32], strides = [1, 1]} : vector<18x96xf32> to vector<18x32xf32>
    %107 = arith.mulf %106, %48 : vector<18x32xf32>
    %108 = vector.extract_strided_slice %106 {offsets = [0, 16], sizes = [18, 16], strides = [1, 1]} : vector<18x32xf32> to vector<18x16xf32>
    %109 = vector.extract_strided_slice %106 {offsets = [0, 0], sizes = [18, 16], strides = [1, 1]} : vector<18x32xf32> to vector<18x16xf32>
    %110 = tpu.concatenate %108, %109 in 1 : vector<18x16xf32>, vector<18x16xf32> -> vector<18x32xf32>
    %111 = arith.mulf %110, %49 : vector<18x32xf32>
    %112 = arith.addf %107, %111 : vector<18x32xf32>
    %113 = arith.mulf %102, %104 : vector<50x32xf32>
    %114 = vector.extract_strided_slice %102 {offsets = [0, 16], sizes = [50, 16], strides = [1, 1]} : vector<50x32xf32> to vector<50x16xf32>
    %115 = vector.extract_strided_slice %102 {offsets = [0, 0], sizes = [50, 16], strides = [1, 1]} : vector<50x32xf32> to vector<50x16xf32>
    %116 = tpu.concatenate %114, %115 in 1 : vector<50x16xf32>, vector<50x16xf32> -> vector<50x32xf32>
    %117 = arith.mulf %116, %105 : vector<50x32xf32>
    %118 = arith.addf %113, %117 : vector<50x32xf32>
    %119 = vector.extract_strided_slice %112 {offsets = [0, 0], sizes = [18, 4], strides = [1, 1]} : vector<18x32xf32> to vector<18x4xf32>
    %120 = vector.extract_strided_slice %118 {offsets = [0, 0], sizes = [50, 4], strides = [1, 1]} : vector<50x32xf32> to vector<50x4xf32>
    %cst_56 = arith.constant dense<0.000000e+00> : vector<18x50xf32>
    %121 = tpu.matmul %119, %120, %cst_56 {dimension_numbers = #tpu.dot_dimension_numbers<[1], [1], [0], [0], [0, 0, 1, 0], [], []>} : vector<18x4xf32>, vector<50x4xf32>, vector<18x50xf32> -> vector<18x50xf32>
    %122 = vector.extract_strided_slice %112 {offsets = [0, 16], sizes = [18, 4], strides = [1, 1]} : vector<18x32xf32> to vector<18x4xf32>
    %123 = vector.extract_strided_slice %118 {offsets = [0, 16], sizes = [50, 4], strides = [1, 1]} : vector<50x32xf32> to vector<50x4xf32>
    %cst_57 = arith.constant dense<0.000000e+00> : vector<18x50xf32>
    %124 = tpu.matmul %122, %123, %cst_57 {dimension_numbers = #tpu.dot_dimension_numbers<[1], [1], [0], [0], [0, 0, 1, 0], [], []>} : vector<18x4xf32>, vector<50x4xf32>, vector<18x50xf32> -> vector<18x50xf32>
    %125 = arith.addf %121, %124 : vector<18x50xf32>
    %cst_58 = arith.constant 0.353553385 : f32
    %126 = vector.broadcast %cst_58 : f32 to vector<18x50xf32>
    %127 = arith.mulf %125, %126 : vector<18x50xf32>
    %128 = arith.addf %127, %50 : vector<18x50xf32>
    %cst_59 = arith.constant dense<0xFF800000> : vector<18xf32>
    %129 = vector.multi_reduction <maximumf>, %128, %cst_59 [1] : vector<18x50xf32> to vector<18xf32>
    %130 = vector.shape_cast %129 : vector<18xf32> to vector<18x1xf32>
    %131 = vector.broadcast %130 : vector<18x1xf32> to vector<18x50xf32>
    %132 = arith.subf %128, %131 : vector<18x50xf32>
    %133 = math.exp %132 : vector<18x50xf32>
    %cst_60 = arith.constant dense<0.000000e+00> : vector<18xf32>
    %134 = vector.multi_reduction <add>, %133, %cst_60 [1] : vector<18x50xf32> to vector<18xf32>
    %135 = vector.shape_cast %134 : vector<18xf32> to vector<18x1xf32>
    %136 = tpu.reciprocal %135 {approx = true} : vector<18x1xf32> -> vector<18x1xf32>
    %137 = vector.extract_strided_slice %103 {offsets = [0, 0], sizes = [50, 8], strides = [1, 1]} : vector<50x32xf32> to vector<50x8xf32>
    %cst_61 = arith.constant dense<0.000000e+00> : vector<18x8xf32>
    %138 = tpu.matmul %133, %137, %cst_61 {dimension_numbers = #tpu.dot_dimension_numbers<[1], [0], [0], [1], [0, 0, 1, 1], [], []>} : vector<18x50xf32>, vector<50x8xf32>, vector<18x8xf32> -> vector<18x8xf32>
    %139 = vector.broadcast %136 : vector<18x1xf32> to vector<18x8xf32>
    %140 = arith.mulf %138, %139 : vector<18x8xf32>
    %141 = vector.extract_strided_slice %112 {offsets = [0, 4], sizes = [18, 4], strides = [1, 1]} : vector<18x32xf32> to vector<18x4xf32>
    %142 = vector.extract_strided_slice %118 {offsets = [0, 4], sizes = [50, 4], strides = [1, 1]} : vector<50x32xf32> to vector<50x4xf32>
    %cst_62 = arith.constant dense<0.000000e+00> : vector<18x50xf32>
    %143 = tpu.matmul %141, %142, %cst_62 {dimension_numbers = #tpu.dot_dimension_numbers<[1], [1], [0], [0], [0, 0, 1, 0], [], []>} : vector<18x4xf32>, vector<50x4xf32>, vector<18x50xf32> -> vector<18x50xf32>
    %144 = vector.extract_strided_slice %112 {offsets = [0, 20], sizes = [18, 4], strides = [1, 1]} : vector<18x32xf32> to vector<18x4xf32>
    %145 = vector.extract_strided_slice %118 {offsets = [0, 20], sizes = [50, 4], strides = [1, 1]} : vector<50x32xf32> to vector<50x4xf32>
    %cst_63 = arith.constant dense<0.000000e+00> : vector<18x50xf32>
    %146 = tpu.matmul %144, %145, %cst_63 {dimension_numbers = #tpu.dot_dimension_numbers<[1], [1], [0], [0], [0, 0, 1, 0], [], []>} : vector<18x4xf32>, vector<50x4xf32>, vector<18x50xf32> -> vector<18x50xf32>
    %147 = arith.addf %143, %146 : vector<18x50xf32>
    %cst_64 = arith.constant 0.353553385 : f32
    %148 = vector.broadcast %cst_64 : f32 to vector<18x50xf32>
    %149 = arith.mulf %147, %148 : vector<18x50xf32>
    %150 = arith.addf %149, %50 : vector<18x50xf32>
    %cst_65 = arith.constant dense<0xFF800000> : vector<18xf32>
    %151 = vector.multi_reduction <maximumf>, %150, %cst_65 [1] : vector<18x50xf32> to vector<18xf32>
    %152 = vector.shape_cast %151 : vector<18xf32> to vector<18x1xf32>
    %153 = vector.broadcast %152 : vector<18x1xf32> to vector<18x50xf32>
    %154 = arith.subf %150, %153 : vector<18x50xf32>
    %155 = math.exp %154 : vector<18x50xf32>
    %cst_66 = arith.constant dense<0.000000e+00> : vector<18xf32>
    %156 = vector.multi_reduction <add>, %155, %cst_66 [1] : vector<18x50xf32> to vector<18xf32>
    %157 = vector.shape_cast %156 : vector<18xf32> to vector<18x1xf32>
    %158 = tpu.reciprocal %157 {approx = true} : vector<18x1xf32> -> vector<18x1xf32>
    %159 = vector.extract_strided_slice %103 {offsets = [0, 8], sizes = [50, 8], strides = [1, 1]} : vector<50x32xf32> to vector<50x8xf32>
    %cst_67 = arith.constant dense<0.000000e+00> : vector<18x8xf32>
    %160 = tpu.matmul %155, %159, %cst_67 {dimension_numbers = #tpu.dot_dimension_numbers<[1], [0], [0], [1], [0, 0, 1, 1], [], []>} : vector<18x50xf32>, vector<50x8xf32>, vector<18x8xf32> -> vector<18x8xf32>
    %161 = vector.broadcast %158 : vector<18x1xf32> to vector<18x8xf32>
    %162 = arith.mulf %160, %161 : vector<18x8xf32>
    %163 = vector.extract_strided_slice %112 {offsets = [0, 8], sizes = [18, 4], strides = [1, 1]} : vector<18x32xf32> to vector<18x4xf32>
    %164 = vector.extract_strided_slice %118 {offsets = [0, 8], sizes = [50, 4], strides = [1, 1]} : vector<50x32xf32> to vector<50x4xf32>
    %cst_68 = arith.constant dense<0.000000e+00> : vector<18x50xf32>
    %165 = tpu.matmul %163, %164, %cst_68 {dimension_numbers = #tpu.dot_dimension_numbers<[1], [1], [0], [0], [0, 0, 1, 0], [], []>} : vector<18x4xf32>, vector<50x4xf32>, vector<18x50xf32> -> vector<18x50xf32>
    %166 = vector.extract_strided_slice %112 {offsets = [0, 24], sizes = [18, 4], strides = [1, 1]} : vector<18x32xf32> to vector<18x4xf32>
    %167 = vector.extract_strided_slice %118 {offsets = [0, 24], sizes = [50, 4], strides = [1, 1]} : vector<50x32xf32> to vector<50x4xf32>
    %cst_69 = arith.constant dense<0.000000e+00> : vector<18x50xf32>
    %168 = tpu.matmul %166, %167, %cst_69 {dimension_numbers = #tpu.dot_dimension_numbers<[1], [1], [0], [0], [0, 0, 1, 0], [], []>} : vector<18x4xf32>, vector<50x4xf32>, vector<18x50xf32> -> vector<18x50xf32>
    %169 = arith.addf %165, %168 : vector<18x50xf32>
    %cst_70 = arith.constant 0.353553385 : f32
    %170 = vector.broadcast %cst_70 : f32 to vector<18x50xf32>
    %171 = arith.mulf %169, %170 : vector<18x50xf32>
    %172 = arith.addf %171, %50 : vector<18x50xf32>
    %cst_71 = arith.constant dense<0xFF800000> : vector<18xf32>
    %173 = vector.multi_reduction <maximumf>, %172, %cst_71 [1] : vector<18x50xf32> to vector<18xf32>
    %174 = vector.shape_cast %173 : vector<18xf32> to vector<18x1xf32>
    %175 = vector.broadcast %174 : vector<18x1xf32> to vector<18x50xf32>
    %176 = arith.subf %172, %175 : vector<18x50xf32>
    %177 = math.exp %176 : vector<18x50xf32>
    %cst_72 = arith.constant dense<0.000000e+00> : vector<18xf32>
    %178 = vector.multi_reduction <add>, %177, %cst_72 [1] : vector<18x50xf32> to vector<18xf32>
    %179 = vector.shape_cast %178 : vector<18xf32> to vector<18x1xf32>
    %180 = tpu.reciprocal %179 {approx = true} : vector<18x1xf32> -> vector<18x1xf32>
    %181 = vector.extract_strided_slice %103 {offsets = [0, 16], sizes = [50, 8], strides = [1, 1]} : vector<50x32xf32> to vector<50x8xf32>
    %cst_73 = arith.constant dense<0.000000e+00> : vector<18x8xf32>
    %182 = tpu.matmul %177, %181, %cst_73 {dimension_numbers = #tpu.dot_dimension_numbers<[1], [0], [0], [1], [0, 0, 1, 1], [], []>} : vector<18x50xf32>, vector<50x8xf32>, vector<18x8xf32> -> vector<18x8xf32>
    %183 = vector.broadcast %180 : vector<18x1xf32> to vector<18x8xf32>
    %184 = arith.mulf %182, %183 : vector<18x8xf32>
    %185 = vector.extract_strided_slice %112 {offsets = [0, 12], sizes = [18, 4], strides = [1, 1]} : vector<18x32xf32> to vector<18x4xf32>
    %186 = vector.extract_strided_slice %118 {offsets = [0, 12], sizes = [50, 4], strides = [1, 1]} : vector<50x32xf32> to vector<50x4xf32>
    %cst_74 = arith.constant dense<0.000000e+00> : vector<18x50xf32>
    %187 = tpu.matmul %185, %186, %cst_74 {dimension_numbers = #tpu.dot_dimension_numbers<[1], [1], [0], [0], [0, 0, 1, 0], [], []>} : vector<18x4xf32>, vector<50x4xf32>, vector<18x50xf32> -> vector<18x50xf32>
    %188 = vector.extract_strided_slice %112 {offsets = [0, 28], sizes = [18, 4], strides = [1, 1]} : vector<18x32xf32> to vector<18x4xf32>
    %189 = vector.extract_strided_slice %118 {offsets = [0, 28], sizes = [50, 4], strides = [1, 1]} : vector<50x32xf32> to vector<50x4xf32>
    %cst_75 = arith.constant dense<0.000000e+00> : vector<18x50xf32>
    %190 = tpu.matmul %188, %189, %cst_75 {dimension_numbers = #tpu.dot_dimension_numbers<[1], [1], [0], [0], [0, 0, 1, 0], [], []>} : vector<18x4xf32>, vector<50x4xf32>, vector<18x50xf32> -> vector<18x50xf32>
    %191 = arith.addf %187, %190 : vector<18x50xf32>
    %cst_76 = arith.constant 0.353553385 : f32
    %192 = vector.broadcast %cst_76 : f32 to vector<18x50xf32>
    %193 = arith.mulf %191, %192 : vector<18x50xf32>
    %194 = arith.addf %193, %50 : vector<18x50xf32>
    %cst_77 = arith.constant dense<0xFF800000> : vector<18xf32>
    %195 = vector.multi_reduction <maximumf>, %194, %cst_77 [1] : vector<18x50xf32> to vector<18xf32>
    %196 = vector.shape_cast %195 : vector<18xf32> to vector<18x1xf32>
    %197 = vector.broadcast %196 : vector<18x1xf32> to vector<18x50xf32>
    %198 = arith.subf %194, %197 : vector<18x50xf32>
    %199 = math.exp %198 : vector<18x50xf32>
    %cst_78 = arith.constant dense<0.000000e+00> : vector<18xf32>
    %200 = vector.multi_reduction <add>, %199, %cst_78 [1] : vector<18x50xf32> to vector<18xf32>
    %201 = vector.shape_cast %200 : vector<18xf32> to vector<18x1xf32>
    %202 = tpu.reciprocal %201 {approx = true} : vector<18x1xf32> -> vector<18x1xf32>
    %203 = vector.extract_strided_slice %103 {offsets = [0, 24], sizes = [50, 8], strides = [1, 1]} : vector<50x32xf32> to vector<50x8xf32>
    %cst_79 = arith.constant dense<0.000000e+00> : vector<18x8xf32>
    %204 = tpu.matmul %199, %203, %cst_79 {dimension_numbers = #tpu.dot_dimension_numbers<[1], [0], [0], [1], [0, 0, 1, 1], [], []>} : vector<18x50xf32>, vector<50x8xf32>, vector<18x8xf32> -> vector<18x8xf32>
    %205 = vector.broadcast %202 : vector<18x1xf32> to vector<18x8xf32>
    %206 = arith.mulf %204, %205 : vector<18x8xf32>
    %207 = tpu.concatenate %140, %162, %184, %206 in 1 : vector<18x8xf32>, vector<18x8xf32>, vector<18x8xf32>, vector<18x8xf32> -> vector<18x32xf32>
    %c336 = arith.constant 336 : index
    %c0_80 = arith.constant 0 : index
    %208 = vector.load %arg4[%c336, %c0_80] : memref<496x128xf32, #tpu.memory_space<vmem>>, vector<32x32xf32>
    %cst_81 = arith.constant dense<0.000000e+00> : vector<18x32xf32>
    %209 = tpu.matmul %207, %208, %cst_81 {dimension_numbers = #tpu.dot_dimension_numbers<[1], [0], [0], [1], [0, 0, 1, 1], [], []>} : vector<18x32xf32>, vector<32x32xf32>, vector<18x32xf32> -> vector<18x32xf32>
    %210 = arith.addf %78, %209 : vector<18x32xf32>
    %c11 = arith.constant 11 : index
    %c0_82 = arith.constant 0 : index
    %211 = vector.load %arg5[%c11, %c0_82] : memref<16x128xf32, #tpu.memory_space<vmem>>, vector<1x32xf32>
    %212 = vector.broadcast %211 : vector<1x32xf32> to vector<18x32xf32>
    %213 = arith.addf %210, %212 : vector<18x32xf32>
    %c8 = arith.constant 8 : index
    %c0_83 = arith.constant 0 : index
    %214 = vector.load %arg5[%c8, %c0_83] : memref<16x128xf32, #tpu.memory_space<vmem>>, vector<1x32xf32>
    %215 = arith.mulf %213, %213 : vector<18x32xf32>
    %cst_84 = arith.constant dense<0.000000e+00> : vector<18xf32>
    %216 = vector.multi_reduction <add>, %215, %cst_84 [1] : vector<18x32xf32> to vector<18xf32>
    %217 = vector.shape_cast %216 : vector<18xf32> to vector<18x1xf32>
    %cst_85 = arith.constant 3.200000e+01 : f32
    %218 = vector.broadcast %cst_85 : f32 to vector<18x1xf32>
    %219 = arith.divf %217, %218 : vector<18x1xf32>
    %cst_86 = arith.constant 9.99999997E-7 : f32
    %220 = vector.broadcast %cst_86 : f32 to vector<18x1xf32>
    %221 = arith.addf %219, %220 : vector<18x1xf32>
    %222 = math.rsqrt %221 : vector<18x1xf32>
    %223 = vector.broadcast %222 : vector<18x1xf32> to vector<18x32xf32>
    %224 = arith.mulf %213, %223 : vector<18x32xf32>
    %cst_87 = arith.constant 1.000000e+00 : f32
    %225 = vector.broadcast %cst_87 : f32 to vector<1x32xf32>
    %226 = arith.addf %225, %214 : vector<1x32xf32>
    %227 = vector.broadcast %226 : vector<1x32xf32> to vector<18x32xf32>
    %228 = arith.mulf %224, %227 : vector<18x32xf32>
    %c368 = arith.constant 368 : index
    %c0_88 = arith.constant 0 : index
    %229 = vector.load %arg4[%c368, %c0_88] : memref<496x128xf32, #tpu.memory_space<vmem>>, vector<32x64xf32>
    %cst_89 = arith.constant dense<0.000000e+00> : vector<18x64xf32>
    %230 = tpu.matmul %228, %229, %cst_89 {dimension_numbers = #tpu.dot_dimension_numbers<[1], [0], [0], [1], [0, 0, 1, 1], [], []>} : vector<18x32xf32>, vector<32x64xf32>, vector<18x64xf32> -> vector<18x64xf32>
    %c12 = arith.constant 12 : index
    %c0_90 = arith.constant 0 : index
    %231 = vector.load %arg5[%c12, %c0_90] : memref<16x128xf32, #tpu.memory_space<vmem>>, vector<1x64xf32>
    %232 = vector.broadcast %231 : vector<1x64xf32> to vector<18x64xf32>
    %233 = arith.addf %230, %232 : vector<18x64xf32>
    %234 = arith.mulf %233, %233 : vector<18x64xf32>
    %235 = arith.mulf %233, %234 : vector<18x64xf32>
    %cst_91 = arith.constant 4.471500e-02 : f32
    %236 = vector.broadcast %cst_91 : f32 to vector<18x64xf32>
    %237 = arith.mulf %236, %235 : vector<18x64xf32>
    %238 = arith.addf %233, %237 : vector<18x64xf32>
    %cst_92 = arith.constant 0.797884583 : f32
    %239 = vector.broadcast %cst_92 : f32 to vector<18x64xf32>
    %240 = arith.mulf %239, %238 : vector<18x64xf32>
    %241 = math.tanh %240 : vector<18x64xf32>
    %cst_93 = arith.constant 1.000000e+00 : f32
    %242 = vector.broadcast %cst_93 : f32 to vector<18x64xf32>
    %243 = arith.addf %242, %241 : vector<18x64xf32>
    %cst_94 = arith.constant 5.000000e-01 : f32
    %244 = vector.broadcast %cst_94 : f32 to vector<18x64xf32>
    %245 = arith.mulf %244, %243 : vector<18x64xf32>
    %246 = arith.mulf %233, %245 : vector<18x64xf32>
    %c400 = arith.constant 400 : index
    %c0_95 = arith.constant 0 : index
    %247 = vector.load %arg4[%c400, %c0_95] : memref<496x128xf32, #tpu.memory_space<vmem>>, vector<64x32xf32>
    %cst_96 = arith.constant dense<0.000000e+00> : vector<18x32xf32>
    %248 = tpu.matmul %246, %247, %cst_96 {dimension_numbers = #tpu.dot_dimension_numbers<[1], [0], [0], [1], [0, 0, 1, 1], [], []>} : vector<18x64xf32>, vector<64x32xf32>, vector<18x32xf32> -> vector<18x32xf32>
    %249 = arith.addf %213, %248 : vector<18x32xf32>
    %c13 = arith.constant 13 : index
    %c0_97 = arith.constant 0 : index
    %250 = vector.load %arg5[%c13, %c0_97] : memref<16x128xf32, #tpu.memory_space<vmem>>, vector<1x32xf32>
    %251 = vector.broadcast %250 : vector<1x32xf32> to vector<18x32xf32>
    %252 = arith.addf %249, %251 : vector<18x32xf32>
    %c9 = arith.constant 9 : index
    %c0_98 = arith.constant 0 : index
    %253 = vector.load %arg5[%c9, %c0_98] : memref<16x128xf32, #tpu.memory_space<vmem>>, vector<1x32xf32>
    %254 = arith.mulf %252, %252 : vector<18x32xf32>
    %cst_99 = arith.constant dense<0.000000e+00> : vector<18xf32>
    %255 = vector.multi_reduction <add>, %254, %cst_99 [1] : vector<18x32xf32> to vector<18xf32>
    %256 = vector.shape_cast %255 : vector<18xf32> to vector<18x1xf32>
    %cst_100 = arith.constant 3.200000e+01 : f32
    %257 = vector.broadcast %cst_100 : f32 to vector<18x1xf32>
    %258 = arith.divf %256, %257 : vector<18x1xf32>
    %cst_101 = arith.constant 9.99999997E-7 : f32
    %259 = vector.broadcast %cst_101 : f32 to vector<18x1xf32>
    %260 = arith.addf %258, %259 : vector<18x1xf32>
    %261 = math.rsqrt %260 : vector<18x1xf32>
    %262 = vector.broadcast %261 : vector<18x1xf32> to vector<18x32xf32>
    %263 = arith.mulf %252, %262 : vector<18x32xf32>
    %cst_102 = arith.constant 1.000000e+00 : f32
    %264 = vector.broadcast %cst_102 : f32 to vector<1x32xf32>
    %265 = arith.addf %264, %253 : vector<1x32xf32>
    %266 = vector.broadcast %265 : vector<1x32xf32> to vector<18x32xf32>
    %267 = arith.mulf %263, %266 : vector<18x32xf32>
    %c464 = arith.constant 464 : index
    %c0_103 = arith.constant 0 : index
    %268 = vector.load %arg4[%c464, %c0_103] : memref<496x128xf32, #tpu.memory_space<vmem>>, vector<32x128xf32>
    %cst_104 = arith.constant dense<0.000000e+00> : vector<18x128xf32>
    %269 = tpu.matmul %267, %268, %cst_104 {dimension_numbers = #tpu.dot_dimension_numbers<[1], [0], [0], [1], [0, 0, 1, 1], [], []>} : vector<18x32xf32>, vector<32x128xf32>, vector<18x128xf32> -> vector<18x128xf32>
    %c14 = arith.constant 14 : index
    %c0_105 = arith.constant 0 : index
    %270 = vector.load %arg5[%c14, %c0_105] : memref<16x128xf32, #tpu.memory_space<vmem>>, vector<1x128xf32>
    %271 = vector.broadcast %270 : vector<1x128xf32> to vector<18x128xf32>
    %272 = arith.addf %269, %271 : vector<18x128xf32>
    %c0_106 = arith.constant 0 : index
    %c0_107 = arith.constant 0 : index
    %273 = vector.load %arg6[%c0_106, %c0_107] : memref<18x128xf32, #tpu.memory_space<vmem>>, vector<18x128xf32>
    tpu.vector_store %arg6[%c0_106, %c0_107], %272 {strides = array<i32>} : memref<18x128xf32, #tpu.memory_space<vmem>>, vector<18x128xf32>,
    return
  }
}

</mosaic_0001>

<bundles_post_ra>
// kernel: tile.106
= control target key start
LH: loop header
LB: loop body
LE: loop exit
PB: predicated region body
PF: predicated region fallthrough
CT: control target
= control target key end

     0   :  { %s22_s0 = inlined_call_operand.vmem [shape: f32[9], index: 0, kind: input, shape index: {}]   ;;  %s23_s1 = inlined_call_operand.vmem [shape: f32[2,9], index: 1, kind: output, shape index: {}]  }
   0x1   :  { %v4_v0 = vld [vmem:[%s22_s0] ss:$0 sm:$0xff] }
   0x2   :  { %5 = vst [vmem:[%s23_s1] sm:$0x3] %v4_v0 }

// kernel: neg.2
= control target key start
LH: loop header
LB: loop body
LE: loop exit
PB: predicated region body
PF: predicated region fallthrough
CT: control target
= control target key end

     0   :  { %s40_s0 = inlined_call_operand.vmem [shape: f32[18,16], index: 0, kind: input, shape index: {}]   ;;  %s41_s1 = inlined_call_operand.vmem [shape: f32[18,16], index: 1, kind: output, shape index: {}]  }
   0x1   :  { %v2_v0 = vld [vmem:[%s40_s0] sm:$0xff]  ;;  %v16_v1 = vld [vmem:[%s40_s0 + $0x8] sm:$0xff] }
   0x2   :  { %v5_v2 = vxor.u32 2147483648, %v2_v0  ;;  %v12_v3 = vxor.u32 2147483648, %v16_v1 }
   0x4   :  { %7 = vst [vmem:[%s41_s1] sm:$0xff] %v5_v2  ;;  %17 = vst [vmem:[%s41_s1 + $0x8] sm:$0xff] %v12_v3 }

// kernel: neg.3
= control target key start
LH: loop header
LB: loop body
LE: loop exit
PB: predicated region body
PF: predicated region fallthrough
CT: control target
= control target key end

     0   :  { %s40_s0 = inlined_call_operand.vmem [shape: f32[50,16], index: 0, kind: input, shape index: {}]   ;;  %s41_s1 = inlined_call_operand.vmem [shape: f32[50,16], index: 1, kind: output, shape index: {}]  }
   0x1   :  { %v2_v0 = vld [vmem:[%s40_s0] sm:$0xff]  ;;  %v16_v1 = vld [vmem:[%s40_s0 + $0x8] sm:$0xff] }
   0x2   :  { %v5_v2 = vxor.u32 2147483648, %v2_v0  ;;  %v12_v3 = vxor.u32 2147483648, %v16_v1 }
   0x4   :  { %7 = vst [vmem:[%s41_s1] sm:$0xff] %v5_v2  ;;  %17 = vst [vmem:[%s41_s1 + $0x8] sm:$0xff] %v12_v3 }

// kernel: pi0_onestep_forward.1
= control target key start
LH: loop header
LB: loop body
LE: loop exit
PB: predicated region body
PF: predicated region fallthrough
CT: control target
= control target key end

     0   :  { %v4495_v0 = vmov 0.0|0.0   ;;  %vm62_vm0 = vcmask 523264   ;;  %vm146_vm1 = vcmask 261120   ;;  %s4496_s19 = smov 16   ;;  %vm4497_vm2 = vmmov 0   ;;  %s4499_s26 = smov 112   ;;  %s5676_s4 = inlined_call_operand.vmem [shape: f32[496,128], index: 4, kind: input, shape index: {}]   ;;  %s5677_s0 = inlined_call_operand.vmem [shape: f32[16,192], index: 0, kind: input, shape index: {}]   ;;  %s5678_s1 = inlined_call_operand.vmem [shape: f32[16,32], index: 1, kind: input, shape index: {}]   ;;  %s5679_s5 = inlined_call_operand.vmem [shape: f32[16,128], index: 5, kind: input, shape index: {}]   ;;  %s5680_s2 = inlined_call_operand.vmem [shape: f32[18,162], index: 2, kind: input, shape index: {}]   ;;  %s5681_s3 = inlined_call_operand.vmem [shape: f32[50,64], index: 3, kind: input, shape index: {}]   ;;  %s5682_s6 = inlined_call_operand.vmem [shape: f32[18,128], index: 6, kind: output, shape index: {}]  }
   0x1   :  { %3952 = vmatprep.subr.bf16.mxu0 %v4495_v0  ;;  %v33_v1 = vld [vmem:[%s5676_s4] sm:$0xff]  ;;  %v34_v2 = vld [vmem:[%s5676_s4 + $0x8] sm:$0xff]  ;;  %v35_v3 = vld [vmem:[%s5676_s4 + $0x10] sm:$0xff]  ;;  %vm372_vm3 = vcmask 130048   ;;  %vm749_vm4 = vcmask 254976   ;;  %s4500_s20 = smov 96  }
   0x2   :  { %v3953_v4 = vpack.c.bf16 %v34_v2, %v33_v1  ;;  %v36_v5 = vld [vmem:[%s5676_s4 + $0x18] sm:$0xff]  ;;  %v37_v7 = vld [vmem:[%s5676_s4 + $0x20] sm:$0xff]  ;;  %v38_v8 = vld [vmem:[%s5676_s4 + $0x28] sm:$0xff]  ;;  %v4498_v2 = vmov 0.0   ;;  %vm885_vm5 = vcmask 517120   ;;  %s4502_s10 = smov 80  }
   0x3   :  { %v3956_v6 = vpack.c.bf16 %v36_v5, %v35_v3  ;;  %v3959_v9 = vpack.c.bf16 %v38_v8, %v37_v7  ;;  %v39_v10 = vld [vmem:[%s5676_s4 + $0x30] sm:$0xff]  ;;  %v40_v11 = vld [vmem:[%s5676_s4 + $0x38] sm:$0xff]  ;;  %v30_v12 = vld [vmem:[%s5677_s0 + $0x8] sm:$0xff]  ;;  %vm1084_vm6 = vcmask 31744   ;;  %vm1373_vm8 = vcmask 1041408   ;;  %s4504_s16 = smov 124  }
   0x4   :  { %3954 = vmatpush1.bf16.msra.mxu0 %v3953_v4  ;;  %3185 = vmatprep.mubr.msk.f32.mxu0 %vm62_vm0, %v30_v12  ;;  %v3962_v13 = vpack.c.bf16 %v40_v11, %v39_v10  ;;  %v41_v14 = vld [vmem:[%s5676_s4 + $0x40] sm:$0xff]  ;;  %v42_v15 = vld [vmem:[%s5676_s4 + $0x48] sm:$0xff]  ;;  %v43_v17 = vld [vmem:[%s5676_s4 + $0x50] sm:$0xff]  ;;  %vm1312_vm9 = vcmask 408576   ;;  %vm1319_vm10 = vcmask 402432   ;;  %s4505_s17 = smov 88  }
   0x5   :  { %3955 = vmatprep.subr.bf16.mxu0 %v4495_v0  ;;  %v3965_v16 = vpack.c.bf16 %v42_v15, %v41_v14  ;;  %v44_v18 = vld [vmem:[%s5676_s4 + $0x58] sm:$0xff]  ;;  %v45_v20 = vld [vmem:[%s5676_s4 + $0x60] sm:$0xff]  ;;  %v46_v21 = vld [vmem:[%s5676_s4 + $0x68] sm:$0xff]  ;;  %s4506_s18 = smov 104   ;;  %s4508_s21 = smov 100   ;;  %vm2665_vm11 = vcmask 64512  }
   0x6   :  { %v3968_v19 = vpack.c.bf16 %v44_v18, %v43_v17  ;;  %v3971_v22 = vpack.c.bf16 %v46_v21, %v45_v20  ;;  %v47_v23 = vld [vmem:[%s5676_s4 + $0x70] sm:$0xff]  ;;  %v48_v24 = vld [vmem:[%s5676_s4 + $0x78] sm:$0xff]  ;;  %v49_v26 = vld [vmem:[%s5676_s4 + $0x80] sm:$0xff]  ;;  %s4509_s22 = smov 116   ;;  %s4510_s23 = smov 72   ;;  %vm2672_vm12 = vcmask 195584  }
   0x7   :  { %v3974_v25 = vpack.c.bf16 %v48_v24, %v47_v23  ;;  %v50_v27 = vld [vmem:[%s5676_s4 + $0x88] sm:$0xff]  ;;  %v51_v29 = vld [vmem:[%s5676_s4 + $0x90] sm:$0xff]  ;;  %v52_v30 = vld [vmem:[%s5676_s4 + $0x98] sm:$0xff]  ;;  %s4511_s24 = smov 8   ;;  %s4512_s9 = smov 24  }
   0x8   :  { %3957 = vmatpush1.bf16.msra.mxu0 %v3956_v6  ;;  %v3977_v28 = vpack.c.bf16 %v50_v27, %v49_v26  ;;  %v3980_v31 = vpack.c.bf16 %v52_v30, %v51_v29  ;;  %v53_v32 = vld [vmem:[%s5676_s4 + $0xa0] sm:$0xff]  ;;  %v54_v33 = vld [vmem:[%s5676_s4 + $0xa8] sm:$0xff]  ;;  %v55_v35 = vld [vmem:[%s5676_s4 + $0xb0] sm:$0xff] }
   0x9   :  { %3958 = vmatprep.subr.bf16.mxu0 %v4495_v0  ;;  %v3983_v34 = vpack.c.bf16 %v54_v33, %v53_v32  ;;  %v56_v36 = vld [vmem:[%s5676_s4 + $0xb8] sm:$0xff]  ;;  %v29_v38 = vld [vmem:[%s5677_s0] sm:$0xff]  ;;  %v31_v40 = vld [vmem:[%s5677_s0 + $0x10] sm:$0xff] }
   0xa   :  { %v3986_v37 = vpack.c.bf16 %v56_v36, %v55_v35  ;;  %v32_v39 = vld [vmem:[%s5677_s0 + $0x18] sm:$0xff]  ;;  %v4650_v41 = vld [vmem:[%s5678_s1] sm:$0xff]  ;;  %v4657_v43 = vld [vmem:[%s5678_s1 + $0x8] sm:$0xff] }
   0xb   :  { %v258_v42 = vmul.f32 %v4650_v41, %v4650_v41  ;;  %v259_v44 = vmul.f32 %v4657_v43, %v4657_v43  ;;  %v3184_v47 = vld [vmem:[%s5679_s5] ss:$0 sm:$0xff]  ;;  %v24_v58 = vld [vmem:[%s5676_s4 + $0x110] sm:$0xff]  ;;  %v25_v59 = vld [vmem:[%s5676_s4 + $0x118] sm:$0xff] }
   0xc   :  { %3960 = vmatpush1.bf16.msra.mxu0 %v3959_v9  ;;  %v26_v60 = vld [vmem:[%s5676_s4 + $0x120] sm:$0xff]  ;;  %v3988_v62 = vpack.c.bf16 %v25_v59, %v24_v58  ;;  %v27_v63 = vld [vmem:[%s5676_s4 + $0x128] sm:$0xff]  ;;  %v163_v9 = vlaneseq  ;;  %v4712_v23 = vld [vmem:[%s5680_s2 + $0x10] sm:$0xff] }
   0xd   :  { %3961 = vmatprep.subr.bf16.mxu0 %v4495_v0  ;;  %v260_v45 = vsel %vm146_vm1, %v258_v42, 0.0  ;;  %v263_v46 = vsel %vm146_vm1, %v259_v44, 0.0  ;;  %v3196_v61 = vld [vmem:[%s5679_s5 + $0x4] ss:$0 sm:$0xff]  ;;  %v4691_v1 = vpack.c.bf16 %v27_v63, %v26_v60  ;;  %v23_v17 = vld [vmem:[%s5679_s5 + $0x1] sm:$0x1]  ;;  %vm5080_vm7 = vmpackc.low %vm1084_vm6, %vm1084_vm6 }
   0xe   :  { %261 = vadd.xlane.f32.xlu1 %v260_v45  ;;  %3989 = vmatprep.subr.bf16.mxu1 %v3988_v62  ;;  %v164_v14 = vshrl.u32 %v163_v9, 7  ;;  %v4704_v18 = vld [vmem:[%s5680_s2] sm:$0xff]  ;;  %v162_v21 = vadd.f32 1.0, %v23_v17  ;;  %v490_v44 = vld [vmem:[%s5676_s4 + $0xd8] sm:$0xff] }
   0xf   :  { %3991 = vmatpush3.bf16.msra.mxu1 %v3988_v62  ;;  %v4720_v27 = vld [vmem:[%s5680_s2 + $0x20] sm:$0x3]  ;;  %v3192_v59 = vld [vmem:[%s5679_s5 + $0x3] ss:$0 sm:$0xff] }
  0x10   :  { %3963 = vmatpush1.bf16.msra.mxu0 %v3962_v13  ;;  %3993 = vmatprep.subr.bf16.mxu1 %v4691_v1 }
  0x11   :  { %3964 = vmatprep.subr.bf16.mxu0 %v4495_v0 }
  0x12   :  { %264 = vadd.xlane.f32.xlu1 %v263_v46  ;;  %v491_v46 = vld [vmem:[%s5676_s4 + $0xe0] sm:$0xff] }
  0x13   :  { %3995 = vmatpush3.bf16.msra.mxu1 %v4691_v1 }
  0x14   :  { %3966 = vmatpush1.bf16.msra.mxu0 %v3965_v16  ;;  %3997 = vmatprep.subr.bf16.mxu1 %v3988_v62 }
  0x15   :  { %3967 = vmatprep.subr.bf16.mxu0 %v4495_v0 }
  0x18   :  { %3969 = vmatpush1.bf16.msra.mxu0 %v3968_v19 }
  0x19   :  { %3970 = vmatprep.subr.bf16.mxu0 %v4495_v0 }
  0x1c   :  { %3972 = vmatpush1.bf16.msra.mxu0 %v3971_v22  ;;  %v4707_v22 = vsub.s32 0, %v164_v14 }
  0x1d   :  { %3973 = vmatprep.subr.bf16.mxu0 %v4495_v0 }
  0x1e   :  { %v166_v26 = vrot.slane %v162_v21, %v4707_v22 }
  0x20   :  { %3975 = vmatpush1.bf16.msra.mxu0 %v3974_v25 }
  0x21   :  { %3976 = vmatprep.subr.bf16.mxu0 %v4495_v0 }
  0x24   :  { %3978 = vmatpush1.bf16.msra.mxu0 %v3977_v28 }
  0x25   :  { %3979 = vmatprep.subr.bf16.mxu0 %v4495_v0 }
  0x28   :  { %3981 = vmatpush1.bf16.msra.mxu0 %v3980_v31 }
  0x29   :  { %3982 = vmatprep.subr.bf16.mxu0 %v4495_v0 }
  0x2c   :  { %3984 = vmatpush1.bf16.msra.mxu0 %v3983_v34 }
  0x2d   :  { %3985 = vmatprep.subr.bf16.mxu0 %v4495_v0 }
  0x30   :  { %3987 = vmatpush1.bf16.msra.mxu0 %v3986_v37 }
  0x31   :  { %4019 = vmatprep.subr.bf16.mxu0 %v4495_v0 }
  0x33   :  { %134 = vmatmul.mubr.f32.vlgmr.msra.gmra.mrb[0].mxu0 %v29_v38 }
  0x34   :  { %3186 = vmatprep.mubr.msk.f32.mxu0 %vm62_vm0, %v32_v39  ;;  %v365_v39 = vld [vmem:[%s5676_s4 + $0xc0] sm:$0xff] }
  0x37   :  { %139 = vmatmul.mubr.f32.gmra.mrb[2].mxu0 %v31_v40  ;;  %v366_v40 = vld [vmem:[%s5676_s4 + $0xc8] sm:$0xff] }
  0x38   :  { %3591 = vmatprep.mubr.msk.f32.mxu0 %vm4497_vm2, %v4498_v2  ;;  %v4005_v42 = vpack.c.bf16 %v366_v40, %v365_v39 }
  0x9b   :  { %v262_v3 = vpop.xlane.xlu1 %261 }
  0x9c   :  { %v266_v4 = vmul.f32 0.03125, %v262_v3 }
  0x9e   :  { %v268_v6 = vadd.f32 1e-06, %v266_v4 }
  0x9f   :  { %v265_v7 = vpop.xlane.xlu1 %264 }
  0xa0   :  { %v267_v11 = vmul.f32 0.03125, %v265_v7  ;;  %4398 = vrsqrt.f32 %v268_v6 }
  0xa2   :  { %v269_v16 = vadd.f32 1e-06, %v267_v11 }
  0xaa   :  { %v4399_v25 = vpop.eup %4398 }
  0xab   :  { %v272_v31 = vmul.f32 %v4399_v25, %v4650_v41 }
  0xad   :  { %v274_v36 = vmul.f32 %v272_v31, %v166_v26 }
 0x106   :  { %v135_v48 = vpop.f32.mrb[0].mxu0 }
 0x107   :  { %v4666_v49 = vadd.f32 %v3184_v47, %v135_v48  ;;  %v137_v50 = vpop.f32.mrb[1].mxu0 }
 0x109   :  { %v144_v51 = vmul.f32 %v4666_v49, %v4666_v49 }
 0x10a   :  { %v140_v52 = vpop.f32.mrb[2].mxu0 }
 0x10b   :  { %v4670_v53 = vadd.f32 %v3184_v47, %v140_v52  ;;  %v142_v54 = vpop.f32.mrb[3].mxu0  ;;  %v147_v55 = vsel %vm146_vm1, %v144_v51, 0.0  ;;  %v492_v47 = vld [vmem:[%s5676_s4 + $0xe8] sm:$0xff] }
 0x10c   :  { %148 = vadd.xlane.f32.xlu0 %v147_v55  ;;  %v4011_v48 = vpack.c.bf16 %v492_v47, %v491_v46  ;;  %v3204_v47 = vld [vmem:[%s5679_s5 + $0x6] ss:$0 sm:$0xff] }
 0x10d   :  { %v145_v56 = vmul.f32 %v4670_v53, %v4670_v53 }
 0x10f   :  { %v150_v57 = vsel %vm146_vm1, %v145_v56, 0.0 }
 0x110   :  { %151 = vadd.xlane.f32.xlu0 %v150_v57 }
 0x126   :  { %468 = vrot.lane.b32.xlu0 %v3196_v61, %s4496_s19 }
 0x199   :  { %v149_v5 = vpop.xlane.xlu0 %148 }
 0x19a   :  { %v154_v8 = vmul.f32 0.03125, %v149_v5 }
 0x19c   :  { %v156_v10 = vadd.f32 1e-06, %v154_v8 }
 0x19d   :  { %v152_v12 = vpop.xlane.xlu0 %151 }
 0x19e   :  { %4400 = vrsqrt.f32 %v156_v10  ;;  %v155_v13 = vmul.f32 0.03125, %v152_v12  ;;  %v608_v12 = vld [vmem:[%s5676_s4 + $0xf0] sm:$0xff] }
 0x1a0   :  { %v157_v15 = vadd.f32 1e-06, %v155_v13  ;;  %v609_v13 = vld [vmem:[%s5676_s4 + $0xf8] sm:$0xff] }
 0x1a1   :  { %v469_v19 = vpop.permute.xlu0 %468  ;;  %v4014_v14 = vpack.c.bf16 %v609_v13, %v608_v12 }
 0x1a2   :  { %4402 = vrsqrt.f32 %v157_v15  ;;  %v471_v20 = vmul.f32 %v469_v19, %v4704_v18  ;;  %v472_v24 = vmul.f32 %v469_v19, %v4712_v23  ;;  %v473_v29 = vmul.f32 %v469_v19, %v4720_v27  ;;  %v610_v15 = vld [vmem:[%s5676_s4 + $0x100] sm:$0xff] }
 0x1a3   :  { %4404 = vrsqrt.f32 %v269_v16  ;;  %v611_v16 = vld [vmem:[%s5676_s4 + $0x108] sm:$0xff]  ;;  %v3197_v19 = vld [vmem:[%s5679_s5 + $0x5] ss:$0 sm:$0xff] }
 0x1a4   :  { %477 = vrot.lane.b32.xlu1 %v471_v20, %s4499_s26  ;;  %v4017_v17 = vpack.c.bf16 %v611_v16, %v610_v15  ;;  %v773_v16 = vld [vmem:[%s5676_s4 + $0x130] sm:$0xff] }
 0x1a8   :  { %v4401_v28 = vpop.eup %4400  ;;  %479 = vrot.lane.b32.xlu1 %v472_v24, %s4499_s26 }
 0x1a9   :  { %v160_v30 = vmul.f32 %v4401_v28, %v4666_v49  ;;  %v3187_v49 = vld [vmem:[%s5679_s5 + $0x2] ss:$0 sm:$0xff] }
 0x1ab   :  { %v167_v32 = vmul.f32 %v166_v26, %v160_v30 }
 0x1ac   :  { %v4403_v33 = vpop.eup %4402  ;;  %481 = vrot.lane.b32.xlu1 %v473_v29, %s4499_s26 }
 0x1ad   :  { %3522 = vmatprep.mubr.msk.f32.mxu1 %vm146_vm1, %v167_v32  ;;  %v161_v34 = vmul.f32 %v4403_v33, %v4670_v53  ;;  %v4405_v35 = vpop.eup %4404 }
 0x1ae   :  { %v273_v38 = vmul.f32 %v4405_v35, %v4657_v43  ;;  %v489_v43 = vld [vmem:[%s5676_s4 + $0xd0] sm:$0xff] }
 0x1af   :  { %v168_v37 = vmul.f32 %v166_v26, %v161_v34  ;;  %v4008_v45 = vpack.c.bf16 %v490_v44, %v489_v43 }
 0x1b0   :  { %v275_v41 = vmul.f32 %v273_v38, %v166_v26 }
 0x1b1   :  { %3523 = vmatmul.mubr.msk.f32.vlgmr.msra.gmra.mrb[0].mxu1 %vm146_vm1, %v168_v37 }
 0x1b2   :  { %3999 = vmatpush3.bf16.msra.mxu1 %v3988_v62  ;;  %3533 = vmatprep.mubr.msk.f32.mxu1 %vm146_vm1, %v274_v36 }
 0x1b3   :  { %4001 = vmatprep.subr.bf16.mxu1 %v4691_v1 }
 0x1b6   :  { %4003 = vmatpush3.bf16.msra.mxu1 %v4691_v1 }
 0x1b7   :  { %4004 = vmatprep.subr.bf16.mxu1 %v4495_v0 }
 0x1b9   :  { %3534 = vmatmul.mubr.msk.f32.vlgmr.msra.gmra.mrb[2].mxu1 %vm146_vm1, %v275_v41 }
 0x1ba   :  { %4006 = vmatpush3.bf16.msra.mxu1 %v4005_v42  ;;  %3540 = vmatprep.mubr.msk.f32.mxu1 %vm4497_vm2, %v4498_v2 }
 0x1bb   :  { %4007 = vmatprep.subr.bf16.mxu1 %v4495_v0 }
 0x1bd   :  { %3541 = vmatmul.mubr.msk.f32.vlgmr.msra.gmra.mrb[4].mxu1 %vm372_vm3, %v4704_v18 }
 0x1be   :  { %3543 = vmatprep.mubr.msk.f32.mxu1 %vm4497_vm2, %v4498_v2  ;;  %4009 = vmatpush3.bf16.msra.mxu1 %v4008_v45 }
 0x1bf   :  { %4010 = vmatprep.subr.bf16.mxu1 %v4495_v0 }
 0x1c1   :  { %3544 = vmatmul.mubr.msk.f32.gmra.mrb[6].mxu1 %vm372_vm3, %v4712_v23 }
 0x1c2   :  { %3546 = vmatprep.mubr.msk.f32.mxu1 %vm4497_vm2, %v4498_v2  ;;  %4012 = vmatpush3.bf16.msra.mxu1 %v4011_v48 }
 0x1c3   :  { %4013 = vmatprep.subr.bf16.mxu1 %v4495_v0 }
 0x1c5   :  { %3547 = vmatmul.mubr.msk.f32.gmra.mrb[8].mxu1 %vm372_vm3, %v4720_v27 }
 0x1c6   :  { %3557 = vmatprep.mubr.msk.f32.mxu1 %vm4497_vm2, %v4498_v2 }
 0x216   :  { %v478_v57 = vpop.permute.xlu1 %477 }
 0x21a   :  { %v480_v1 = vpop.permute.xlu1 %479 }
 0x21e   :  { %v482_v10 = vpop.permute.xlu1 %481 }
 0x284   :  { %v3524_v50 = vpop.f32.mrb[0].mxu1 }
 0x285   :  { %v251_v51 = vadd.f32 %v3524_v50, %v3187_v49  ;;  %v245_v52 = vpop.f32.mrb[1].mxu1 }
 0x286   :  { %v246_v53 = vadd.f32 %v3187_v49, %v245_v52 }
 0x287   :  { %255 = vst.msk [vmem:[#allocation2 + $0x8] sm:$0xff] %vm62_vm0, %v251_v51 }
 0x288   :  { %254 = vst.msk [vmem:[#allocation2] sm:$0xff] %vm62_vm0, %v246_v53 }
 0x28c   :  { %v3535_v54 = vpop.f32.mrb[2].mxu1 }
 0x28d   :  { %v354_v55 = vadd.f32 %v3535_v54, %v3187_v49  ;;  %v348_v56 = vpop.f32.mrb[3].mxu1 }
 0x28e   :  { %v349_v58 = vadd.f32 %v3187_v49, %v348_v56 }
 0x28f   :  { %358 = vst.msk [vmem:[#allocation2 + $0x18] sm:$0xff] %vm62_vm0, %v354_v55 }
 0x290   :  { %357 = vst.msk [vmem:[#allocation2 + $0x10] sm:$0xff] %vm62_vm0, %v349_v58  ;;  %v448_v60 = vpop.f32.mrb[4].mxu1 }
 0x291   :  { %v449_v61 = vadd.f32 %v3192_v59, %v448_v60  ;;  %v3542_v62 = vpop.f32.mrb[5].mxu1 }
 0x293   :  { %v4781_v63 = vadd.f32 %v478_v57, %v449_v61 }
 0x294   :  { %v453_v3 = vpop.f32.mrb[6].mxu1 }
 0x295   :  { %v454_v4 = vadd.f32 %v3192_v59, %v453_v3  ;;  %v3545_v5 = vpop.f32.mrb[7].mxu1  ;;  %3558 = vmatmul.mubr.msk.f32.vlgmr.msra.gmra.mrb[10].mxu1 %vm146_vm1, %v4781_v63 }
 0x296   :  { %3560 = vmatprep.mubr.msk.f32.mxu1 %vm4497_vm2, %v4498_v2  ;;  %4015 = vmatpush3.bf16.msra.mxu1 %v4014_v14 }
 0x297   :  { %v4787_v6 = vadd.f32 %v480_v1, %v454_v4  ;;  %4016 = vmatprep.subr.bf16.mxu1 %v4495_v0 }
 0x298   :  { %v458_v7 = vpop.f32.mrb[8].mxu1 }
 0x299   :  { %v459_v8 = vadd.f32 %v3192_v59, %v458_v7  ;;  %3561 = vmatmul.mubr.msk.f32.gmra.mrb[12].mxu1 %vm146_vm1, %v4787_v6  ;;  %v3548_v9 = vpop.f32.mrb[9].mxu1 }
 0x29a   :  { %3563 = vmatprep.mubr.msk.f32.mxu1 %vm4497_vm2, %v4498_v2  ;;  %4018 = vmatpush3.bf16.msra.mxu1 %v4017_v17  ;;  %v774_v17 = vld [vmem:[%s5676_s4 + $0x138] sm:$0xff] }
 0x29b   :  { %v4793_v11 = vadd.f32 %v482_v10, %v459_v8  ;;  %4025 = vmatprep.subr.bf16.mxu1 %v4495_v0 }
 0x29d   :  { %3564 = vmatmul.mubr.msk.f32.gmra.mrb[14].mxu1 %vm146_vm1, %v4793_v11 }
 0x29e   :  { %3574 = vmatprep.mubr.msk.f32.mxu1 %vm4497_vm2, %v4498_v2 }
 0x368   :  { %v573_v20 = vpop.f32.mrb[10].mxu1 }
 0x369   :  { %v574_v21 = vadd.f32 %v3197_v19, %v573_v20  ;;  %v3559_v24 = vpop.f32.mrb[11].mxu1  ;;  %v775_v20 = vld [vmem:[%s5676_s4 + $0x140] sm:$0xff] }
 0x36b   :  { %v3201_v25 = vmul.f32 -1.442695, %v574_v21 }
 0x36c   :  { %v578_v26 = vpop.f32.mrb[12].mxu1 }
 0x36d   :  { %4406 = vpow2.f32 %v3201_v25  ;;  %v579_v28 = vadd.f32 %v3197_v19, %v578_v26  ;;  %v3562_v29 = vpop.f32.mrb[13].mxu1 }
 0x36f   :  { %v3202_v30 = vmul.f32 -1.442695, %v579_v28 }
 0x370   :  { %v583_v31 = vpop.f32.mrb[14].mxu1 }
 0x371   :  { %4408 = vpow2.f32 %v3202_v30  ;;  %v584_v32 = vadd.f32 %v3197_v19, %v583_v31  ;;  %v3565_v33 = vpop.f32.mrb[15].mxu1  ;;  %v4020_v19 = vpack.c.bf16 %v774_v17, %v773_v16  ;;  %v739_v31 = vld [vmem:[%s5679_s5 + $0x7] sm:$0x1] }
 0x373   :  { %v3203_v34 = vmul.f32 -1.442695, %v584_v32  ;;  %4021 = vmatpush3.bf16.msra.mxu0 %v4020_v19 }
 0x374   :  { %4022 = vmatprep.subr.bf16.mxu0 %v4495_v0 }
 0x375   :  { %4410 = vpow2.f32 %v3203_v34 }
 0x377   :  { %v4407_v35 = vpop.eup %4406 }
 0x378   :  { %v596_v36 = vadd.f32 1.0, %v4407_v35  ;;  %v765_v35 = vadd.f32 1.0, %v739_v31 }
 0x37a   :  { %4412 = vrcp.f32 %v596_v36 }
 0x37b   :  { %v4409_v37 = vpop.eup %4408 }
 0x37c   :  { %v597_v38 = vadd.f32 1.0, %v4409_v37  ;;  %v769_v37 = vrot.slane %v765_v35, %v4707_v22 }
 0x37e   :  { %4414 = vrcp.f32 %v597_v38 }
 0x37f   :  { %v4411_v39 = vpop.eup %4410 }
 0x380   :  { %v598_v40 = vadd.f32 1.0, %v4411_v39 }
 0x382   :  { %4416 = vrcp.f32 %v598_v40 }
 0x384   :  { %v4413_v41 = vpop.eup %4412 }
 0x385   :  { %v605_v42 = vmul.f32 %v4413_v41, %v574_v21  ;;  %v776_v21 = vld [vmem:[%s5676_s4 + $0x148] sm:$0xff] }
 0x386   :  { %v4023_v24 = vpack.c.bf16 %v776_v21, %v775_v20  ;;  %v4967_v20 = vld [vmem:[%s5681_s3 + $0x30] sm:$0x3] }
 0x387   :  { %3575 = vmatmul.mubr.msk.f32.vlgmr.msra.gmra.mrb[16].mxu1 %vm146_vm1, %v605_v42 }
 0x388   :  { %v4415_v43 = vpop.eup %4414  ;;  %3577 = vmatprep.mubr.msk.f32.mxu1 %vm4497_vm2, %v4498_v2  ;;  %4024 = vmatpush3.bf16.msra.mxu0 %v4023_v24 }
 0x389   :  { %v606_v44 = vmul.f32 %v4415_v43, %v579_v28  ;;  %4049 = vmatprep.subr.bf16.mxu0 %v4495_v0 }
 0x38b   :  { %3578 = vmatmul.mubr.msk.f32.gmra.mrb[18].mxu1 %vm146_vm1, %v606_v44 }
 0x38c   :  { %v4417_v45 = vpop.eup %4416  ;;  %3580 = vmatprep.mubr.msk.f32.mxu1 %vm4497_vm2, %v4498_v2 }
 0x38d   :  { %v607_v46 = vmul.f32 %v4417_v45, %v584_v32 }
 0x38f   :  { %3581 = vmatmul.mubr.msk.f32.gmra.mrb[20].mxu1 %vm146_vm1, %v607_v46 }
 0x390   :  { %3614 = vmatprep.mubr.msk.f32.mxu1 %vm4497_vm2, %v4498_v2 }
 0x45a   :  { %v692_v48 = vpop.f32.mrb[16].mxu1 }
 0x45b   :  { %v693_v49 = vadd.f32 %v3204_v47, %v692_v48  ;;  %v3576_v50 = vpop.f32.mrb[17].mxu1 }
 0x45d   :  { %v706_v51 = vsub.f32 %v4781_v63, %v693_v49 }
 0x45e   :  { %v697_v52 = vpop.f32.mrb[18].mxu1 }
 0x45f   :  { %v698_v53 = vadd.f32 %v3204_v47, %v697_v52  ;;  %712 = vrot.lane.b32.xlu0 %v706_v51, %s4496_s19  ;;  %v3579_v54 = vpop.f32.mrb[19].mxu1 }
 0x460   :  { %v4894_v54 = vld [vmem:[#allocation2] sm:$0xff] }
 0x461   :  { %v707_v55 = vsub.f32 %v4787_v6, %v698_v53 }
 0x462   :  { %v702_v56 = vpop.f32.mrb[20].mxu1 }
 0x463   :  { %v703_v57 = vadd.f32 %v3204_v47, %v702_v56  ;;  %714 = vrot.lane.b32.xlu1 %v707_v55, %s4496_s19  ;;  %v3582_v58 = vpop.f32.mrb[21].mxu1  ;;  %v3208_v47 = vld [vmem:[%s5679_s5 + $0xa] ss:$0 sm:$0xff] }
 0x464   :  { %v894_v58 = vld [vmem:[%s5681_s3] sm:$0xff] }
 0x465   :  { %v708_v59 = vsub.f32 %v4793_v11, %v703_v57  ;;  %v949_v31 = vmul.f32 %v894_v58, %v4894_v54 }
 0x467   :  { %716 = vrot.lane.b32.xlu0 %v708_v59, %s4496_s19  ;;  %v4909_v59 = vld [vmem:[#allocation2 + $0x8] sm:$0xff] }
 0x4d1   :  { %v713_v60 = vpop.permute.xlu0 %712 }
 0x4d2   :  { %v721_v61 = vmul.f32 %v713_v60, %v4704_v18  ;;  %v4914_v60 = vld [vmem:[#allocation2 + $0x10] sm:$0xff] }
 0x4d4   :  { %727 = vrot.lane.b32.xlu1 %v721_v61, %s4499_s26  ;;  %v895_v61 = vld [vmem:[%s5681_s3 + $0x8] sm:$0xff] }
 0x4d5   :  { %v715_v62 = vpop.permute.xlu1 %714 }
 0x4d6   :  { %v722_v63 = vmul.f32 %v715_v62, %v4712_v23  ;;  %v896_v62 = vld [vmem:[%s5681_s3 + $0x10] sm:$0xff] }
 0x4d8   :  { %729 = vrot.lane.b32.xlu0 %v722_v63, %s4499_s26  ;;  %v4929_v63 = vld [vmem:[#allocation2 + $0x18] sm:$0xff] }
 0x4d9   :  { %v717_v1 = vpop.permute.xlu0 %716 }
 0x4da   :  { %v723_v3 = vmul.f32 %v717_v1, %v4720_v27  ;;  %v4937_v1 = vld [vmem:[%s5681_s3 + $0x20] sm:$0xff] }
 0x4dc   :  { %731 = vrot.lane.b32.xlu1 %v723_v3, %s4499_s26  ;;  %v897_v3 = vld [vmem:[%s5681_s3 + $0x18] sm:$0xff] }
 0x546   :  { %v728_v4 = vpop.permute.xlu1 %727 }
 0x547   :  { %v4840_v5 = vadd.f32 %v728_v4, %v693_v49 }
 0x549   :  { %v740_v6 = vmul.f32 %v4840_v5, %v4840_v5 }
 0x54a   :  { %v730_v7 = vpop.permute.xlu0 %729 }
 0x54b   :  { %v4844_v8 = vadd.f32 %v730_v7, %v698_v53  ;;  %v743_v9 = vsel %vm146_vm1, %v740_v6, 0.0 }
 0x54c   :  { %744 = vadd.xlane.f32.xlu0 %v743_v9 }
 0x54d   :  { %v741_v10 = vmul.f32 %v4844_v8, %v4844_v8 }
 0x54e   :  { %v732_v11 = vpop.permute.xlu1 %731 }
 0x54f   :  { %v4849_v12 = vadd.f32 %v732_v11, %v703_v57  ;;  %v746_v13 = vsel %vm146_vm1, %v741_v10, 0.0 }
 0x550   :  { %747 = vadd.xlane.f32.xlu1 %v746_v13  ;;  %v899_v13 = vld [vmem:[%s5681_s3 + $0x28] sm:$0xff]  ;;  %s4501_s3 = smov 48  }
 0x551   :  { %v742_v14 = vmul.f32 %v4849_v12, %v4849_v12 }
 0x553   :  { %v750_v15 = vsel %vm749_vm4, %v742_v14, 0.0 }
 0x554   :  { %751 = vadd.xlane.f32.xlu0 %v750_v15 }
 0x5d9   :  { %v745_v25 = vpop.xlane.xlu0 %744 }
 0x5da   :  { %v753_v26 = vmul.f32 0.03125, %v745_v25 }
 0x5dc   :  { %v756_v28 = vadd.f32 1e-06, %v753_v26 }
 0x5dd   :  { %v748_v29 = vpop.xlane.xlu1 %747 }
 0x5de   :  { %4418 = vrsqrt.f32 %v756_v28  ;;  %v754_v30 = vmul.f32 0.03125, %v748_v29 }
 0x5e0   :  { %v757_v32 = vadd.f32 1e-06, %v754_v30 }
 0x5e1   :  { %v752_v33 = vpop.xlane.xlu0 %751 }
 0x5e2   :  { %4420 = vrsqrt.f32 %v757_v32  ;;  %v755_v34 = vmul.f32 0.03125, %v752_v33  ;;  %v950_v32 = vmul.f32 %v895_v61, %v4909_v59 }
 0x5e4   :  { %v758_v36 = vadd.f32 1e-06, %v755_v34 }
 0x5e6   :  { %4422 = vrsqrt.f32 %v758_v36 }
 0x5e8   :  { %v4419_v38 = vpop.eup %4418 }
 0x5e9   :  { %v762_v39 = vmul.f32 %v4419_v38, %v4840_v5 }
 0x5eb   :  { %v770_v40 = vmul.f32 %v769_v37, %v762_v39 }
 0x5ec   :  { %v4421_v41 = vpop.eup %4420 }
 0x5ed   :  { %3592 = vmatmul.mubr.msk.f32.vlgmr.msra.gmra.mrb[4].mxu0 %vm146_vm1, %v770_v40  ;;  %v763_v42 = vmul.f32 %v4421_v41, %v4844_v8 }
 0x5ee   :  { %3594 = vmatprep.mubr.msk.f32.mxu0 %vm4497_vm2, %v4498_v2 }
 0x5ef   :  { %v771_v43 = vmul.f32 %v769_v37, %v763_v42 }
 0x5f0   :  { %v4423_v44 = vpop.eup %4422 }
 0x5f1   :  { %3595 = vmatmul.mubr.msk.f32.gmra.mrb[6].mxu0 %vm146_vm1, %v771_v43  ;;  %v764_v45 = vmul.f32 %v4423_v44, %v4849_v12 }
 0x5f2   :  { %3597 = vmatprep.mubr.msk.f32.mxu0 %vm4497_vm2, %v4498_v2 }
 0x5f3   :  { %v772_v46 = vmul.f32 %v769_v37, %v764_v45 }
 0x5f5   :  { %3598 = vmatmul.mubr.msk.f32.gmra.mrb[8].mxu0 %vm146_vm1, %v772_v46  ;;  %v951_v46 = vmul.f32 %v896_v62, %v4914_v60 }
 0x5f6   :  { %3660 = vmatprep.mubr.msk.f32.mxu0 %vm4497_vm2, %v4498_v2 }
 0x6c0   :  { %v857_v48 = vpop.f32.mrb[4].mxu0 }
 0x6c1   :  { %v4888_v49 = vadd.f32 %v3208_v47, %v857_v48  ;;  %v3593_v50 = vpop.f32.mrb[5].mxu0 }
 0x6c3   :  { %874 = vrot.lane.b32.xlu0 %v4888_v49, %s4500_s20 }
 0x6c4   :  { %v862_v51 = vpop.f32.mrb[6].mxu0 }
 0x6c5   :  { %v4892_v52 = vadd.f32 %v3208_v47, %v862_v51  ;;  %v3596_v53 = vpop.f32.mrb[7].mxu0 }
 0x6c7   :  { %963 = vrot.lane.b32.xlu0 %v4894_v54, %s4499_s26  ;;  %876 = vrot.lane.b32.xlu1 %v4892_v52, %s4500_s20 }
 0x6c8   :  { %v867_v55 = vpop.f32.mrb[8].mxu0 }
 0x6c9   :  { %v4900_v56 = vadd.f32 %v3208_v47, %v867_v55  ;;  %v3599_v57 = vpop.f32.mrb[9].mxu0  ;;  %v952_v47 = vmul.f32 %v897_v3, %v4929_v63 }
 0x6cb   :  { %984 = vrot.lane.b32.xlu0 %v4894_v54, %s4496_s19  ;;  %878 = vrot.lane.b32.xlu1 %v4900_v56, %s4500_s20 }
 0x6cf   :  { %1019 = vrot.lane.b32.xlu0 %v894_v58, %s4500_s20  ;;  %965 = vrot.lane.b32.xlu1 %v4909_v59, %s4499_s26 }
 0x6d3   :  { %967 = vrot.lane.b32.xlu0 %v4914_v60, %s4499_s26  ;;  %986 = vrot.lane.b32.xlu1 %v4909_v59, %s4496_s19 }
 0x6d7   :  { %988 = vrot.lane.b32.xlu0 %v4914_v60, %s4496_s19  ;;  %1021 = vrot.lane.b32.xlu1 %v895_v61, %s4500_s20 }
 0x6db   :  { %1023 = vrot.lane.b32.xlu0 %v896_v62, %s4500_s20  ;;  %969 = vrot.lane.b32.xlu1 %v4929_v63, %s4499_s26 }
 0x6df   :  { %990 = vrot.lane.b32.xlu1 %v4929_v63, %s4496_s19  ;;  %1027 = vrot.lane.b32.xlu0 %v4937_v1, %s4500_s20 }
 0x6e3   :  { %1025 = vrot.lane.b32.xlu1 %v897_v3, %s4500_s20 }
 0x735   :  { %v875_v4 = vpop.permute.xlu0 %874 }
 0x736   :  { %883 = vst.msk [vmem:[#allocation2 + $0x20] sm:$0xff] %vm62_vm0, %v875_v4 }
 0x739   :  { %v877_v6 = vpop.permute.xlu1 %876  ;;  %v964_v7 = vpop.permute.xlu0 %963 }
 0x73a   :  { %884 = vst.msk [vmem:[#allocation2 + $0x28] sm:$0xff] %vm62_vm0, %v877_v6 }
 0x73d   :  { %v4949_v9 = vld [vmem:[#allocation2 + $0x20] sm:$0xff]  ;;  %v879_v10 = vpop.permute.xlu1 %878  ;;  %v985_v11 = vpop.permute.xlu0 %984 }
 0x73e   :  { %886 = vst.msk [vmem:[#allocation2 + $0x30] sm:$0x3] %vm885_vm5, %v879_v10  ;;  %971 = vrot.lane.b32.xlu0 %v4949_v9, %s4499_s26  ;;  %v1005_v25 = vsel %vm372_vm3, %v964_v7, %v985_v11 }
 0x741   :  { %v966_v14 = vpop.permute.xlu1 %965  ;;  %v1020_v15 = vpop.permute.xlu0 %1019  ;;  %v892_v16 = vld [vmem:[#allocation2 + $0x28] sm:$0xff] }
 0x742   :  { %973 = vrot.lane.b32.xlu1 %v892_v16, %s4499_s26  ;;  %992 = vrot.lane.b32.xlu0 %v4949_v9, %s4496_s19  ;;  %v4959_v17 = vmul.f32 %v899_v13, %v892_v16  ;;  %v4962_v19 = vpack.i.bf16 %v892_v16, %v4949_v9  ;;  %v1040_v26 = vmul.f32 %v1020_v15, %v1005_v25 }
 0x744   :  { %v4981_v35 = vadd.f32 %v1040_v26, %v949_v31 }
 0x745   :  { %v987_v21 = vpop.permute.xlu1 %986  ;;  %v968_v24 = vpop.permute.xlu0 %967  ;;  %v4974_v29 = vld [vmem:[#allocation2 + $0x30] sm:$0x3] }
 0x746   :  { %994 = vrot.lane.b32.xlu1 %v892_v16, %s4496_s19  ;;  %1031 = vrot.lane.b32.xlu0 %v4967_v20, %s4500_s20  ;;  %v1006_v28 = vsel %vm372_vm3, %v966_v14, %v987_v21  ;;  %v953_v14 = vmul.f32 %v4937_v1, %v4949_v9 }
 0x749   :  { %v1022_v30 = vpop.permute.xlu1 %1021  ;;  %v989_v34 = vpop.permute.xlu0 %988 }
 0x74a   :  { %v1041_v33 = vmul.f32 %v1022_v30, %v1006_v28  ;;  %1029 = vrot.lane.b32.xlu1 %v899_v13, %s4500_s20  ;;  %975 = vrot.lane.b32.xlu0 %v4974_v29, %s4499_s26  ;;  %v1007_v42 = vsel %vm372_vm3, %v968_v24, %v989_v34  ;;  %v955_v24 = vmul.f32 %v4967_v20, %v4974_v29 }
 0x74c   :  { %v4983_v36 = vadd.f32 %v1041_v33, %v950_v32 }
 0x74d   :  { %v970_v37 = vpop.permute.xlu1 %969  ;;  %v1024_v40 = vpop.permute.xlu0 %1023 }
 0x74e   :  { %996 = vrot.lane.b32.xlu1 %v4974_v29, %s4496_s19  ;;  %922 = vrot.lane.b32.xlu0 %v4888_v49, %s4496_s19  ;;  %v4038_v38 = vpack.c.bf16 %v4983_v36, %v4981_v35  ;;  %v4993_v39 = vpack.i.bf16 %v4983_v36, %v4981_v35  ;;  %v1042_v43 = vmul.f32 %v1024_v40, %v1007_v42 }
 0x750   :  { %v5006_v50 = vadd.f32 %v1042_v43, %v951_v46 }
 0x751   :  { %v991_v41 = vpop.permute.xlu1 %990  ;;  %v1028_v57 = vpop.permute.xlu0 %1027 }
 0x752   :  { %913 = vrot.lane.b32.xlu1 %v4888_v49, %s4499_s26  ;;  %934 = vrot.lane.b32.xlu0 %v4704_v18, %s4501_s3  ;;  %v1008_v44 = vsel %vm372_vm3, %v970_v37, %v991_v41 }
 0x755   :  { %v1026_v45 = vpop.permute.xlu1 %1025 }
 0x756   :  { %v1043_v48 = vmul.f32 %v1026_v45, %v1008_v44  ;;  %901 = vrot.lane.b32.xlu1 %v4704_v18, %s4502_s10  ;;  %924 = vrot.lane.b32.xlu0 %v4892_v52, %s4496_s19 }
 0x758   :  { %v5008_v51 = vadd.f32 %v1043_v48, %v952_v47 }
 0x75a   :  { %915 = vrot.lane.b32.xlu1 %v4892_v52, %s4499_s26  ;;  %936 = vrot.lane.b32.xlu0 %v4712_v23, %s4501_s3  ;;  %v4042_v53 = vpack.c.bf16 %v5008_v51, %v5006_v50  ;;  %v5017_v55 = vpack.i.bf16 %v5008_v51, %v5006_v50 }
 0x75e   :  { %903 = vrot.lane.b32.xlu1 %v4712_v23, %s4502_s10  ;;  %926 = vrot.lane.b32.xlu0 %v4900_v56, %s4496_s19 }
 0x762   :  { %917 = vrot.lane.b32.xlu1 %v4900_v56, %s4499_s26  ;;  %938 = vrot.lane.b32.xlu0 %v4720_v27, %s4501_s3 }
 0x766   :  { %905 = vrot.lane.b32.xlu1 %v4720_v27, %s4502_s10  ;;  %4239 = vrot.lane.b32.xlu0 %v5017_v55, %s4499_s26 }
 0x76a   :  { %4234 = vrot.lane.b32.xlu1 %v4993_v39, %s4499_s26 }
 0x7b0   :  { %v972_v58 = vpop.permute.xlu0 %971 }
 0x7b4   :  { %v974_v61 = vpop.permute.xlu1 %973  ;;  %v993_v62 = vpop.permute.xlu0 %992 }
 0x7b5   :  { %v1009_v3 = vsel %vm372_vm3, %v972_v58, %v993_v62 }
 0x7b6   :  { %v1044_v7 = vmul.f32 %v1028_v57, %v1009_v3 }
 0x7b8   :  { %v995_v4 = vpop.permute.xlu1 %994  ;;  %v1032_v6 = vpop.permute.xlu0 %1031  ;;  %v5036_v16 = vadd.f32 %v1044_v7, %v953_v14 }
 0x7b9   :  { %v1010_v10 = vsel %vm372_vm3, %v974_v61, %v995_v4 }
 0x7bc   :  { %v1030_v11 = vpop.permute.xlu1 %1029  ;;  %v976_v13 = vpop.permute.xlu0 %975 }
 0x7bd   :  { %v1045_v15 = vmul.f32 %v1030_v11, %v1010_v10 }
 0x7bf   :  { %v5039_v21 = vadd.f32 %v1045_v15, %v4959_v17  ;;  %v363_v15 = vld [vmem:[%s5680_s2 + $0x18] sm:$0xff] }
 0x7c0   :  { %v997_v25 = vpop.permute.xlu1 %996  ;;  %v923_v26 = vpop.permute.xlu0 %922 }
 0x7c1   :  { %v1011_v28 = vsel %vm372_vm3, %v976_v13, %v997_v25  ;;  %v5046_v30 = vpack.i.bf16 %v5039_v21, %v5036_v16  ;;  %v4046_v1 = vpack.c.bf16 %v5039_v21, %v5036_v16  ;;  %v5108_v25 = vpack.i.bf16 %v4909_v59, %v4894_v54 }
 0x7c2   :  { %v1046_v9 = vmul.f32 %v1032_v6, %v1011_v28 }
 0x7c3   :  { %4244 = vrot.lane.b32.xlu1 %v5046_v30, %s4499_s26 }
 0x7c4   :  { %v5052_v17 = vadd.f32 %v1046_v9, %v955_v24  ;;  %v914_v31 = vpop.permute.xlu1 %913  ;;  %v935_v32 = vpop.permute.xlu0 %934 }
 0x7c5   :  { %v931_v20 = vsel %vm372_vm3, %v914_v31, %v923_v26  ;;  %v5114_v26 = vpack.i.bf16 %v4929_v63, %v4914_v60 }
 0x7c6   :  { %1082 = vrot.lane.b32.xlu0 %v5052_v17, %s4499_s26  ;;  %v943_v37 = vmul.f32 %v935_v32, %v931_v20 }
 0x7c8   :  { %v902_v33 = vpop.permute.xlu1 %901  ;;  %v925_v34 = vpop.permute.xlu0 %924 }
 0x7c9   :  { %v910_v40 = vmul.f32 %v902_v33, %v4888_v49 }
 0x7cb   :  { %v5058_v41 = vadd.f32 %v943_v37, %v910_v40 }
 0x7cc   :  { %v916_v42 = vpop.permute.xlu1 %915  ;;  %v937_v43 = vpop.permute.xlu0 %936 }
 0x7cd   :  { %1057 = vrot.lane.b32.xlu1 %v5058_v41, %s4499_s26  ;;  %v932_v44 = vsel %vm372_vm3, %v916_v42, %v925_v34 }
 0x7ce   :  { %v944_v47 = vmul.f32 %v937_v43, %v932_v44 }
 0x7d0   :  { %v904_v45 = vpop.permute.xlu1 %903  ;;  %v927_v46 = vpop.permute.xlu0 %926 }
 0x7d1   :  { %v911_v48 = vmul.f32 %v904_v45, %v4892_v52 }
 0x7d3   :  { %v5064_v57 = vadd.f32 %v944_v47, %v911_v48 }
 0x7d4   :  { %v918_v58 = vpop.permute.xlu1 %917  ;;  %v939_v61 = vpop.permute.xlu0 %938 }
 0x7d5   :  { %1059 = vrot.lane.b32.xlu0 %v5064_v57, %s4499_s26  ;;  %v933_v49 = vsel %vm372_vm3, %v918_v58, %v927_v46 }
 0x7d6   :  { %v945_v3 = vmul.f32 %v939_v61, %v933_v49 }
 0x7d8   :  { %v906_v62 = vpop.permute.xlu1 %905  ;;  %v4240_v13 = vpop.permute.xlu0 %4239 }
 0x7d9   :  { %v912_v4 = vmul.f32 %v906_v62, %v4900_v56  ;;  %1291 = vrot.lane.b32.xlu0 %v4704_v18, %s4496_s19  ;;  %v362_v18 = vld [vmem:[%s5680_s2 + $0x8] sm:$0xff]  ;;  %v4241_v14 = vunpack.i.l.bf16 %v4240_v13 }
 0x7db   :  { %v5072_v6 = vadd.f32 %v945_v3, %v912_v4 }
 0x7dc   :  { %v4235_v52 = vpop.permute.xlu1 %4234 }
 0x7dd   :  { %v4237_v7 = vunpack.i.h.bf16 %v4235_v52  ;;  %v4236_v10 = vunpack.i.l.bf16 %v4235_v52  ;;  %1295 = vrot.lane.b32.xlu0 %v4712_v23, %s4496_s19  ;;  %1061 = vrot.lane.b32.xlu1 %v5072_v6, %s4499_s26  ;;  %v4242_v23 = vunpack.i.h.bf16 %v4240_v13 }
 0x7df   :  { %v4026_v56 = vpack.c.bf16 %v4237_v7, %v4236_v10  ;;  %v4030_v24 = vpack.c.bf16 %v4242_v23, %v4241_v14 }
 0x7e1   :  { %4028 = vmatpush3.bf16.xpose.msk.msra.mxu1 %vm5080_vm7, %v4026_v56  ;;  %1299 = vrot.lane.b32.xlu0 %v4720_v27, %s4496_s19  ;;  %v364_v27 = vld [vmem:[%s5680_s2 + $0x28] sm:$0x3]  ;;  %s4503_s2 = smov 108  }
 0x7e2   :  { %1293 = vrot.lane.b32.xlu1 %v362_v18, %s4496_s19  ;;  %4029 = vmatprep.subr.bf16.mxu1 %v4495_v0 }
 0x7e5   :  { %1356 = vrot.lane.b32.xlu0 %v4974_v29, %s4500_s20 }
 0x7e6   :  { %1297 = vrot.lane.b32.xlu1 %v363_v15, %s4496_s19 }
 0x7e9   :  { %4032 = vmatpush3.bf16.xpose.msk.msra.mxu1 %vm5080_vm7, %v4030_v24 }
 0x7ea   :  { %1301 = vrot.lane.b32.xlu1 %v364_v27, %s4496_s19  ;;  %4033 = vmatprep.subr.bf16.mxu1 %v4495_v0 }
 0x7ee   :  { %4249 = vrot.lane.b32.xlu1 %v5108_v25, %s4500_s20 }
 0x7f2   :  { %4254 = vrot.lane.b32.xlu1 %v5114_v26, %s4500_s20 }
 0x7f6   :  { %4259 = vrot.lane.b32.xlu1 %v4962_v19, %s4500_s20  ;;  %s4507_s20 = smov 120  }
 0x835   :  { %v4245_v28 = vpop.permute.xlu1 %4244 }
 0x836   :  { %v4247_v9 = vunpack.i.h.bf16 %v4245_v28  ;;  %v4246_v31 = vunpack.i.l.bf16 %v4245_v28 }
 0x838   :  { %v4034_v32 = vpack.c.bf16 %v4247_v9, %v4246_v31  ;;  %v1083_v54 = vpop.permute.xlu0 %1082 }
 0x83a   :  { %4036 = vmatpush3.bf16.xpose.msk.msra.mxu1 %vm5080_vm7, %v4034_v32 }
 0x83b   :  { %3612 = vmatprep.subr.mxu1 %v4498_v2 }
 0x83f   :  { %v1058_v59 = vpop.permute.xlu1 %1057 }
 0x842   :  { %3613 = vmatpush3.xpose.msk.msra.mxu1 %vm1084_vm6, %v1083_v54 }
 0x843   :  { %4037 = vmatprep.subr.bf16.mxu1 %v4495_v0 }
 0x845   :  { %3615 = vmatmul.mubr.msk.f32.vlgmr.msra.gmra.mrb[22].mxu1 %vm1084_vm6, %v1058_v59 }
 0x846   :  { %4040 = vmatpush3.bf16.xpose.msk.msra.mxu1 %vm5080_vm7, %v4038_v38  ;;  %3617 = vmatprep.mubr.msk.f32.mxu1 %vm4497_vm2, %v4498_v2 }
 0x847   :  { %v1060_v60 = vpop.permute.xlu0 %1059  ;;  %4041 = vmatprep.subr.bf16.mxu1 %v4495_v0 }
 0x849   :  { %3618 = vmatmul.mubr.msk.f32.gmra.mrb[24].mxu1 %vm1084_vm6, %v1060_v60 }
 0x84a   :  { %3620 = vmatprep.mubr.msk.f32.mxu1 %vm4497_vm2, %v4498_v2 }
 0x84b   :  { %v1292_v50 = vpop.permute.xlu0 %1291 }
 0x84e   :  { %4044 = vmatpush3.bf16.xpose.msk.msra.mxu1 %vm5080_vm7, %v4042_v53 }
 0x84f   :  { %v1062_v63 = vpop.permute.xlu1 %1061  ;;  %4045 = vmatprep.subr.bf16.mxu1 %v4495_v0  ;;  %v1296_v21 = vpop.permute.xlu0 %1295 }
 0x850   :  { %3621 = vmatmul.mubr.msk.f32.gmra.mrb[26].mxu1 %vm1084_vm6, %v1062_v63 }
 0x851   :  { %3637 = vmatprep.mubr.msk.f32.mxu1 %vm4497_vm2, %v4498_v2 }
 0x853   :  { %v1300_v44 = vpop.permute.xlu0 %1299 }
 0x854   :  { %v1294_v35 = vpop.permute.xlu1 %1293 }
 0x855   :  { %v5173_v47 = vsel %vm372_vm3, %v1292_v50, %v1294_v35 }
 0x856   :  { %4048 = vmatpush3.bf16.xpose.msk.msra.mxu1 %vm5080_vm7, %v4046_v1 }
 0x857   :  { %3635 = vmatprep.subr.mxu1 %v4498_v2  ;;  %v1357_v46 = vpop.permute.xlu0 %1356 }
 0x858   :  { %v1298_v36 = vpop.permute.xlu1 %1297 }
 0x859   :  { %v5177_v62 = vsel %vm372_vm3, %v1296_v21, %v1298_v36 }
 0x85c   :  { %v1302_v38 = vpop.permute.xlu1 %1301 }
 0x85d   :  { %v5182_v56 = vsel %vm372_vm3, %v1300_v44, %v1302_v38 }
 0x85e   :  { %3636 = vmatpush3.xpose.msk.msra.mxu1 %vm1084_vm6, %v5052_v17 }
 0x85f   :  { %4082 = vmatprep.subr.bf16.mxu1 %v4495_v0 }
 0x860   :  { %v4250_v51 = vpop.permute.xlu1 %4249 }
 0x861   :  { %v4252_v53 = vunpack.i.h.bf16 %v4250_v51  ;;  %v4251_v20 = vunpack.i.l.bf16 %v4250_v51  ;;  %3638 = vmatmul.mubr.msk.f32.vlgmr.msra.gmra.mrb[22].mxu1 %vm1084_vm6, %v5058_v41 }
 0x862   :  { %3640 = vmatprep.mubr.msk.f32.mxu1 %vm4497_vm2, %v4498_v2 }
 0x863   :  { %v4050_v16 = vpack.c.bf16 %v4252_v53, %v4251_v20 }
 0x864   :  { %v4255_v1 = vpop.permute.xlu1 %4254 }
 0x865   :  { %v4257_v33 = vunpack.i.h.bf16 %v4255_v1  ;;  %v4256_v34 = vunpack.i.l.bf16 %v4255_v1  ;;  %4051 = vmatpush3.bf16.msra.mxu0 %v4050_v16  ;;  %3641 = vmatmul.mubr.msk.f32.gmra.mrb[24].mxu1 %vm1084_vm6, %v5064_v57 }
 0x866   :  { %4052 = vmatprep.subr.bf16.mxu0 %v4495_v0  ;;  %3643 = vmatprep.mubr.msk.f32.mxu1 %vm4497_vm2, %v4498_v2 }
 0x867   :  { %v4053_v37 = vpack.c.bf16 %v4257_v33, %v4256_v34 }
 0x868   :  { %v4260_v40 = vpop.permute.xlu1 %4259 }
 0x869   :  { %v4262_v42 = vunpack.i.h.bf16 %v4260_v40  ;;  %v4261_v43 = vunpack.i.l.bf16 %v4260_v40  ;;  %4054 = vmatpush3.bf16.msra.mxu0 %v4053_v37  ;;  %3644 = vmatmul.mubr.msk.f32.gmra.mrb[26].mxu1 %vm1084_vm6, %v5072_v6 }
 0x86a   :  { %4055 = vmatprep.subr.bf16.mxu0 %v4495_v0  ;;  %3729 = vmatprep.mubr.msk.f32.mxu1 %vm4497_vm2, %v4498_v2 }
 0x86b   :  { %v4056_v45 = vpack.c.bf16 %v4262_v42, %v4261_v43 }
 0x86d   :  { %4057 = vmatpush3.bf16.msra.mxu0 %v4056_v45 }
 0x86e   :  { %3658 = vmatprep.subr.mxu0 %v4498_v2 }
 0x871   :  { %3659 = vmatpush3.msk.msra.mxu0 %vm1373_vm8, %v1357_v46 }
 0x872   :  { %4058 = vmatprep.subr.bf16.mxu0 %v4495_v0 }
 0x934   :  { %v1271_v48 = vpop.f32.mrb[22].mxu1 }
 0x935   :  { %v1285_v58 = vmul.f32 0.35355338, %v1271_v48  ;;  %v3639_v49 = vpop.f32.mrb[23].mxu1 }
 0x937   :  { %v1309_v61 = vadd.f32 %v5173_v47, %v1285_v58 }
 0x938   :  { %v1276_v3 = vpop.f32.mrb[24].mxu1 }
 0x939   :  { %v1286_v4 = vmul.f32 0.35355338, %v1276_v3  ;;  %v3642_v52 = vpop.f32.mrb[25].mxu1  ;;  %v1313_v7 = vsel %vm1312_vm9, %v1309_v61, -inf }
 0x93a   :  { %1314 = vmax.xlane.f32.xlu0 %v1313_v7 }
 0x93b   :  { %v1310_v10 = vadd.f32 %v5177_v62, %v1286_v4 }
 0x93c   :  { %v1281_v18 = vpop.f32.mrb[26].mxu1 }
 0x93d   :  { %v1287_v13 = vmul.f32 0.35355338, %v1281_v18  ;;  %v3645_v23 = vpop.f32.mrb[27].mxu1  ;;  %v1316_v14 = vsel %vm1312_vm9, %v1310_v10, -inf }
 0x93e   :  { %1317 = vmax.xlane.f32.xlu1 %v1316_v14 }
 0x93f   :  { %v1311_v15 = vadd.f32 %v5182_v56, %v1287_v13 }
 0x941   :  { %v1320_v24 = vsel %vm1319_vm10, %v1311_v15, -inf }
 0x942   :  { %1321 = vmax.xlane.f32.xlu1 %v1320_v24 }
 0x950   :  { %4264 = vrot.lane.b32.xlu0 %v4993_v39, %s4503_s2 }
 0x953   :  { %4269 = vrot.lane.b32.xlu1 %v5017_v55, %s4503_s2 }
 0x954   :  { %4274 = vrot.lane.b32.xlu0 %v5046_v30, %s4503_s2 }
 0x957   :  { %4284 = vrot.lane.b32.xlu1 %v5017_v55, %s4504_s16 }
 0x958   :  { %1477 = vrot.lane.b32.xlu0 %v5052_v17, %s4503_s2 }
 0x95b   :  { %1461 = vrot.lane.b32.xlu1 %v5064_v57, %s4503_s2 }
 0x95c   :  { %4279 = vrot.lane.b32.xlu0 %v4993_v39, %s4504_s16 }
 0x95f   :  { %1597 = vrot.lane.b32.xlu1 %v5052_v17, %s4504_s16 }
 0x960   :  { %1459 = vrot.lane.b32.xlu0 %v5058_v41, %s4503_s2 }
 0x963   :  { %1581 = vrot.lane.b32.xlu1 %v5064_v57, %s4504_s16 }
 0x964   :  { %4289 = vrot.lane.b32.xlu0 %v5046_v30, %s4504_s16 }
 0x967   :  { %1747 = vrot.lane.b32.xlu1 %v4974_v29, %s4505_s17 }
 0x968   :  { %1463 = vrot.lane.b32.xlu0 %v5072_v6, %s4503_s2 }
 0x96c   :  { %1579 = vrot.lane.b32.xlu0 %v5058_v41, %s4504_s16 }
 0x970   :  { %1583 = vrot.lane.b32.xlu0 %v5072_v6, %s4504_s16 }
 0x974   :  { %4294 = vrot.lane.b32.xlu0 %v5108_v25, %s4505_s17 }
 0x978   :  { %4299 = vrot.lane.b32.xlu0 %v5114_v26, %s4505_s17 }
 0x97c   :  { %4304 = vrot.lane.b32.xlu0 %v4962_v19, %s4505_s17 }
 0x9c7   :  { %v1315_v27 = vpop.xlane.xlu0 %1314 }
 0x9c8   :  { %v1323_v28 = vsub.f32 %v1309_v61, %v1315_v27 }
 0x9ca   :  { %v1326_v9 = vmul.f32 1.442695, %v1323_v28 }
 0x9cb   :  { %v4265_v31 = vpop.permute.xlu0 %4264  ;;  %v1318_v32 = vpop.xlane.xlu1 %1317 }
 0x9cc   :  { %4424 = vpow2.f32 %v1326_v9  ;;  %v1324_v54 = vsub.f32 %v1310_v10, %v1318_v32  ;;  %v4267_v36 = vunpack.i.h.bf16 %v4265_v31  ;;  %v4266_v38 = vunpack.i.l.bf16 %v4265_v31 }
 0x9ce   :  { %v1328_v59 = vmul.f32 1.442695, %v1324_v54  ;;  %v4059_v20 = vpack.c.bf16 %v4267_v36, %v4266_v38 }
 0x9cf   :  { %v4275_v60 = vpop.permute.xlu0 %4274  ;;  %v1322_v63 = vpop.xlane.xlu1 %1321 }
 0x9d0   :  { %4426 = vpow2.f32 %v1328_v59  ;;  %v1325_v35 = vsub.f32 %v1311_v15, %v1322_v63  ;;  %v4277_v44 = vunpack.i.h.bf16 %v4275_v60  ;;  %v4276_v45 = vunpack.i.l.bf16 %v4275_v60 }
 0x9d2   :  { %v1330_v50 = vmul.f32 1.442695, %v1325_v35  ;;  %v4067_v48 = vpack.c.bf16 %v4277_v44, %v4276_v45 }
 0x9d3   :  { %v1478_v51 = vpop.permute.xlu0 %1477  ;;  %v4270_v16 = vpop.permute.xlu1 %4269 }
 0x9d4   :  { %4428 = vpow2.f32 %v1330_v50  ;;  %v4272_v33 = vunpack.i.h.bf16 %v4270_v16  ;;  %v4271_v34 = vunpack.i.l.bf16 %v4270_v16 }
 0x9d6   :  { %v5205_v53 = vpop.eup %4424  ;;  %v4063_v42 = vpack.c.bf16 %v4272_v33, %v4271_v34 }
 0x9d7   :  { %3661 = vmatmul.mubr.msk.f32.vlgmr.msra.gmra.mrb[10].mxu0 %vm1312_vm9, %v5205_v53  ;;  %v4280_v21 = vpop.permute.xlu0 %4279  ;;  %v4285_v58 = vpop.permute.xlu1 %4284 }
 0x9d8   :  { %4061 = vmatpush3.bf16.xpose.msk.msra.mxu0 %vm5080_vm7, %v4059_v20  ;;  %3663 = vmatprep.mubr.msk.f32.mxu0 %vm4497_vm2, %v4498_v2  ;;  %v4282_v4 = vunpack.i.h.bf16 %v4280_v21  ;;  %v4281_v52 = vunpack.i.l.bf16 %v4280_v21  ;;  %v4287_v28 = vunpack.i.h.bf16 %v4285_v58  ;;  %v4286_v9 = vunpack.i.l.bf16 %v4285_v58 }
 0x9d9   :  { %4062 = vmatprep.subr.bf16.mxu0 %v4495_v0 }
 0x9da   :  { %v5214_v1 = vpop.eup %4426  ;;  %v4071_v13 = vpack.c.bf16 %v4282_v4, %v4281_v52  ;;  %v4075_v63 = vpack.c.bf16 %v4287_v28, %v4286_v9 }
 0x9db   :  { %v1460_v37 = vpop.permute.xlu0 %1459  ;;  %3664 = vmatmul.mubr.msk.f32.gmra.mrb[12].mxu0 %vm1312_vm9, %v5214_v1  ;;  %v1462_v3 = vpop.permute.xlu1 %1461 }
 0x9dc   :  { %3666 = vmatprep.mubr.msk.f32.mxu0 %vm4497_vm2, %v4498_v2 }
 0x9de   :  { %v5220_v40 = vpop.eup %4428 }
 0x9df   :  { %v4290_v43 = vpop.permute.xlu0 %4289  ;;  %3667 = vmatmul.mubr.msk.f32.gmra.mrb[14].mxu0 %vm1312_vm9, %v5220_v40  ;;  %v1598_v14 = vpop.permute.xlu1 %1597 }
 0x9e0   :  { %4065 = vmatpush3.bf16.xpose.msk.msra.mxu0 %vm5080_vm7, %v4063_v42  ;;  %3683 = vmatprep.mubr.msk.f32.mxu0 %vm4497_vm2, %v4498_v2  ;;  %v4292_v36 = vunpack.i.h.bf16 %v4290_v43  ;;  %v4291_v38 = vunpack.i.l.bf16 %v4290_v43 }
 0x9e1   :  { %4066 = vmatprep.subr.bf16.mxu0 %v4495_v0 }
 0x9e3   :  { %v1464_v46 = vpop.permute.xlu0 %1463  ;;  %v1582_v60 = vpop.permute.xlu1 %1581 }
 0x9e7   :  { %v1580_v49 = vpop.permute.xlu0 %1579  ;;  %v1748_v50 = vpop.permute.xlu1 %1747 }
 0x9e8   :  { %4069 = vmatpush3.bf16.xpose.msk.msra.mxu0 %vm5080_vm7, %v4067_v48 }
 0x9e9   :  { %3681 = vmatprep.subr.mxu0 %v4498_v2 }
 0x9eb   :  { %v1584_v61 = vpop.permute.xlu0 %1583 }
 0x9ef   :  { %v4295_v7 = vpop.permute.xlu0 %4294 }
 0x9f0   :  { %v4297_v10 = vunpack.i.h.bf16 %v4295_v7  ;;  %v4296_v18 = vunpack.i.l.bf16 %v4295_v7  ;;  %3682 = vmatpush3.xpose.msk.msra.mxu0 %vm1084_vm6, %v1478_v51  ;;  %v4079_v51 = vpack.c.bf16 %v4292_v36, %v4291_v38 }
 0x9f1   :  { %4070 = vmatprep.subr.bf16.mxu0 %v4495_v0 }
 0x9f2   :  { %v4083_v23 = vpack.c.bf16 %v4297_v10, %v4296_v18 }
 0x9f3   :  { %3684 = vmatmul.mubr.msk.f32.vlgmr.msra.gmra.mrb[16].mxu0 %vm1084_vm6, %v1460_v37  ;;  %v4300_v15 = vpop.permute.xlu0 %4299 }
 0x9f4   :  { %v4302_v24 = vunpack.i.h.bf16 %v4300_v15  ;;  %v4301_v27 = vunpack.i.l.bf16 %v4300_v15  ;;  %4073 = vmatpush3.bf16.xpose.msk.msra.mxu0 %vm5080_vm7, %v4071_v13  ;;  %4084 = vmatpush3.bf16.msra.mxu1 %v4083_v23 }
 0x9f5   :  { %3686 = vmatprep.mubr.msk.f32.mxu0 %vm4497_vm2, %v4498_v2  ;;  %4085 = vmatprep.subr.bf16.mxu1 %v4495_v0 }
 0x9f6   :  { %v4086_v31 = vpack.c.bf16 %v4302_v24, %v4301_v27  ;;  %4074 = vmatprep.subr.bf16.mxu0 %v4495_v0 }
 0x9f7   :  { %3687 = vmatmul.mubr.msk.f32.gmra.mrb[18].mxu0 %vm1084_vm6, %v1462_v3  ;;  %v4305_v32 = vpop.permute.xlu0 %4304 }
 0x9f8   :  { %v4307_v54 = vunpack.i.h.bf16 %v4305_v32  ;;  %v4306_v59 = vunpack.i.l.bf16 %v4305_v32  ;;  %4087 = vmatpush3.bf16.msra.mxu1 %v4086_v31  ;;  %3689 = vmatprep.mubr.msk.f32.mxu0 %vm4497_vm2, %v4498_v2 }
 0x9f9   :  { %4088 = vmatprep.subr.bf16.mxu1 %v4495_v0 }
 0x9fa   :  { %v4089_v35 = vpack.c.bf16 %v4307_v54, %v4306_v59 }
 0x9fb   :  { %3690 = vmatmul.mubr.msk.f32.gmra.mrb[20].mxu0 %vm1084_vm6, %v1464_v46 }
 0x9fc   :  { %4077 = vmatpush3.bf16.xpose.msk.msra.mxu0 %vm5080_vm7, %v4075_v63  ;;  %4090 = vmatpush3.bf16.msra.mxu1 %v4089_v35 }
 0x9fd   :  { %3727 = vmatprep.subr.mxu1 %v4498_v2  ;;  %4078 = vmatprep.subr.bf16.mxu0 %v4495_v0 }
 0x9fe   :  { %3706 = vmatprep.mubr.msk.f32.mxu0 %vm4497_vm2, %v4498_v2 }
 0xa00   :  { %3728 = vmatpush3.msk.msra.mxu1 %vm1373_vm8, %v1748_v50 }
 0xa01   :  { %4091 = vmatprep.subr.bf16.mxu1 %v4495_v0 }
 0xa04   :  { %4081 = vmatpush3.bf16.xpose.msk.msra.mxu0 %vm5080_vm7, %v4079_v51 }
 0xa05   :  { %3704 = vmatprep.subr.mxu0 %v4498_v2 }
 0xa0c   :  { %3705 = vmatpush3.xpose.msk.msra.mxu0 %vm1084_vm6, %v1598_v14 }
 0xa0d   :  { %4115 = vmatprep.subr.bf16.mxu0 %v4495_v0 }
 0xa0f   :  { %3707 = vmatmul.mubr.msk.f32.vlgmr.msra.gmra.mrb[16].mxu0 %vm1084_vm6, %v1580_v49 }
 0xa10   :  { %3709 = vmatprep.mubr.msk.f32.mxu0 %vm4497_vm2, %v4498_v2 }
 0xa13   :  { %3710 = vmatmul.mubr.msk.f32.gmra.mrb[18].mxu0 %vm1084_vm6, %v1582_v60 }
 0xa14   :  { %3712 = vmatprep.mubr.msk.f32.mxu0 %vm4497_vm2, %v4498_v2 }
 0xa17   :  { %3713 = vmatmul.mubr.msk.f32.gmra.mrb[20].mxu0 %vm1084_vm6, %v1584_v61 }
 0xa18   :  { %3798 = vmatprep.mubr.msk.f32.mxu0 %vm4497_vm2, %v4498_v2 }
 0xaaa   :  { %v5268_v20 = vpop.f32.mrb[10].mxu0 }
 0xaab   :  { %v3662_v16 = vpop.f32.mrb[11].mxu0 }
 0xaae   :  { %v5270_v21 = vpop.f32.mrb[12].mxu0 }
 0xaaf   :  { %v3665_v33 = vpop.f32.mrb[13].mxu0 }
 0xab2   :  { %v5272_v34 = vpop.f32.mrb[14].mxu0 }
 0xab3   :  { %v3668_v37 = vpop.f32.mrb[15].mxu0 }
 0xae2   :  { %v1685_v42 = vpop.f32.mrb[16].mxu0 }
 0xae3   :  { %v1699_v43 = vmul.f32 0.35355338, %v1685_v42  ;;  %v3708_v44 = vpop.f32.mrb[17].mxu0 }
 0xae5   :  { %v1702_v45 = vadd.f32 %v1699_v43, %v5173_v47 }
 0xae6   :  { %v1690_v46 = vpop.f32.mrb[18].mxu0 }
 0xae7   :  { %v1700_v48 = vmul.f32 0.35355338, %v1690_v46  ;;  %v3711_v58 = vpop.f32.mrb[19].mxu0  ;;  %v1705_v49 = vsel %vm1312_vm9, %v1702_v45, -inf }
 0xae8   :  { %1706 = vmax.xlane.f32.xlu1 %v1705_v49 }
 0xae9   :  { %v1703_v61 = vadd.f32 %v1700_v48, %v5177_v62 }
 0xaea   :  { %v1695_v3 = vpop.f32.mrb[20].mxu0 }
 0xaeb   :  { %v1701_v4 = vmul.f32 0.35355338, %v1695_v3  ;;  %v3714_v52 = vpop.f32.mrb[21].mxu0  ;;  %v1708_v7 = vsel %vm1312_vm9, %v1703_v61, -inf }
 0xaec   :  { %1709 = vmax.xlane.f32.xlu0 %v1708_v7 }
 0xaed   :  { %v1704_v10 = vadd.f32 %v1701_v4, %v5182_v56 }
 0xaef   :  { %v1711_v18 = vsel %vm1319_vm10, %v1704_v10, -inf }
 0xaf0   :  { %1712 = vmax.xlane.f32.xlu0 %v1711_v18 }
 0xaf9   :  { %4314 = vrot.lane.b32.xlu1 %v5017_v55, %s4506_s18 }
 0xafd   :  { %4319 = vrot.lane.b32.xlu1 %v5046_v30, %s4506_s18 }
 0xb01   :  { %1867 = vrot.lane.b32.xlu1 %v5052_v17, %s4506_s18 }
 0xb05   :  { %4324 = vrot.lane.b32.xlu1 %v4993_v39, %s4507_s20 }
 0xb06   :  { %4309 = vrot.lane.b32.xlu0 %v4993_v39, %s4506_s18 }
 0xb09   :  { %1849 = vrot.lane.b32.xlu1 %v5058_v41, %s4506_s18 }
 0xb0a   :  { %4329 = vrot.lane.b32.xlu0 %v5017_v55, %s4507_s20 }
 0xb0d   :  { %4334 = vrot.lane.b32.xlu1 %v5046_v30, %s4507_s20 }
 0xb0e   :  { %1851 = vrot.lane.b32.xlu0 %v5064_v57, %s4506_s18 }
 0xb11   :  { %1853 = vrot.lane.b32.xlu1 %v5072_v6, %s4506_s18 }
 0xb12   :  { %1987 = vrot.lane.b32.xlu0 %v5052_v17, %s4507_s20 }
 0xb15   :  { %1969 = vrot.lane.b32.xlu1 %v5058_v41, %s4507_s20 }
 0xb16   :  { %1971 = vrot.lane.b32.xlu0 %v5064_v57, %s4507_s20 }
 0xb19   :  { %1973 = vrot.lane.b32.xlu1 %v5072_v6, %s4507_s20 }
 0xb1a   :  { %2137 = vrot.lane.b32.xlu0 %v4974_v29, %s4502_s10 }
 0xb1d   :  { %4339 = vrot.lane.b32.xlu1 %v5108_v25, %s4502_s10 }
 0xb21   :  { %4344 = vrot.lane.b32.xlu1 %v5114_v26, %s4502_s10 }
 0xb25   :  { %4349 = vrot.lane.b32.xlu1 %v4962_v19, %s4502_s10 }
 0xb75   :  { %v1707_v13 = vpop.xlane.xlu1 %1706 }
 0xb76   :  { %v1714_v23 = vsub.f32 %v1702_v45, %v1707_v13 }
 0xb78   :  { %v1717_v14 = vmul.f32 1.442695, %v1714_v23 }
 0xb79   :  { %v4315_v15 = vpop.permute.xlu1 %4314  ;;  %v1710_v24 = vpop.xlane.xlu0 %1709 }
 0xb7a   :  { %4430 = vpow2.f32 %v1717_v14  ;;  %v1715_v27 = vsub.f32 %v1703_v61, %v1710_v24  ;;  %v4317_v38 = vunpack.i.h.bf16 %v4315_v15  ;;  %v4316_v50 = vunpack.i.l.bf16 %v4315_v15 }
 0xb7c   :  { %v1719_v28 = vmul.f32 1.442695, %v1715_v27  ;;  %v4096_v33 = vpack.c.bf16 %v4317_v38, %v4316_v50 }
 0xb7d   :  { %v4320_v9 = vpop.permute.xlu1 %4319  ;;  %v1713_v31 = vpop.xlane.xlu0 %1712 }
 0xb7e   :  { %4432 = vpow2.f32 %v1719_v28  ;;  %v1716_v29 = vsub.f32 %v1704_v10, %v1713_v31  ;;  %v4322_v42 = vunpack.i.h.bf16 %v4320_v9  ;;  %v4321_v43 = vunpack.i.l.bf16 %v4320_v9 }
 0xb80   :  { %v1721_v32 = vmul.f32 1.442695, %v1716_v29  ;;  %v4100_v45 = vpack.c.bf16 %v4322_v42, %v4321_v43 }
 0xb81   :  { %v1868_v25 = vpop.permute.xlu1 %1867  ;;  %v4310_v54 = vpop.permute.xlu0 %4309 }
 0xb82   :  { %4434 = vpow2.f32 %v1721_v32  ;;  %v4312_v26 = vunpack.i.h.bf16 %v4310_v54  ;;  %v4311_v59 = vunpack.i.l.bf16 %v4310_v54 }
 0xb84   :  { %v5302_v60 = vpop.eup %4430  ;;  %v4092_v63 = vpack.c.bf16 %v4312_v26, %v4311_v59 }
 0xb85   :  { %3730 = vmatmul.mubr.msk.f32.vlgmr.msra.gmra.mrb[28].mxu1 %vm1312_vm9, %v5302_v60  ;;  %v4325_v35 = vpop.permute.xlu1 %4324  ;;  %v4330_v46 = vpop.permute.xlu0 %4329 }
 0xb86   :  { %4094 = vmatpush3.bf16.xpose.msk.msra.mxu1 %vm5080_vm7, %v4092_v63  ;;  %3732 = vmatprep.mubr.msk.f32.mxu1 %vm4497_vm2, %v4498_v2  ;;  %v4327_v61 = vunpack.i.h.bf16 %v4325_v35  ;;  %v4326_v3 = vunpack.i.l.bf16 %v4325_v35  ;;  %v4332_v24 = vunpack.i.h.bf16 %v4330_v46  ;;  %v4331_v27 = vunpack.i.l.bf16 %v4330_v46 }
 0xb87   :  { %4095 = vmatprep.subr.bf16.mxu1 %v4495_v0 }
 0xb88   :  { %v5311_v36 = vpop.eup %4432  ;;  %v4104_v10 = vpack.c.bf16 %v4327_v61, %v4326_v3 }
 0xb89   :  { %v1850_v51 = vpop.permute.xlu1 %1849  ;;  %3733 = vmatmul.mubr.msk.f32.gmra.mrb[30].mxu1 %vm1312_vm9, %v5311_v36  ;;  %v1852_v49 = vpop.permute.xlu0 %1851 }
 0xb8a   :  { %3735 = vmatprep.mubr.msk.f32.mxu1 %vm4497_vm2, %v4498_v2 }
 0xb8c   :  { %v5317_v16 = vpop.eup %4434 }
 0xb8d   :  { %v4335_v37 = vpop.permute.xlu1 %4334  ;;  %3736 = vmatmul.mubr.msk.f32.gmra.mrb[32].mxu1 %vm1312_vm9, %v5317_v16  ;;  %v1988_v13 = vpop.permute.xlu0 %1987 }
 0xb8e   :  { %4098 = vmatpush3.bf16.xpose.msk.msra.mxu1 %vm5080_vm7, %v4096_v33  ;;  %3752 = vmatprep.mubr.msk.f32.mxu1 %vm4497_vm2, %v4498_v2  ;;  %v4337_v26 = vunpack.i.h.bf16 %v4335_v37  ;;  %v4336_v59 = vunpack.i.l.bf16 %v4335_v37 }
 0xb8f   :  { %4099 = vmatprep.subr.bf16.mxu1 %v4495_v0 }
 0xb90   :  { %v4112_v35 = vpack.c.bf16 %v4337_v26, %v4336_v59 }
 0xb91   :  { %v1854_v44 = vpop.permute.xlu1 %1853  ;;  %v1972_v32 = vpop.permute.xlu0 %1971 }
 0xb95   :  { %v1970_v48 = vpop.permute.xlu1 %1969  ;;  %v2138_v63 = vpop.permute.xlu0 %2137 }
 0xb96   :  { %4102 = vmatpush3.bf16.xpose.msk.msra.mxu1 %vm5080_vm7, %v4100_v45 }
 0xb97   :  { %3750 = vmatprep.subr.mxu1 %v4498_v2 }
 0xb99   :  { %v1974_v58 = vpop.permute.xlu1 %1973 }
 0xb9d   :  { %v4340_v4 = vpop.permute.xlu1 %4339 }
 0xb9e   :  { %v4342_v52 = vunpack.i.h.bf16 %v4340_v4  ;;  %v4341_v7 = vunpack.i.l.bf16 %v4340_v4  ;;  %3751 = vmatpush3.xpose.msk.msra.mxu1 %vm1084_vm6, %v1868_v25  ;;  %v4108_v25 = vpack.c.bf16 %v4332_v24, %v4331_v27 }
 0xb9f   :  { %4103 = vmatprep.subr.bf16.mxu1 %v4495_v0 }
 0xba0   :  { %v4116_v18 = vpack.c.bf16 %v4342_v52, %v4341_v7 }
 0xba1   :  { %v4345_v23 = vpop.permute.xlu1 %4344  ;;  %3753 = vmatmul.mubr.msk.f32.vlgmr.msra.gmra.mrb[34].mxu1 %vm1084_vm6, %v1850_v51 }
 0xba2   :  { %v4347_v14 = vunpack.i.h.bf16 %v4345_v23  ;;  %v4346_v15 = vunpack.i.l.bf16 %v4345_v23  ;;  %4106 = vmatpush3.bf16.xpose.msk.msra.mxu1 %vm5080_vm7, %v4104_v10  ;;  %4117 = vmatpush3.bf16.msra.mxu0 %v4116_v18 }
 0xba3   :  { %3755 = vmatprep.mubr.msk.f32.mxu1 %vm4497_vm2, %v4498_v2  ;;  %4118 = vmatprep.subr.bf16.mxu0 %v4495_v0 }
 0xba4   :  { %v4119_v28 = vpack.c.bf16 %v4347_v14, %v4346_v15  ;;  %4107 = vmatprep.subr.bf16.mxu1 %v4495_v0 }
 0xba5   :  { %v4350_v9 = vpop.permute.xlu1 %4349  ;;  %3756 = vmatmul.mubr.msk.f32.gmra.mrb[36].mxu1 %vm1084_vm6, %v1852_v49 }
 0xba6   :  { %v4352_v31 = vunpack.i.h.bf16 %v4350_v9  ;;  %v4351_v29 = vunpack.i.l.bf16 %v4350_v9  ;;  %4120 = vmatpush3.bf16.msra.mxu0 %v4119_v28  ;;  %3758 = vmatprep.mubr.msk.f32.mxu1 %vm4497_vm2, %v4498_v2 }
 0xba7   :  { %4121 = vmatprep.subr.bf16.mxu0 %v4495_v0 }
 0xba8   :  { %v4122_v54 = vpack.c.bf16 %v4352_v31, %v4351_v29 }
 0xba9   :  { %3759 = vmatmul.mubr.msk.f32.gmra.mrb[38].mxu1 %vm1084_vm6, %v1854_v44 }
 0xbaa   :  { %4110 = vmatpush3.bf16.xpose.msk.msra.mxu1 %vm5080_vm7, %v4108_v25  ;;  %4123 = vmatpush3.bf16.msra.mxu0 %v4122_v54 }
 0xbab   :  { %3796 = vmatprep.subr.mxu0 %v4498_v2  ;;  %4111 = vmatprep.subr.bf16.mxu1 %v4495_v0 }
 0xbac   :  { %3775 = vmatprep.mubr.msk.f32.mxu1 %vm4497_vm2, %v4498_v2 }
 0xbae   :  { %3797 = vmatpush3.msk.msra.mxu0 %vm1373_vm8, %v2138_v63 }
 0xbaf   :  { %4124 = vmatprep.subr.bf16.mxu0 %v4495_v0 }
 0xbb2   :  { %4114 = vmatpush3.bf16.xpose.msk.msra.mxu1 %vm5080_vm7, %v4112_v35 }
 0xbb3   :  { %3773 = vmatprep.subr.mxu1 %v4498_v2 }
 0xbba   :  { %3774 = vmatpush3.xpose.msk.msra.mxu1 %vm1084_vm6, %v1988_v13 }
 0xbbb   :  { %4148 = vmatprep.subr.bf16.mxu1 %v4495_v0 }
 0xbbd   :  { %3776 = vmatmul.mubr.msk.f32.vlgmr.msra.gmra.mrb[34].mxu1 %vm1084_vm6, %v1970_v48 }
 0xbbe   :  { %3778 = vmatprep.mubr.msk.f32.mxu1 %vm4497_vm2, %v4498_v2 }
 0xbc1   :  { %3779 = vmatmul.mubr.msk.f32.gmra.mrb[36].mxu1 %vm1084_vm6, %v1972_v32 }
 0xbc2   :  { %3781 = vmatprep.mubr.msk.f32.mxu1 %vm4497_vm2, %v4498_v2 }
 0xbc5   :  { %3782 = vmatmul.mubr.msk.f32.gmra.mrb[38].mxu1 %vm1084_vm6, %v1974_v58 }
 0xbc6   :  { %3867 = vmatprep.mubr.msk.f32.mxu1 %vm4497_vm2, %v4498_v2 }
 0xc58   :  { %v5365_v38 = vpop.f32.mrb[28].mxu1 }
 0xc59   :  { %v3731_v50 = vpop.f32.mrb[29].mxu1 }
 0xc5c   :  { %v5367_v51 = vpop.f32.mrb[30].mxu1 }
 0xc5d   :  { %v3734_v33 = vpop.f32.mrb[31].mxu1 }
 0xc60   :  { %v5369_v37 = vpop.f32.mrb[32].mxu1 }
 0xc61   :  { %v3737_v42 = vpop.f32.mrb[33].mxu1 }
 0xc90   :  { %v2075_v43 = vpop.f32.mrb[34].mxu1 }
 0xc91   :  { %v2089_v44 = vmul.f32 0.35355338, %v2075_v43  ;;  %v3777_v45 = vpop.f32.mrb[35].mxu1 }
 0xc93   :  { %v2092_v46 = vadd.f32 %v2089_v44, %v5173_v47 }
 0xc94   :  { %v2080_v48 = vpop.f32.mrb[36].mxu1 }
 0xc95   :  { %v2090_v49 = vmul.f32 0.35355338, %v2080_v48  ;;  %v3780_v58 = vpop.f32.mrb[37].mxu1  ;;  %v2095_v61 = vsel %vm1312_vm9, %v2092_v46, -inf }
 0xc96   :  { %2096 = vmax.xlane.f32.xlu0 %v2095_v61 }
 0xc97   :  { %v2093_v3 = vadd.f32 %v2090_v49, %v5177_v62 }
 0xc98   :  { %v2085_v4 = vpop.f32.mrb[38].mxu1 }
 0xc99   :  { %v2091_v52 = vmul.f32 0.35355338, %v2085_v4  ;;  %v3783_v7 = vpop.f32.mrb[39].mxu1  ;;  %v2098_v10 = vsel %vm1312_vm9, %v2093_v3, -inf }
 0xc9a   :  { %2099 = vmax.xlane.f32.xlu1 %v2098_v10 }
 0xc9b   :  { %v2094_v18 = vadd.f32 %v2091_v52, %v5182_v56 }
 0xc9d   :  { %v2101_v13 = vsel %vm1319_vm10, %v2094_v18, -inf }
 0xc9e   :  { %2102 = vmax.xlane.f32.xlu1 %v2101_v13 }
 0xcac   :  { %4354 = vrot.lane.b32.xlu0 %v4993_v39, %s4508_s21 }
 0xcaf   :  { %4359 = vrot.lane.b32.xlu1 %v5017_v55, %s4508_s21 }
 0xcb0   :  { %4364 = vrot.lane.b32.xlu0 %v5046_v30, %s4508_s21 }
 0xcb3   :  { %4374 = vrot.lane.b32.xlu1 %v5017_v55, %s4509_s22 }
 0xcb4   :  { %2257 = vrot.lane.b32.xlu0 %v5052_v17, %s4508_s21 }
 0xcb7   :  { %2241 = vrot.lane.b32.xlu1 %v5064_v57, %s4508_s21 }
 0xcb8   :  { %4369 = vrot.lane.b32.xlu0 %v4993_v39, %s4509_s22 }
 0xcbb   :  { %2377 = vrot.lane.b32.xlu1 %v5052_v17, %s4509_s22 }
 0xcbc   :  { %2239 = vrot.lane.b32.xlu0 %v5058_v41, %s4508_s21 }
 0xcbf   :  { %2361 = vrot.lane.b32.xlu1 %v5064_v57, %s4509_s22 }
 0xcc0   :  { %4379 = vrot.lane.b32.xlu0 %v5046_v30, %s4509_s22 }
 0xcc4   :  { %2243 = vrot.lane.b32.xlu0 %v5072_v6, %s4508_s21 }
 0xcc8   :  { %2359 = vrot.lane.b32.xlu0 %v5058_v41, %s4509_s22 }
 0xccc   :  { %2363 = vrot.lane.b32.xlu0 %v5072_v6, %s4509_s22 }
 0xd23   :  { %v2097_v55 = vpop.xlane.xlu0 %2096 }
 0xd24   :  { %v2104_v23 = vsub.f32 %v2092_v46, %v2097_v55 }
 0xd26   :  { %v2107_v14 = vmul.f32 1.442695, %v2104_v23 }
 0xd27   :  { %v2100_v15 = vpop.xlane.xlu1 %2099  ;;  %v4355_v17 = vpop.permute.xlu0 %4354 }
 0xd28   :  { %4436 = vpow2.f32 %v2107_v14  ;;  %v2105_v39 = vsub.f32 %v2093_v3, %v2100_v15  ;;  %v4357_v57 = vunpack.i.h.bf16 %v4355_v17  ;;  %v4356_v9 = vunpack.i.l.bf16 %v4355_v17 }
 0xd2a   :  { %v2109_v24 = vmul.f32 1.442695, %v2105_v39  ;;  %v4125_v41 = vpack.c.bf16 %v4357_v57, %v4356_v9 }
 0xd2b   :  { %v2103_v27 = vpop.xlane.xlu1 %2102  ;;  %v4365_v54 = vpop.permute.xlu0 %4364 }
 0xd2c   :  { %4438 = vpow2.f32 %v2109_v24  ;;  %v2106_v28 = vsub.f32 %v2094_v18, %v2103_v27  ;;  %v4367_v63 = vunpack.i.h.bf16 %v4365_v54  ;;  %v4366_v35 = vunpack.i.l.bf16 %v4365_v54 }
 0xd2e   :  { %v2111_v30 = vmul.f32 1.442695, %v2106_v28  ;;  %v4133_v33 = vpack.c.bf16 %v4367_v63, %v4366_v35 }
 0xd2f   :  { %v4360_v29 = vpop.permute.xlu1 %4359  ;;  %v2258_v50 = vpop.permute.xlu0 %2257 }
 0xd30   :  { %4440 = vpow2.f32 %v2111_v30  ;;  %v4362_v32 = vunpack.i.h.bf16 %v4360_v29  ;;  %v4361_v25 = vunpack.i.l.bf16 %v4360_v29 }
 0xd32   :  { %v5391_v31 = vpop.eup %4436  ;;  %v4129_v59 = vpack.c.bf16 %v4362_v32, %v4361_v25 }
 0xd33   :  { %3799 = vmatmul.mubr.msk.f32.vlgmr.msra.gmra.mrb[22].mxu0 %vm1312_vm9, %v5391_v31  ;;  %v4370_v42 = vpop.permute.xlu0 %4369  ;;  %v4375_v46 = vpop.permute.xlu1 %4374 }
 0xd34   :  { %4127 = vmatpush3.bf16.xpose.msk.msra.mxu0 %vm5080_vm7, %v4125_v41  ;;  %3801 = vmatprep.mubr.msk.f32.mxu0 %vm4497_vm2, %v4498_v2  ;;  %v4372_v43 = vunpack.i.h.bf16 %v4370_v42  ;;  %v4371_v44 = vunpack.i.l.bf16 %v4370_v42  ;;  %v4377_v58 = vunpack.i.h.bf16 %v4375_v46  ;;  %v4376_v61 = vunpack.i.l.bf16 %v4375_v46  ;;  %v4494_v46 = vld [vmem:[#allocation2 + $0x8] sm:$0xff] }
 0xd35   :  { %4128 = vmatprep.subr.bf16.mxu0 %v4495_v0 }
 0xd36   :  { %v5400_v6 = vpop.eup %4438  ;;  %v4137_v48 = vpack.c.bf16 %v4372_v43, %v4371_v44  ;;  %v4141_v4 = vpack.c.bf16 %v4377_v58, %v4376_v61  ;;  %v4491_v43 = vld [vmem:[#allocation2 + $0x18] sm:$0xff]  ;;  %v1726_v58 = vsel %vm1312_vm9, %v5311_v36, 0.0 }
 0xd37   :  { %3802 = vmatmul.mubr.msk.f32.gmra.mrb[24].mxu0 %vm1312_vm9, %v5400_v6  ;;  %v2240_v45 = vpop.permute.xlu0 %2239  ;;  %v2242_v3 = vpop.permute.xlu1 %2241 }
 0xd38   :  { %3804 = vmatprep.mubr.msk.f32.mxu0 %vm4497_vm2, %v4498_v2 }
 0xd3a   :  { %v5406_v26 = vpop.eup %4440 }
 0xd3b   :  { %3805 = vmatmul.mubr.msk.f32.gmra.mrb[26].mxu0 %vm1312_vm9, %v5406_v26  ;;  %v4380_v49 = vpop.permute.xlu0 %4379  ;;  %v2378_v13 = vpop.permute.xlu1 %2377 }
 0xd3c   :  { %4131 = vmatpush3.bf16.xpose.msk.msra.mxu0 %vm5080_vm7, %v4129_v59  ;;  %3821 = vmatprep.mubr.msk.f32.mxu0 %vm4497_vm2, %v4498_v2  ;;  %v4382_v7 = vunpack.i.h.bf16 %v4380_v49  ;;  %v4381_v10 = vunpack.i.l.bf16 %v4380_v49  ;;  %v2113_v49 = vsel %vm1312_vm9, %v5391_v31, 0.0 }
 0xd3d   :  { %4132 = vmatprep.subr.bf16.mxu0 %v4495_v0 }
 0xd3e   :  { %v4145_v18 = vpack.c.bf16 %v4382_v7, %v4381_v10 }
 0xd3f   :  { %v2244_v52 = vpop.permute.xlu0 %2243  ;;  %v2362_v23 = vpop.permute.xlu1 %2361 }
 0xd43   :  { %v2360_v55 = vpop.permute.xlu0 %2359 }
 0xd44   :  { %4135 = vmatpush3.bf16.xpose.msk.msra.mxu0 %vm5080_vm7, %v4133_v33 }
 0xd45   :  { %3819 = vmatprep.subr.mxu0 %v4498_v2 }
 0xd47   :  { %v2364_v11 = vpop.permute.xlu0 %2363 }
 0xd4c   :  { %3820 = vmatpush3.xpose.msk.msra.mxu0 %vm1084_vm6, %v2258_v50 }
 0xd4d   :  { %4136 = vmatprep.subr.bf16.mxu0 %v4495_v0 }
 0xd4f   :  { %3822 = vmatmul.mubr.msk.f32.vlgmr.msra.gmra.mrb[28].mxu0 %vm1084_vm6, %v2240_v45  ;;  %v4492_v45 = vld [vmem:[#allocation2 + $0x30] sm:$0x3] }
 0xd50   :  { %4139 = vmatpush3.bf16.xpose.msk.msra.mxu0 %vm5080_vm7, %v4137_v48  ;;  %3824 = vmatprep.mubr.msk.f32.mxu0 %vm4497_vm2, %v4498_v2 }
 0xd51   :  { %4140 = vmatprep.subr.bf16.mxu0 %v4495_v0 }
 0xd53   :  { %3825 = vmatmul.mubr.msk.f32.gmra.mrb[30].mxu0 %vm1084_vm6, %v2242_v3 }
 0xd54   :  { %3827 = vmatprep.mubr.msk.f32.mxu0 %vm4497_vm2, %v4498_v2 }
 0xd57   :  { %3828 = vmatmul.mubr.msk.f32.gmra.mrb[32].mxu0 %vm1084_vm6, %v2244_v52 }
 0xd58   :  { %4143 = vmatpush3.bf16.xpose.msk.msra.mxu0 %vm5080_vm7, %v4141_v4  ;;  %3844 = vmatprep.mubr.msk.f32.mxu0 %vm4497_vm2, %v4498_v2 }
 0xd59   :  { %4144 = vmatprep.subr.bf16.mxu0 %v4495_v0 }
 0xd60   :  { %4147 = vmatpush3.bf16.xpose.msk.msra.mxu0 %vm5080_vm7, %v4145_v18 }
 0xd61   :  { %3842 = vmatprep.subr.mxu0 %v4498_v2 }
 0xd68   :  { %3843 = vmatpush3.xpose.msk.msra.mxu0 %vm1084_vm6, %v2378_v13 }
 0xd69   :  { %4163 = vmatprep.subr.bf16.mxu0 %v4495_v0 }
 0xd6b   :  { %3845 = vmatmul.mubr.msk.f32.vlgmr.msra.gmra.mrb[28].mxu0 %vm1084_vm6, %v2360_v55 }
 0xd6c   :  { %3847 = vmatprep.mubr.msk.f32.mxu0 %vm4497_vm2, %v4498_v2 }
 0xd6f   :  { %3848 = vmatmul.mubr.msk.f32.gmra.mrb[30].mxu0 %vm1084_vm6, %v2362_v23 }
 0xd70   :  { %3850 = vmatprep.mubr.msk.f32.mxu0 %vm4497_vm2, %v4498_v2 }
 0xd73   :  { %3851 = vmatmul.mubr.msk.f32.gmra.mrb[32].mxu0 %vm1084_vm6, %v2364_v11 }
 0xd74   :  { %3901 = vmatprep.mubr.msk.f32.mxu0 %vm4497_vm2, %v4498_v2 }
 0xe06   :  { %v5449_v14 = vpop.f32.mrb[22].mxu0 }
 0xe07   :  { %v3800_v15 = vpop.f32.mrb[23].mxu0 }
 0xe0a   :  { %v5451_v39 = vpop.f32.mrb[24].mxu0 }
 0xe0b   :  { %v3803_v24 = vpop.f32.mrb[25].mxu0 }
 0xe0e   :  { %v5453_v17 = vpop.f32.mrb[26].mxu0 }
 0xe0f   :  { %v3806_v27 = vpop.f32.mrb[27].mxu0 }
 0xe3e   :  { %v2465_v28 = vpop.f32.mrb[28].mxu0 }
 0xe3f   :  { %v2479_v57 = vmul.f32 0.35355338, %v2465_v28  ;;  %v3846_v9 = vpop.f32.mrb[29].mxu0 }
 0xe40   :  { %v1729_v9 = vsel %vm1319_vm10, %v5317_v16, 0.0  ;;  %v1332_v16 = vsel %vm1312_vm9, %v5205_v53, 0.0 }
 0xe41   :  { %v2482_v30 = vadd.f32 %v2479_v57, %v5173_v47  ;;  %v4490_v47 = vld [vmem:[#allocation2 + $0x10] sm:$0xff] }
 0xe42   :  { %v2470_v41 = vpop.f32.mrb[30].mxu0  ;;  %v4388_v44 = vpack.i.bf16 %v4491_v43, %v4490_v47 }
 0xe43   :  { %v2480_v29 = vmul.f32 0.35355338, %v2470_v41  ;;  %v3849_v32 = vpop.f32.mrb[31].mxu0  ;;  %v2485_v25 = vsel %vm1312_vm9, %v2482_v30, -inf }
 0xe44   :  { %2486 = vmax.xlane.f32.xlu1 %v2485_v25 }
 0xe45   :  { %v2483_v54 = vadd.f32 %v2480_v29, %v5177_v62  ;;  %v4493_v62 = vld [vmem:[#allocation2] sm:$0xff] }
 0xe46   :  { %v2475_v59 = vpop.f32.mrb[32].mxu0  ;;  %v4383_v48 = vpack.i.bf16 %v4494_v46, %v4493_v62 }
 0xe47   :  { %v2481_v63 = vmul.f32 0.35355338, %v2475_v59  ;;  %v3852_v35 = vpop.f32.mrb[33].mxu0  ;;  %v2488_v50 = vsel %vm1312_vm9, %v2483_v54, -inf  ;;  %v2119_v59 = vsel %vm1319_vm10, %v5406_v26, 0.0  ;;  %v1338_v26 = vsel %vm1319_vm10, %v5220_v40, 0.0 }
 0xe48   :  { %2489 = vmax.xlane.f32.xlu0 %v2488_v50  ;;  %v1335_v35 = vsel %vm1312_vm9, %v5214_v1, 0.0 }
 0xe49   :  { %v2484_v33 = vadd.f32 %v2481_v63, %v5182_v56  ;;  %v1723_v56 = vsel %vm1312_vm9, %v5302_v60, 0.0 }
 0xe4b   :  { %v2491_v42 = vsel %vm1319_vm10, %v2484_v33, -inf }
 0xe4c   :  { %2492 = vmax.xlane.f32.xlu0 %v2491_v42 }
 0xe55   :  { %4389 = vrot.lane.b32.xlu1 %v4388_v44, %s4510_s23 }
 0xe59   :  { %4394 = vrot.lane.b32.xlu1 %v4962_v19, %s4510_s23  ;;  %v2116_v19 = vsel %vm1312_vm9, %v5400_v6, 0.0 }
 0xe5d   :  { %2527 = vrot.lane.b32.xlu1 %v4492_v45, %s4510_s23 }
 0xe62   :  { %4384 = vrot.lane.b32.xlu0 %v4383_v48, %s4510_s23 }
 0xe81   :  { %2114 = vadd.xlane.f32.xlu1 %v2113_v49  ;;  %1724 = vadd.xlane.f32.xlu0 %v1723_v56 }
 0xe85   :  { %1727 = vadd.xlane.f32.xlu0 %v1726_v58 }
 0xe89   :  { %2117 = vadd.xlane.f32.xlu0 %v2116_v19 }
 0xed1   :  { %v2487_v61 = vpop.xlane.xlu1 %2486 }
 0xed2   :  { %v2494_v3 = vsub.f32 %v2482_v30, %v2487_v61 }
 0xed4   :  { %v2497_v4 = vmul.f32 1.442695, %v2494_v3 }
 0xed5   :  { %v2490_v52 = vpop.xlane.xlu0 %2489  ;;  %v4390_v18 = vpop.permute.xlu1 %4389 }
 0xed6   :  { %4442 = vpow2.f32 %v2497_v4  ;;  %v2495_v7 = vsub.f32 %v2483_v54, %v2490_v52  ;;  %v4392_v6 = vunpack.i.h.bf16 %v4390_v18  ;;  %v4391_v24 = vunpack.i.l.bf16 %v4390_v18 }
 0xed8   :  { %v2499_v31 = vmul.f32 1.442695, %v2495_v7  ;;  %v4152_v30 = vpack.c.bf16 %v4392_v6, %v4391_v24 }
 0xed9   :  { %v2493_v10 = vpop.xlane.xlu0 %2492  ;;  %v4395_v28 = vpop.permute.xlu1 %4394 }
 0xeda   :  { %4444 = vpow2.f32 %v2499_v31  ;;  %v2496_v60 = vsub.f32 %v2484_v33, %v2493_v10  ;;  %v4397_v41 = vunpack.i.h.bf16 %v4395_v28  ;;  %v4396_v29 = vunpack.i.l.bf16 %v4395_v28 }
 0xedc   :  { %v2501_v13 = vmul.f32 1.442695, %v2496_v60  ;;  %v4155_v54 = vpack.c.bf16 %v4397_v41, %v4396_v29 }
 0xedd   :  { %v4385_v55 = vpop.permute.xlu0 %4384  ;;  %v2528_v50 = vpop.permute.xlu1 %2527 }
 0xede   :  { %4446 = vpow2.f32 %v2501_v13  ;;  %v4387_v36 = vunpack.i.h.bf16 %v4385_v55  ;;  %v4386_v23 = vunpack.i.l.bf16 %v4385_v55 }
 0xee0   :  { %v4443_v11 = vpop.eup %4442  ;;  %v4149_v15 = vpack.c.bf16 %v4387_v36, %v4386_v23 }
 0xee1   :  { %v2503_v27 = vsel %vm1312_vm9, %v4443_v11, 0.0 }
 0xee2   :  { %2504 = vadd.xlane.f32.xlu0 %v2503_v27  ;;  %4150 = vmatpush3.bf16.msra.mxu1 %v4149_v15 }
 0xee3   :  { %4151 = vmatprep.subr.bf16.mxu1 %v4495_v0 }
 0xee4   :  { %v4445_v57 = vpop.eup %4444 }
 0xee5   :  { %v2506_v32 = vsel %vm1312_vm9, %v4445_v57, 0.0 }
 0xee6   :  { %2507 = vadd.xlane.f32.xlu1 %v2506_v32  ;;  %1730 = vadd.xlane.f32.xlu0 %v1729_v9 }
 0xee7   :  { %4153 = vmatpush3.bf16.msra.mxu1 %v4152_v30 }
 0xee8   :  { %v4447_v25 = vpop.eup %4446  ;;  %4154 = vmatprep.subr.bf16.mxu1 %v4495_v0 }
 0xee9   :  { %v2509_v63 = vsel %vm1319_vm10, %v4447_v25, 0.0 }
 0xeea   :  { %2120 = vadd.xlane.f32.xlu1 %v2119_v59  ;;  %2510 = vadd.xlane.f32.xlu0 %v2509_v63 }
 0xeeb   :  { %4156 = vmatpush3.bf16.msra.mxu1 %v4155_v54 }
 0xeec   :  { %3865 = vmatprep.subr.mxu1 %v4498_v2 }
 0xeee   :  { %1333 = vadd.xlane.f32.xlu1 %v1332_v16  ;;  %1336 = vadd.xlane.f32.xlu0 %v1335_v35 }
 0xeef   :  { %3866 = vmatpush3.msk.msra.mxu1 %vm1373_vm8, %v2528_v50 }
 0xef0   :  { %3868 = vmatmul.mubr.msk.f32.vlgmr.msra.gmra.mrb[40].mxu1 %vm1312_vm9, %v4443_v11  ;;  %4157 = vmatprep.subr.bf16.mxu1 %v4495_v0 }
 0xef1   :  { %3870 = vmatprep.mubr.msk.f32.mxu1 %vm4497_vm2, %v4498_v2 }
 0xef2   :  { %1339 = vadd.xlane.f32.xlu1 %v1338_v26 }
 0xef4   :  { %3871 = vmatmul.mubr.msk.f32.gmra.mrb[42].mxu1 %vm1312_vm9, %v4445_v57 }
 0xef5   :  { %3873 = vmatprep.mubr.msk.f32.mxu1 %vm4497_vm2, %v4498_v2 }
 0xef8   :  { %3874 = vmatmul.mubr.msk.f32.gmra.mrb[44].mxu1 %vm1312_vm9, %v4447_v25 }
 0xef9   :  { %3884 = vmatprep.mubr.msk.f32.mxu1 %vm4497_vm2, %v4498_v2 }
 0xf0e   :  { %v2115_v53 = vpop.xlane.xlu1 %2114  ;;  %v1725_v1 = vpop.xlane.xlu0 %1724 }
 0xf0f   :  { %4448 = vrcp.f32 %v2115_v53 }
 0xf10   :  { %4450 = vrcp.f32 %v1725_v1 }
 0xf12   :  { %v1728_v33 = vpop.xlane.xlu0 %1727 }
 0xf13   :  { %4452 = vrcp.f32 %v1728_v33 }
 0xf16   :  { %v2118_v40 = vpop.xlane.xlu0 %2117 }
 0xf17   :  { %4454 = vrcp.f32 %v2118_v40 }
 0xf19   :  { %v4449_v42 = vpop.eup %4448 }
 0xf1a   :  { %v4451_v47 = vpop.eup %4450  ;;  %v2236_v43 = vmul.f32 %v4449_v42, %v5449_v14  ;;  %v2677_v14 = vld [vmem:[%s5676_s4 + $0x158] sm:$0xff] }
 0xf1b   :  { %v1846_v44 = vmul.f32 %v4451_v47, %v5365_v38  ;;  %v2676_v38 = vld [vmem:[%s5676_s4 + $0x150] sm:$0xff] }
 0xf1c   :  { %2644 = vrot.lane.b32.xlu1 %v2236_v43, %s4496_s19  ;;  %v4158_v58 = vpack.c.bf16 %v2677_v14, %v2676_v38 }
 0xf1d   :  { %v4453_v45 = vpop.eup %4452  ;;  %2632 = vrot.lane.b32.xlu0 %v1846_v44, %s4511_s24 }
 0xf1e   :  { %v1847_v62 = vmul.f32 %v4453_v45, %v5367_v51  ;;  %v2678_v51 = vld [vmem:[%s5676_s4 + $0x160] sm:$0xff]  ;;  %4159 = vmatpush3.bf16.msra.mxu1 %v4158_v58 }
 0xf1f   :  { %4160 = vmatprep.subr.bf16.mxu1 %v4495_v0 }
 0xf20   :  { %2634 = vrot.lane.b32.xlu1 %v1847_v62, %s4511_s24 }
 0xf21   :  { %v4455_v46 = vpop.eup %4454 }
 0xf22   :  { %v2237_v48 = vmul.f32 %v4455_v46, %v5451_v39  ;;  %v2679_v39 = vld [vmem:[%s5676_s4 + $0x168] sm:$0xff] }
 0xf23   :  { %v4161_v19 = vpack.c.bf16 %v2679_v39, %v2678_v51 }
 0xf24   :  { %2646 = vrot.lane.b32.xlu0 %v2237_v48, %s4496_s19 }
 0xf25   :  { %4162 = vmatpush3.bf16.msra.mxu1 %v4161_v19 }
 0xf26   :  { %4169 = vmatprep.subr.bf16.mxu1 %v4495_v0 }
 0xf6f   :  { %v2505_v49 = vpop.xlane.xlu0 %2504 }
 0xf73   :  { %v1731_v56 = vpop.xlane.xlu0 %1730  ;;  %v2508_v4 = vpop.xlane.xlu1 %2507 }
 0xf74   :  { %4456 = vrcp.f32 %v1731_v56 }
 0xf75   :  { %4458 = vrcp.f32 %v2505_v49 }
 0xf76   :  { %4460 = vrcp.f32 %v2508_v4 }
 0xf77   :  { %v2121_v52 = vpop.xlane.xlu1 %2120  ;;  %v2511_v7 = vpop.xlane.xlu0 %2510 }
 0xf78   :  { %4462 = vrcp.f32 %v2121_v52 }
 0xf79   :  { %4464 = vrcp.f32 %v2511_v7 }
 0xf7b   :  { %v1334_v28 = vpop.xlane.xlu1 %1333  ;;  %v1337_v57 = vpop.xlane.xlu0 %1336 }
 0xf7c   :  { %4466 = vrcp.f32 %v1334_v28 }
 0xf7d   :  { %4468 = vrcp.f32 %v1337_v57 }
 0xf7e   :  { %v4457_v61 = vpop.eup %4456 }
 0xf7f   :  { %v1848_v3 = vmul.f32 %v4457_v61, %v5369_v37  ;;  %v4459_v31 = vpop.eup %4458  ;;  %v1340_v9 = vpop.xlane.xlu1 %1339 }
 0xf80   :  { %v4461_v13 = vpop.eup %4460  ;;  %4470 = vrcp.f32 %v1340_v9 }
 0xf81   :  { %2636 = vrot.lane.b32.xlu0 %v1848_v3, %s4511_s24 }
 0xf82   :  { %v4463_v11 = vpop.eup %4462 }
 0xf83   :  { %v4465_v37 = vpop.eup %4464  ;;  %v2238_v27 = vmul.f32 %v4463_v11, %v5453_v17 }
 0xf86   :  { %v4467_v41 = vpop.eup %4466 }
 0xf87   :  { %v1456_v32 = vmul.f32 %v4467_v41, %v5268_v20  ;;  %v4469_v59 = vpop.eup %4468 }
 0xf88   :  { %v1457_v35 = vmul.f32 %v4469_v59, %v5270_v21 }
 0xf8a   :  { %v4471_v26 = vpop.eup %4470 }
 0xf8b   :  { %v1458_v42 = vmul.f32 %v4471_v26, %v5272_v34  ;;  %v3311_v34 = vld [vmem:[%s5679_s5 + $0xb] ss:$0 sm:$0xff]  ;;  %v2940_v26 = vld [vmem:[%s5676_s4 + $0x1a0] sm:$0xff] }
 0xf8e   :  { %v2645_v30 = vpop.permute.xlu1 %2644 }
 0xf8f   :  { %v2633_v29 = vpop.permute.xlu0 %2632 }
 0xf90   :  { %v2666_v54 = vsel %vm2665_vm11, %v1456_v32, %v2633_v29 }
 0xf91   :  { %v2669_v63 = vsel %vm372_vm3, %v2666_v54, %v2645_v30 }
 0xf92   :  { %v2635_v25 = vpop.permute.xlu1 %2634 }
 0xf93   :  { %v2667_v53 = vsel %vm2665_vm11, %v1457_v35, %v2635_v25  ;;  %v2939_v35 = vld [vmem:[%s5676_s4 + $0x198] sm:$0xff] }
 0xf96   :  { %v2647_v17 = vpop.permute.xlu0 %2646 }
 0xf97   :  { %v2670_v20 = vsel %vm372_vm3, %v2667_v53, %v2647_v17  ;;  %v2941_v53 = vld [vmem:[%s5676_s4 + $0x1a8] sm:$0xff] }
 0xfc3   :  { %v2612_v10 = vpop.f32.mrb[40].mxu1 }
 0xfc4   :  { %v2626_v60 = vmul.f32 %v4459_v31, %v2612_v10  ;;  %v3869_v18 = vpop.f32.mrb[41].mxu1  ;;  %v2813_v31 = vld [vmem:[%s5676_s4 + $0x170] sm:$0xff] }
 0xfc5   :  { %v2816_v18 = vld [vmem:[%s5676_s4 + $0x188] sm:$0xff] }
 0xfc6   :  { %2656 = vrot.lane.b32.xlu1 %v2626_v60, %s4512_s9  ;;  %v2815_v60 = vld [vmem:[%s5676_s4 + $0x180] sm:$0xff] }
 0xfc7   :  { %v2617_v55 = vpop.f32.mrb[42].mxu1 }
 0xfc8   :  { %v2627_v36 = vmul.f32 %v4461_v13, %v2617_v55  ;;  %v3872_v23 = vpop.f32.mrb[43].mxu1  ;;  %v4167_v13 = vpack.c.bf16 %v2816_v18, %v2815_v60 }
 0xfca   :  { %2658 = vrot.lane.b32.xlu1 %v2627_v36, %s4512_s9 }
 0xfcb   :  { %v2622_v15 = vpop.f32.mrb[44].mxu1 }
 0xfcc   :  { %v2628_v6 = vmul.f32 %v4465_v37, %v2622_v15  ;;  %v3875_v24 = vpop.f32.mrb[45].mxu1  ;;  %v2780_v15 = vld [vmem:[%s5679_s5 + $0x8] sm:$0x1] }
 0xfce   :  { %2648 = vrot.lane.b32.xlu1 %v2238_v27, %s4496_s19  ;;  %2660 = vrot.lane.b32.xlu0 %v2628_v6, %s4512_s9  ;;  %v2805_v27 = vadd.f32 1.0, %v2780_v15 }
 0xfd0   :  { %v2809_v9 = vrot.slane %v2805_v27, %v4707_v22 }
 0xff3   :  { %v2637_v1 = vpop.permute.xlu0 %2636 }
 0xff4   :  { %v2668_v21 = vsel %vm2665_vm11, %v1458_v42, %v2637_v1  ;;  %v2942_v1 = vld [vmem:[%s5676_s4 + $0x1b0] sm:$0xff]  ;;  %v2944_v42 = vld [vmem:[%s5676_s4 + $0x1c0] sm:$0xff] }
0x1038   :  { %v2657_v16 = vpop.permute.xlu1 %2656 }
0x1039   :  { %v2673_v50 = vsel %vm2672_vm12, %v2669_v63, %v2657_v16  ;;  %v2938_v16 = vld [vmem:[%s5676_s4 + $0x190] sm:$0xff] }
0x103a   :  { %3885 = vmatmul.mubr.msk.f32.vlgmr.msra.gmra.mrb[46].mxu1 %vm146_vm1, %v2673_v50  ;;  %v4170_v50 = vpack.c.bf16 %v2939_v35, %v2938_v16 }
0x103b   :  { %3887 = vmatprep.mubr.msk.f32.mxu1 %vm4497_vm2, %v4498_v2 }
0x103c   :  { %v2659_v33 = vpop.permute.xlu1 %2658  ;;  %4171 = vmatpush3.bf16.msra.mxu1 %v4170_v50 }
0x103d   :  { %v2674_v40 = vsel %vm2672_vm12, %v2670_v20, %v2659_v33  ;;  %4172 = vmatprep.subr.bf16.mxu1 %v4495_v0  ;;  %v4173_v20 = vpack.c.bf16 %v2941_v53, %v2940_v26  ;;  %v2943_v33 = vld [vmem:[%s5676_s4 + $0x1b8] sm:$0xff] }
0x103e   :  { %3888 = vmatmul.mubr.msk.f32.gmra.mrb[48].mxu1 %vm146_vm1, %v2674_v40  ;;  %v4176_v40 = vpack.c.bf16 %v2943_v33, %v2942_v1 }
0x103f   :  { %3890 = vmatprep.mubr.msk.f32.mxu1 %vm4497_vm2, %v4498_v2 }
0x1040   :  { %v2649_v47 = vpop.permute.xlu1 %2648  ;;  %v2661_v43 = vpop.permute.xlu0 %2660  ;;  %4174 = vmatpush3.bf16.msra.mxu1 %v4173_v20 }
0x1041   :  { %v2671_v44 = vsel %vm372_vm3, %v2668_v21, %v2649_v47  ;;  %4175 = vmatprep.subr.bf16.mxu1 %v4495_v0  ;;  %v2945_v21 = vld [vmem:[%s5676_s4 + $0x1c8] sm:$0xff] }
0x1042   :  { %v2675_v45 = vsel %vm2672_vm12, %v2671_v44, %v2661_v43  ;;  %v4179_v47 = vpack.c.bf16 %v2945_v21, %v2944_v42  ;;  %v3312_v43 = vld [vmem:[%s5679_s5 + $0xc] ss:$0 sm:$0xff]  ;;  %v3080_v42 = vld [vmem:[%s5676_s4 + $0x1d8] sm:$0xff] }
0x1043   :  { %3891 = vmatmul.mubr.msk.f32.gmra.mrb[50].mxu1 %vm146_vm1, %v2675_v45 }
0x1044   :  { %3926 = vmatprep.mubr.msk.f32.mxu1 %vm4497_vm2, %v4498_v2  ;;  %4177 = vmatpush3.bf16.msra.mxu1 %v4176_v40 }
0x1045   :  { %4178 = vmatprep.subr.bf16.mxu1 %v4495_v0 }
0x1048   :  { %4180 = vmatpush3.bf16.msra.mxu1 %v4179_v47  ;;  %v3082_v47 = vld [vmem:[%s5676_s4 + $0x1e8] sm:$0xff] }
0x1049   :  { %4187 = vmatprep.subr.bf16.mxu1 %v4495_v0 }
0x110d   :  { %v2755_v62 = vpop.f32.mrb[46].mxu1 }
0x110e   :  { %v2769_v46 = vadd.f32 %v2755_v62, %v4840_v5  ;;  %v3886_v48 = vpop.f32.mrb[47].mxu1 }
0x1110   :  { %v5545_v49 = vadd.f32 %v3311_v34, %v2769_v46 }
0x1111   :  { %v2760_v56 = vpop.f32.mrb[48].mxu1 }
0x1112   :  { %v2770_v38 = vadd.f32 %v2760_v56, %v4844_v8  ;;  %v3889_v14 = vpop.f32.mrb[49].mxu1  ;;  %v2781_v51 = vmul.f32 %v5545_v49, %v5545_v49 }
0x1114   :  { %v5550_v58 = vadd.f32 %v3311_v34, %v2770_v38  ;;  %v2784_v39 = vsel %vm146_vm1, %v2781_v51, 0.0 }
0x1115   :  { %2785 = vadd.xlane.f32.xlu1 %v2784_v39 }
0x1116   :  { %v2765_v19 = vpop.f32.mrb[50].mxu1  ;;  %v2782_v61 = vmul.f32 %v5550_v58, %v5550_v58 }
0x1117   :  { %v2771_v5 = vadd.f32 %v2765_v19, %v4849_v12  ;;  %v3892_v3 = vpop.f32.mrb[51].mxu1  ;;  %v2814_v12 = vld [vmem:[%s5676_s4 + $0x178] sm:$0xff] }
0x1118   :  { %v2787_v4 = vsel %vm146_vm1, %v2782_v61, 0.0  ;;  %v4164_v10 = vpack.c.bf16 %v2814_v12, %v2813_v31 }
0x1119   :  { %v5557_v52 = vadd.f32 %v3311_v34, %v2771_v5  ;;  %2788 = vadd.xlane.f32.xlu0 %v2787_v4 }
0x111a   :  { %4165 = vmatpush3.bf16.msra.mxu0 %v4164_v10 }
0x111b   :  { %v2783_v8 = vmul.f32 %v5557_v52, %v5557_v52  ;;  %4166 = vmatprep.subr.bf16.mxu0 %v4495_v0 }
0x111d   :  { %v2790_v7 = vsel %vm749_vm4, %v2783_v8, 0.0 }
0x111e   :  { %2791 = vadd.xlane.f32.xlu0 %v2790_v7  ;;  %4168 = vmatpush3.bf16.msra.mxu0 %v4167_v13 }
0x111f   :  { %4181 = vmatprep.subr.bf16.mxu0 %v4495_v0 }
0x11a2   :  { %v2786_v55 = vpop.xlane.xlu1 %2785 }
0x11a3   :  { %v2793_v36 = vmul.f32 0.03125, %v2786_v55 }
0x11a5   :  { %v2796_v23 = vadd.f32 1e-06, %v2793_v36 }
0x11a6   :  { %v2789_v11 = vpop.xlane.xlu0 %2788 }
0x11a7   :  { %4472 = vrsqrt.f32 %v2796_v23  ;;  %v2794_v37 = vmul.f32 0.03125, %v2789_v11 }
0x11a9   :  { %v2797_v6 = vadd.f32 1e-06, %v2794_v37 }
0x11ab   :  { %4474 = vrsqrt.f32 %v2797_v6  ;;  %v2792_v24 = vpop.xlane.xlu0 %2791 }
0x11ac   :  { %v2795_v28 = vmul.f32 0.03125, %v2792_v24 }
0x11ae   :  { %v2798_v57 = vadd.f32 1e-06, %v2795_v28 }
0x11b0   :  { %4476 = vrsqrt.f32 %v2798_v57 }
0x11b1   :  { %v4473_v30 = vpop.eup %4472 }
0x11b2   :  { %v2802_v41 = vmul.f32 %v4473_v30, %v5545_v49 }
0x11b4   :  { %v2810_v29 = vmul.f32 %v2809_v9, %v2802_v41  ;;  %v3319_v41 = vld [vmem:[%s5679_s5 + $0xd] ss:$0 sm:$0xff] }
0x11b5   :  { %v4475_v32 = vpop.eup %4474 }
0x11b6   :  { %3902 = vmatmul.mubr.msk.f32.vlgmr.msra.gmra.mrb[34].mxu0 %vm146_vm1, %v2810_v29  ;;  %v2803_v25 = vmul.f32 %v4475_v32, %v5550_v58 }
0x11b7   :  { %3904 = vmatprep.mubr.msk.f32.mxu0 %vm4497_vm2, %v4498_v2 }
0x11b8   :  { %v2811_v54 = vmul.f32 %v2809_v9, %v2803_v25 }
0x11ba   :  { %v4477_v59 = vpop.eup %4476  ;;  %3905 = vmatmul.mubr.msk.f32.gmra.mrb[36].mxu0 %vm146_vm1, %v2811_v54 }
0x11bb   :  { %3907 = vmatprep.mubr.msk.f32.mxu0 %vm4497_vm2, %v4498_v2  ;;  %v2804_v17 = vmul.f32 %v4477_v59, %v5557_v52 }
0x11bd   :  { %v2812_v63 = vmul.f32 %v2809_v9, %v2804_v17 }
0x11bf   :  { %3908 = vmatmul.mubr.msk.f32.gmra.mrb[38].mxu0 %vm146_vm1, %v2812_v63 }
0x11c0   :  { %3943 = vmatprep.mubr.msk.f32.mxu0 %vm4497_vm2, %v4498_v2 }
0x1289   :  { %v2897_v44 = vpop.f32.mrb[34].mxu0 }
0x128a   :  { %v2898_v45 = vadd.f32 %v3312_v43, %v2897_v44  ;;  %v3903_v62 = vpop.f32.mrb[35].mxu0 }
0x128c   :  { %v2911_v34 = vmul.f32 %v2898_v45, %v2898_v45 }
0x128d   :  { %v2902_v46 = vpop.f32.mrb[36].mxu0 }
0x128e   :  { %v2914_v48 = vmul.f32 %v2911_v34, %v2898_v45  ;;  %v2903_v56 = vadd.f32 %v3312_v43, %v2902_v46  ;;  %v3906_v38 = vpop.f32.mrb[37].mxu0 }
0x1290   :  { %v2917_v14 = vmul.f32 0.044715, %v2914_v48  ;;  %v2912_v51 = vmul.f32 %v2903_v56, %v2903_v56  ;;  %v3046_v48 = vld [vmem:[%s5679_s5 + $0x9] sm:$0x1] }
0x1292   :  { %v2920_v39 = vadd.f32 %v2917_v14, %v2898_v45  ;;  %v2915_v19 = vmul.f32 %v2912_v51, %v2903_v56  ;;  %v2907_v61 = vpop.f32.mrb[38].mxu0  ;;  %v3071_v14 = vadd.f32 1.0, %v3046_v48 }
0x1293   :  { %v2908_v5 = vadd.f32 %v3312_v43, %v2907_v61  ;;  %v3909_v3 = vpop.f32.mrb[39].mxu0 }
0x1294   :  { %v2923_v4 = vmul.f32 0.7978846, %v2920_v39  ;;  %v2918_v8 = vmul.f32 0.044715, %v2915_v19 }
0x1295   :  { %v2913_v7 = vmul.f32 %v2908_v5, %v2908_v5 }
0x1296   :  { %4478 = vtanh.f32 %v2923_v4  ;;  %v2921_v31 = vadd.f32 %v2918_v8, %v2903_v56 }
0x1297   :  { %v2916_v12 = vmul.f32 %v2913_v7, %v2908_v5 }
0x1298   :  { %v2924_v10 = vmul.f32 0.7978846, %v2921_v31 }
0x1299   :  { %v2919_v60 = vmul.f32 0.044715, %v2916_v12 }
0x129a   :  { %4480 = vtanh.f32 %v2924_v10 }
0x129b   :  { %v2922_v18 = vadd.f32 %v2919_v60, %v2908_v5 }
0x129d   :  { %v2925_v13 = vmul.f32 0.7978846, %v2922_v18 }
0x129f   :  { %4482 = vtanh.f32 %v2925_v13 }
0x12a0   :  { %v4479_v55 = vpop.eup %4478 }
0x12a1   :  { %v2929_v36 = vadd.f32 1.0, %v4479_v55 }
0x12a3   :  { %v2932_v23 = vmul.f32 0.5, %v2929_v36 }
0x12a4   :  { %v4481_v11 = vpop.eup %4480 }
0x12a5   :  { %v2935_v37 = vmul.f32 %v2932_v23, %v2898_v45  ;;  %v2930_v15 = vadd.f32 1.0, %v4481_v11 }
0x12a7   :  { %3927 = vmatmul.mubr.msk.f32.vlgmr.msra.gmra.mrb[52].mxu1 %vm62_vm0, %v2935_v37  ;;  %v2933_v6 = vmul.f32 0.5, %v2930_v15 }
0x12a8   :  { %3929 = vmatprep.mubr.msk.f32.mxu1 %vm4497_vm2, %v4498_v2 }
0x12a9   :  { %v4483_v24 = vpop.eup %4482  ;;  %v2936_v27 = vmul.f32 %v2933_v6, %v2903_v56 }
0x12aa   :  { %v2931_v28 = vadd.f32 1.0, %v4483_v24 }
0x12ab   :  { %3930 = vmatmul.mubr.msk.f32.gmra.mrb[54].mxu1 %vm62_vm0, %v2936_v27 }
0x12ac   :  { %3932 = vmatprep.mubr.msk.f32.mxu1 %vm4497_vm2, %v4498_v2  ;;  %v2934_v57 = vmul.f32 0.5, %v2931_v28 }
0x12ae   :  { %v2937_v9 = vmul.f32 %v2934_v57, %v2908_v5 }
0x12b0   :  { %3933 = vmatmul.mubr.msk.f32.gmra.mrb[56].mxu1 %vm62_vm0, %v2937_v9 }
0x12b1   :  { %3949 = vmatprep.mubr.msk.f32.mxu1 %vm4497_vm2, %v4498_v2 }
0x137a   :  { %v3021_v30 = vpop.f32.mrb[52].mxu1 }
0x137b   :  { %v3035_v29 = vadd.f32 %v3021_v30, %v5545_v49  ;;  %v3928_v32 = vpop.f32.mrb[53].mxu1 }
0x137d   :  { %v3043_v25 = vadd.f32 %v3319_v41, %v3035_v29 }
0x137e   :  { %v3026_v54 = vpop.f32.mrb[54].mxu1 }
0x137f   :  { %v3036_v59 = vadd.f32 %v3026_v54, %v5550_v58  ;;  %v3931_v17 = vpop.f32.mrb[55].mxu1  ;;  %v3047_v63 = vmul.f32 %v3043_v25, %v3043_v25  ;;  %v3079_v58 = vld [vmem:[%s5676_s4 + $0x1d0] sm:$0xff] }
0x1380   :  { %v4182_v21 = vpack.c.bf16 %v3080_v42, %v3079_v58 }
0x1381   :  { %v3044_v16 = vadd.f32 %v3319_v41, %v3036_v59  ;;  %v3050_v35 = vsel %vm146_vm1, %v3047_v63, 0.0 }
0x1382   :  { %3051 = vadd.xlane.f32.xlu0 %v3050_v35  ;;  %4183 = vmatpush3.bf16.msra.mxu0 %v4182_v21 }
0x1383   :  { %v3031_v50 = vpop.f32.mrb[56].mxu1  ;;  %v3048_v26 = vmul.f32 %v3044_v16, %v3044_v16  ;;  %4189 = vmatpush3.bf16.msra.mxu1 %v4182_v21  ;;  %4184 = vmatprep.subr.bf16.mxu0 %v4495_v0 }
0x1384   :  { %v3037_v53 = vadd.f32 %v3031_v50, %v5557_v52  ;;  %v3934_v20 = vpop.f32.mrb[57].mxu1  ;;  %v3081_v52 = vld [vmem:[%s5676_s4 + $0x1e0] sm:$0xff]  ;;  %4188 = vmatprep.subr.bf16.mxu1 %v4495_v0  ;;  %v3075_v0 = vrot.slane %v3071_v14, %v4707_v22  ;;  %v3320_v22 = vld [vmem:[%s5679_s5 + $0xe] ss:$0 sm:$0xff] }
0x1385   :  { %v3053_v1 = vsel %vm146_vm1, %v3048_v26, 0.0  ;;  %v4185_v43 = vpack.c.bf16 %v3082_v47, %v3081_v52 }
0x1386   :  { %v3045_v33 = vadd.f32 %v3319_v41, %v3037_v53  ;;  %3054 = vadd.xlane.f32.xlu1 %v3053_v1 }
0x1387   :  { %4186 = vmatpush3.bf16.msra.mxu0 %v4185_v43  ;;  %4190 = vmatpush3.bf16.msra.mxu1 %v4185_v43 }
0x1388   :  { %v3049_v49 = vmul.f32 %v3045_v33, %v3045_v33 }
0x138a   :  { %v3056_v40 = vsel %vm749_vm4, %v3049_v49, 0.0 }
0x138b   :  { %3057 = vadd.xlane.f32.xlu0 %v3056_v40 }
0x140f   :  { %v3052_v44 = vpop.xlane.xlu0 %3051 }
0x1410   :  { %v3059_v45 = vmul.f32 0.03125, %v3052_v44 }
0x1412   :  { %v3062_v62 = vadd.f32 1e-06, %v3059_v45 }
0x1413   :  { %v3055_v34 = vpop.xlane.xlu1 %3054 }
0x1414   :  { %4484 = vrsqrt.f32 %v3062_v62  ;;  %v3060_v46 = vmul.f32 0.03125, %v3055_v34 }
0x1416   :  { %v3063_v56 = vadd.f32 1e-06, %v3060_v46 }
0x1418   :  { %4486 = vrsqrt.f32 %v3063_v56  ;;  %v3058_v38 = vpop.xlane.xlu0 %3057 }
0x1419   :  { %v3061_v51 = vmul.f32 0.03125, %v3058_v38 }
0x141b   :  { %v3064_v39 = vadd.f32 1e-06, %v3061_v51 }
0x141d   :  { %4488 = vrsqrt.f32 %v3064_v39 }
0x141e   :  { %v4485_v19 = vpop.eup %4484 }
0x141f   :  { %v3068_v61 = vmul.f32 %v4485_v19, %v3043_v25 }
0x1421   :  { %v3076_v5 = vmul.f32 %v3075_v0, %v3068_v61 }
0x1422   :  { %v4487_v3 = vpop.eup %4486 }
0x1423   :  { %3944 = vmatmul.mubr.msk.f32.vlgmr.msra.gmra.mrb[40].mxu0 %vm146_vm1, %v3076_v5  ;;  %v3069_v4 = vmul.f32 %v4487_v3, %v3044_v16 }
0x1424   :  { %3946 = vmatprep.mubr.msk.f32.mxu0 %vm4497_vm2, %v4498_v2 }
0x1425   :  { %v3077_v8 = vmul.f32 %v3075_v0, %v3069_v4 }
0x1427   :  { %v4489_v7 = vpop.eup %4488  ;;  %3947 = vmatmul.mubr.msk.f32.gmra.mrb[42].mxu0 %vm146_vm1, %v3077_v8 }
0x1428   :  { %v3070_v31 = vmul.f32 %v4489_v7, %v3045_v33 }
0x142a   :  { %v3078_v12 = vmul.f32 %v3075_v0, %v3070_v31 }
0x142c   :  { %3950 = vmatmul.mubr.msk.f32.vlgmr.msra.gmra.mrb[58].mxu1 %vm146_vm1, %v3078_v12 }
0x14f6   :  { %v3163_v10 = vpop.f32.mrb[40].mxu0 }
0x14f7   :  { %v3164_v60 = vadd.f32 %v3320_v22, %v3163_v10  ;;  %v3945_v18 = vpop.f32.mrb[41].mxu0 }
0x14f9   :  { %3177 = vst [vmem:[%s5682_s6] sm:$0xff] %v3164_v60 }
0x14fa   :  { %v3168_v2 = vpop.f32.mrb[42].mxu0 }
0x14fb   :  { %v3169_v13 = vadd.f32 %v3320_v22, %v3168_v2  ;;  %v3948_v55 = vpop.f32.mrb[43].mxu0 }
0x14fd   :  { %3178 = vst [vmem:[%s5682_s6 + $0x8] sm:$0xff] %v3169_v13 }
0x14ff   :  { %v3173_v36 = vpop.f32.mrb[58].mxu1 }
0x1500   :  { %v3174_v23 = vadd.f32 %v3320_v22, %v3173_v36  ;;  %v3951_v11 = vpop.f32.mrb[59].mxu1 }
0x1502   :  { %3179 = vst [vmem:[%s5682_s6 + $0x10] sm:$0x3] %v3174_v23 }

</bundles_post_ra>
